<compile_context>
chip_gen: v6e
topology: v6e:2x2x1
jax: 0.10.0
libtpu: 0.0.40
codegen_flags: <defaults>
</compile_context>

<pallas_src>
import numpy as np
import jax
import jax.numpy as jnp
from jax import lax
from jax.experimental import pallas as pl
from jax.experimental.pallas import tpu as pltpu


# ------------------------------ model dims ----------------------------------

C0, H0, W0 = 3, 32, 32                   # input
C1, K = 6, 5                             # conv1
H1, W1 = H0 - K + 1, W0 - K + 1          # 28, 28
H1P, W1P = H1 // 2, W1 // 2              # 14, 14
C2 = 16                                  # conv2
H2, W2 = H1P - K + 1, W1P - K + 1        # 10, 10
H2P, W2P = H2 // 2, W2 // 2              # 5, 5
F1, F2, F3 = 120, 84, 10
LANE = 128                               # lane-padded width
B_TILE = 8                               # images per grid step (multiple of 8 so
                                         # every sublane slice is tile-aligned)


# ------------------------------ Pallas kernel --------------------------------

def _lenet_kernel(x_ref, m1_ref, b1_ref, ce1_ref, co1_ref, rsel1_ref,
                  m2_ref, b2_ref, ce2_ref, co2_ref,
                  f1_ref, bf1_ref, f2_ref, bf2_ref, f3_ref, bf3_ref, out_ref):
    f32 = jnp.float32
    B = B_TILE

    # ---- conv1 + bias + relu: 5 banded GEMMs at M = B*28 = 224 ---------------
    # rows of x: h*B + b ; lanes: c*32 + w (96 real lanes, padded to 128)
    t = jnp.dot(x_ref[0, 0:H1 * B, :], m1_ref[0], preferred_element_type=f32)
    for kh in range(1, K):
        t = t + jnp.dot(x_ref[0, kh * B:kh * B + H1 * B, :], m1_ref[kh],
                        preferred_element_type=f32)
    t = jnp.maximum(t + b1_ref[...], 0.0)                 # (224, 168) lane=c*28+wo

    # ---- pool1: row max on VPU (aligned slices), compaction on MXU -----------
    mr = jnp.maximum(t[:(H1 - 1) * B, :], t[B:, :])       # (216, 168)
    rc = jnp.dot(rsel1_ref[...], mr, preferred_element_type=f32)   # (112, 168)
    p1 = jnp.maximum(jnp.dot(rc, ce1_ref[...], preferred_element_type=f32),
                     jnp.dot(rc, co1_ref[...], preferred_element_type=f32))
    # p1: (112, 128), rows hp*B + b, lanes c*14 + wp (84 real, rest zero)

    # ---- conv2 + bias + relu: 5 banded GEMMs at M = B*10 = 80 -----------------
    t = jnp.dot(p1[0:H2 * B, :], m2_ref[0], preferred_element_type=f32)
    for kh in range(1, K):
        t = t + jnp.dot(p1[kh * B:kh * B + H2 * B, :], m2_ref[kh],
                        preferred_element_type=f32)
    t = jnp.maximum(t + b2_ref[...], 0.0)                 # (80, 160) lane=c*10+wo

    # ---- pool2: row max on VPU, lane compaction on MXU; row compaction is ----
    # ---- folded into the fc1 lane-concat below (no extra matmul). ------------
    mr = jnp.maximum(t[:(H2 - 1) * B, :], t[B:, :])       # (72, 160)
    cp = jnp.maximum(jnp.dot(mr, ce2_ref[...], preferred_element_type=f32),
                     jnp.dot(mr, co2_ref[...], preferred_element_type=f32))
    # cp: (72, 128); pooled rows live at h2 even, i.e. row blocks 2*hp*B .. +B

    # ---- fc1 as ONE GEMM: gather the 5 pooled row blocks into lanes ----------
    lcat = jnp.concatenate(
        [cp[2 * hp * B:2 * hp * B + B, :] for hp in range(H2P)], axis=1)  # (8, 640)
    h = jnp.maximum(jnp.dot(lcat, f1_ref[...], preferred_element_type=f32)
                    + bf1_ref[...], 0.0)                  # (8, 128)

    # ---- fc2, fc3 (lane-dense 128-wide output) --------------------------------
    h = jnp.maximum(jnp.dot(h, f2_ref[...], preferred_element_type=f32)
                    + bf2_ref[...], 0.0)
    out_ref[0] = (jnp.dot(h, f3_ref[...], preferred_element_type=f32)
                  + bf3_ref[...])                         # (8, 128)


# --------------------------- weight pre-processing ---------------------------

def _band_weights(w, w_in):
    """Conv weight (Cout, Cin, K, K) -> (K, Cin*w_in, Cout*w_out) banded GEMM
    weights: M[kh, ci*w_in + w, co*w_out + wo] = w[co, ci, kh, w - wo]."""
    cout, cin, k, _ = w.shape
    w_out = w_in - k + 1
    band = (np.arange(w_in)[None, :, None]
            == np.arange(w_out)[None, None, :] + np.arange(k)[:, None, None])
    band = jnp.asarray(band, jnp.float32)                      # (K, w_in, w_out)
    m = jnp.einsum('oihk,kab->hiaob', w, band,
                   precision=lax.Precision.HIGHEST)            # exact selection
    return m.reshape(k, cin * w_in, cout * w_out)


def _col_pool_sel(c, w, parity):
    """0/1 matrix (c*w, LANE): picks lane c*w + 2*wp + parity -> lane c*(w//2)+wp."""
    wp = w // 2
    m = np.zeros((c * w, LANE), np.float32)
    for ci in range(c):
        for j in range(wp):
            m[ci * w + 2 * j + parity, ci * wp + j] = 1.0
    return jnp.asarray(m)


def _prepare_params(p):
    # conv banded weights (contraction rows padded to 128 lanes) + tiled biases
    m1 = _band_weights(p['w_conv1'], W0)                       # (5, 96, 168)
    m1 = jnp.pad(m1, ((0, 0), (0, LANE - C0 * W0), (0, 0)))    # (5, 128, 168)
    m2 = _band_weights(p['w_conv2'], W1P)                      # (5, 84, 160)
    m2 = jnp.pad(m2, ((0, 0), (0, LANE - C1 * W1P), (0, 0)))   # (5, 128, 160)
    b1 = jnp.repeat(p['b_conv1'], W1).reshape(1, C1 * W1)      # (1, 168)
    b2 = jnp.repeat(p['b_conv2'], W2).reshape(1, C2 * W2)      # (1, 160)

    # hoisted pool constants (0/1 selection matrices)
    ce1, co1 = _col_pool_sel(C1, W1, 0), _col_pool_sel(C1, W1, 1)   # (168, 128)
    ce2, co2 = _col_pool_sel(C2, W2, 0), _col_pool_sel(C2, W2, 1)   # (160, 128)
    rsel1 = np.zeros((H1P * B_TILE, (H1 - 1) * B_TILE), np.float32)  # (112, 216)
    for hp in range(H1P):
        for b in range(B_TILE):
            rsel1[hp * B_TILE + b, 2 * hp * B_TILE + b] = 1.0
    rsel1 = jnp.asarray(rsel1)

    # fc1 folded to (H2P*128, 128): row hp*128 + (c2*5 + wp) <- flatten c2*25+hp*5+wp
    f1 = p['w_fc1'].reshape(C2, H2P, W2P, F1).transpose(1, 0, 2, 3)
    f1 = f1.reshape(H2P, C2 * W2P, F1)                         # (5, 80, 120)
    f1 = jnp.pad(f1, ((0, 0), (0, LANE - C2 * W2P), (0, LANE - F1)))
    f1 = f1.reshape(H2P * LANE, LANE)                          # (640, 128)
    bf1 = jnp.pad(p['b_fc1'], (0, LANE - F1)).reshape(1, LANE)

    f2 = jnp.pad(p['w_fc2'], ((0, LANE - F1), (0, LANE - F2)))  # (128, 128)
    bf2 = jnp.pad(p['b_fc2'], (0, LANE - F2)).reshape(1, LANE)
    f3 = jnp.pad(p['w_fc3'], ((0, LANE - F2), (0, LANE - F3)))  # (128, 128) lane-dense
    bf3 = jnp.pad(p['b_fc3'], (0, LANE - F3)).reshape(1, LANE)
    return (m1, b1, ce1, co1, rsel1, m2, b2, ce2, co2, f1, bf1, f2, bf2, f3, bf3)


# --------------------------------- wrapper -----------------------------------

def net_forward(x_nchw, params):
    n = x_nchw.shape[0]
    ops = _prepare_params(params)

    g = -(-n // B_TILE)                       # groups of B_TILE images
    n_pad = g * B_TILE
    if n_pad != n:
        x_nchw = jnp.pad(x_nchw, ((0, n_pad - n), (0, 0), (0, 0), (0, 0)))

    # (N,C,H,W) -> (G, H*B + b rows, c*W + w lanes), lanes padded 96 -> 128
    xg = x_nchw.reshape(g, B_TILE, C0, H0, W0).transpose(0, 3, 1, 2, 4)
    xg = xg.reshape(g, H0 * B_TILE, C0 * W0)
    xg = jnp.pad(xg, ((0, 0), (0, 0), (0, LANE - C0 * W0)))

    def _fixed(a):
        return pl.BlockSpec(a.shape, lambda i, _nd=a.ndim: (0,) * _nd)

    in_specs = ([pl.BlockSpec((1, H0 * B_TILE, LANE), lambda i: (i, 0, 0))]
                + [_fixed(a) for a in ops])

    out = pl.pallas_call(
        _lenet_kernel,
        out_shape=jax.ShapeDtypeStruct((g, B_TILE, LANE), jnp.float32),
        grid=(g,),
        in_specs=in_specs,
        out_specs=pl.BlockSpec((1, B_TILE, LANE), lambda i: (i, 0, 0)),
        compiler_params=pltpu.CompilerParams(
            dimension_semantics=("parallel",),
            vmem_limit_bytes=32 * 1024 * 1024),
    )(xg, *ops)

    return out.reshape(n_pad, LANE)[:n, :F3]


# ------------------------- params & pure-JAX reference -----------------------

def init_params(key):
    ks = jax.random.split(key, 10)

    def u(k, shape, fan_in):
        bound = 1.0 / np.sqrt(fan_in)
        return jax.random.uniform(k, shape, jnp.float32, -bound, bound)

    return {
        'w_conv1': u(ks[0], (6, 3, 5, 5), 3 * 25),
        'b_conv1': u(ks[1], (6,), 3 * 25),
        'w_conv2': u(ks[2], (16, 6, 5, 5), 6 * 25),
        'b_conv2': u(ks[3], (16,), 6 * 25),
        'w_fc1':   u(ks[4], (400, 120), 400),   # stored as (in, out) == torch W.T
        'b_fc1':   u(ks[5], (120,), 400),
        'w_fc2':   u(ks[6], (120, 84), 120),
        'b_fc2':   u(ks[7], (84,), 120),
        'w_fc3':   u(ks[8], (84, 10), 84),
        'b_fc3':   u(ks[9], (10,), 84),
    }


def reference_forward(x, p):
    dn = ('NCHW', 'OIHW', 'NCHW')
    hi = lax.Precision.HIGHEST
    y = lax.conv_general_dilated(x, p['w_conv1'], (1, 1), 'VALID',
                                 dimension_numbers=dn, precision=hi)
    y = jnp.maximum(y + p['b_conv1'][None, :, None, None], 0.0)
    y = lax.reduce_window(y, -jnp.inf, lax.max, (1, 1, 2, 2), (1, 1, 2, 2), 'VALID')
    y = lax.conv_general_dilated(y, p['w_conv2'], (1, 1), 'VALID',
                                 dimension_numbers=dn, precision=hi)
    y = jnp.maximum(y + p['b_conv2'][None, :, None, None], 0.0)
    y = lax.reduce_window(y, -jnp.inf, lax.max, (1, 1, 2, 2), (1, 1, 2, 2), 'VALID')
    y = y.reshape(y.shape[0], -1)
    y = jnp.maximum(jnp.dot(y, p['w_fc1'], precision=hi) + p['b_fc1'], 0.0)
    y = jnp.maximum(jnp.dot(y, p['w_fc2'], precision=hi) + p['b_fc2'], 0.0)
    return jnp.dot(y, p['w_fc3'], precision=hi) + p['b_fc3']


# ----------------------------------- main -------------------------------------

if __name__ == "__main__":
    key = jax.random.PRNGKey(0)
    kx, kp = jax.random.split(key)
    params = init_params(kp)
    fwd = jax.jit(net_forward)

    # Batch of 16 NCHW 3x32x32 images -> 2 grid steps of B_TILE=8 (even count for
    # v7x's two TensorCores).
    x = jax.random.normal(kx, (16, 3, 32, 32), jnp.float32)
    out = jax.block_until_ready(fwd(x, params))
    assert out.shape == (16, F3) and out.dtype == jnp.float32
    np.testing.assert_allclose(np.asarray(out),
                               np.asarray(reference_forward(x, params)),
                               rtol=1e-4, atol=1e-4)

    # Ragged batch (exercises the pad-to-B_TILE path).
    x3 = x[:3]
    out3 = jax.block_until_ready(fwd(x3, params))
    np.testing.assert_allclose(np.asarray(out3),
                               np.asarray(reference_forward(x3, params)),
                               rtol=1e-4, atol=1e-4)

    print("KERNEL_OK")
</pallas_src>

<mosaic_0001>
module attributes {stable_mosaic.version = 11 : i64} {
  func.func @_lenet_kernel(%arg0: i32, %arg1: memref<1x256x128xf32, #tpu.memory_space<vmem>>, %arg2: memref<5x128x168xf32, #tpu.memory_space<vmem>>, %arg3: memref<1x168xf32, #tpu.memory_space<vmem>>, %arg4: memref<168x128xf32, #tpu.memory_space<vmem>>, %arg5: memref<168x128xf32, #tpu.memory_space<vmem>>, %arg6: memref<112x216xf32, #tpu.memory_space<vmem>>, %arg7: memref<5x128x160xf32, #tpu.memory_space<vmem>>, %arg8: memref<1x160xf32, #tpu.memory_space<vmem>>, %arg9: memref<160x128xf32, #tpu.memory_space<vmem>>, %arg10: memref<160x128xf32, #tpu.memory_space<vmem>>, %arg11: memref<640x128xf32, #tpu.memory_space<vmem>>, %arg12: memref<1x128xf32, #tpu.memory_space<vmem>>, %arg13: memref<128x128xf32, #tpu.memory_space<vmem>>, %arg14: memref<1x128xf32, #tpu.memory_space<vmem>>, %arg15: memref<128x128xf32, #tpu.memory_space<vmem>>, %arg16: memref<1x128xf32, #tpu.memory_space<vmem>>, %arg17: memref<1x8x128xf32, #tpu.memory_space<vmem>>) attributes {dimension_semantics = [#tpu.dimension_semantics<parallel>], iteration_bounds = array<i64: 2>, scalar_prefetch = 0 : i64, scratch_operands = 0 : i64, tpu.core_type = #tpu.core_type<tc>, window_params = [{transform_indices = @transform_0, window_bounds = array<i64: 1, 256, 128>}, {pipeline_mode = #tpu.pipeline_mode<synchronous>, transform_indices = @transform_1, window_bounds = array<i64: 5, 128, 168>}, {pipeline_mode = #tpu.pipeline_mode<synchronous>, transform_indices = @transform_2, window_bounds = array<i64: 1, 168>}, {pipeline_mode = #tpu.pipeline_mode<synchronous>, transform_indices = @transform_3, window_bounds = array<i64: 168, 128>}, {pipeline_mode = #tpu.pipeline_mode<synchronous>, transform_indices = @transform_4, window_bounds = array<i64: 168, 128>}, {pipeline_mode = #tpu.pipeline_mode<synchronous>, transform_indices = @transform_5, window_bounds = array<i64: 112, 216>}, {pipeline_mode = #tpu.pipeline_mode<synchronous>, transform_indices = @transform_6, window_bounds = array<i64: 5, 128, 160>}, {pipeline_mode = #tpu.pipeline_mode<synchronous>, transform_indices = @transform_7, window_bounds = array<i64: 1, 160>}, {pipeline_mode = #tpu.pipeline_mode<synchronous>, transform_indices = @transform_8, window_bounds = array<i64: 160, 128>}, {pipeline_mode = #tpu.pipeline_mode<synchronous>, transform_indices = @transform_9, window_bounds = array<i64: 160, 128>}, {pipeline_mode = #tpu.pipeline_mode<synchronous>, transform_indices = @transform_10, window_bounds = array<i64: 640, 128>}, {pipeline_mode = #tpu.pipeline_mode<synchronous>, transform_indices = @transform_11, window_bounds = array<i64: 1, 128>}, {pipeline_mode = #tpu.pipeline_mode<synchronous>, transform_indices = @transform_12, window_bounds = array<i64: 128, 128>}, {pipeline_mode = #tpu.pipeline_mode<synchronous>, transform_indices = @transform_13, window_bounds = array<i64: 1, 128>}, {pipeline_mode = #tpu.pipeline_mode<synchronous>, transform_indices = @transform_14, window_bounds = array<i64: 128, 128>}, {pipeline_mode = #tpu.pipeline_mode<synchronous>, transform_indices = @transform_15, window_bounds = array<i64: 1, 128>}, {transform_indices = @transform_16, window_bounds = array<i64: 1, 8, 128>}]} {
    %c0 = arith.constant 0 : index
    %c0_0 = arith.constant 0 : index
    %c0_1 = arith.constant 0 : index
    %0 = vector.load %arg1[%c0, %c0_0, %c0_1] : memref<1x256x128xf32, #tpu.memory_space<vmem>>, vector<1x224x128xf32>
    %1 = vector.shape_cast %0 : vector<1x224x128xf32> to vector<224x128xf32>
    %c0_2 = arith.constant 0 : index
    %c0_3 = arith.constant 0 : index
    %c0_4 = arith.constant 0 : index
    %2 = vector.load %arg2[%c0_2, %c0_3, %c0_4] : memref<5x128x168xf32, #tpu.memory_space<vmem>>, vector<1x128x168xf32>
    %3 = vector.shape_cast %2 : vector<1x128x168xf32> to vector<128x168xf32>
    %cst = arith.constant dense<0.000000e+00> : vector<224x168xf32>
    %4 = tpu.matmul %1, %3, %cst {dimension_numbers = #tpu.dot_dimension_numbers<[1], [0], [0], [1], [0, 0, 1, 1], [], []>} : vector<224x128xf32>, vector<128x168xf32>, vector<224x168xf32> -> vector<224x168xf32>
    %c0_5 = arith.constant 0 : index
    %c8 = arith.constant 8 : index
    %c0_6 = arith.constant 0 : index
    %5 = vector.load %arg1[%c0_5, %c8, %c0_6] : memref<1x256x128xf32, #tpu.memory_space<vmem>>, vector<1x224x128xf32>
    %6 = vector.shape_cast %5 : vector<1x224x128xf32> to vector<224x128xf32>
    %c1 = arith.constant 1 : index
    %c0_7 = arith.constant 0 : index
    %c0_8 = arith.constant 0 : index
    %7 = vector.load %arg2[%c1, %c0_7, %c0_8] : memref<5x128x168xf32, #tpu.memory_space<vmem>>, vector<1x128x168xf32>
    %8 = vector.shape_cast %7 : vector<1x128x168xf32> to vector<128x168xf32>
    %cst_9 = arith.constant dense<0.000000e+00> : vector<224x168xf32>
    %9 = tpu.matmul %6, %8, %cst_9 {dimension_numbers = #tpu.dot_dimension_numbers<[1], [0], [0], [1], [0, 0, 1, 1], [], []>} : vector<224x128xf32>, vector<128x168xf32>, vector<224x168xf32> -> vector<224x168xf32>
    %10 = arith.addf %4, %9 : vector<224x168xf32>
    %c0_10 = arith.constant 0 : index
    %c16 = arith.constant 16 : index
    %c0_11 = arith.constant 0 : index
    %11 = vector.load %arg1[%c0_10, %c16, %c0_11] : memref<1x256x128xf32, #tpu.memory_space<vmem>>, vector<1x224x128xf32>
    %12 = vector.shape_cast %11 : vector<1x224x128xf32> to vector<224x128xf32>
    %c2 = arith.constant 2 : index
    %c0_12 = arith.constant 0 : index
    %c0_13 = arith.constant 0 : index
    %13 = vector.load %arg2[%c2, %c0_12, %c0_13] : memref<5x128x168xf32, #tpu.memory_space<vmem>>, vector<1x128x168xf32>
    %14 = vector.shape_cast %13 : vector<1x128x168xf32> to vector<128x168xf32>
    %cst_14 = arith.constant dense<0.000000e+00> : vector<224x168xf32>
    %15 = tpu.matmul %12, %14, %cst_14 {dimension_numbers = #tpu.dot_dimension_numbers<[1], [0], [0], [1], [0, 0, 1, 1], [], []>} : vector<224x128xf32>, vector<128x168xf32>, vector<224x168xf32> -> vector<224x168xf32>
    %16 = arith.addf %10, %15 : vector<224x168xf32>
    %c0_15 = arith.constant 0 : index
    %c24 = arith.constant 24 : index
    %c0_16 = arith.constant 0 : index
    %17 = vector.load %arg1[%c0_15, %c24, %c0_16] : memref<1x256x128xf32, #tpu.memory_space<vmem>>, vector<1x224x128xf32>
    %18 = vector.shape_cast %17 : vector<1x224x128xf32> to vector<224x128xf32>
    %c3 = arith.constant 3 : index
    %c0_17 = arith.constant 0 : index
    %c0_18 = arith.constant 0 : index
    %19 = vector.load %arg2[%c3, %c0_17, %c0_18] : memref<5x128x168xf32, #tpu.memory_space<vmem>>, vector<1x128x168xf32>
    %20 = vector.shape_cast %19 : vector<1x128x168xf32> to vector<128x168xf32>
    %cst_19 = arith.constant dense<0.000000e+00> : vector<224x168xf32>
    %21 = tpu.matmul %18, %20, %cst_19 {dimension_numbers = #tpu.dot_dimension_numbers<[1], [0], [0], [1], [0, 0, 1, 1], [], []>} : vector<224x128xf32>, vector<128x168xf32>, vector<224x168xf32> -> vector<224x168xf32>
    %22 = arith.addf %16, %21 : vector<224x168xf32>
    %c0_20 = arith.constant 0 : index
    %c32 = arith.constant 32 : index
    %c0_21 = arith.constant 0 : index
    %23 = vector.load %arg1[%c0_20, %c32, %c0_21] : memref<1x256x128xf32, #tpu.memory_space<vmem>>, vector<1x224x128xf32>
    %24 = vector.shape_cast %23 : vector<1x224x128xf32> to vector<224x128xf32>
    %c4 = arith.constant 4 : index
    %c0_22 = arith.constant 0 : index
    %c0_23 = arith.constant 0 : index
    %25 = vector.load %arg2[%c4, %c0_22, %c0_23] : memref<5x128x168xf32, #tpu.memory_space<vmem>>, vector<1x128x168xf32>
    %26 = vector.shape_cast %25 : vector<1x128x168xf32> to vector<128x168xf32>
    %cst_24 = arith.constant dense<0.000000e+00> : vector<224x168xf32>
    %27 = tpu.matmul %24, %26, %cst_24 {dimension_numbers = #tpu.dot_dimension_numbers<[1], [0], [0], [1], [0, 0, 1, 1], [], []>} : vector<224x128xf32>, vector<128x168xf32>, vector<224x168xf32> -> vector<224x168xf32>
    %28 = arith.addf %22, %27 : vector<224x168xf32>
    %c0_25 = arith.constant 0 : index
    %c0_26 = arith.constant 0 : index
    %29 = vector.load %arg3[%c0_25, %c0_26] : memref<1x168xf32, #tpu.memory_space<vmem>>, vector<1x168xf32>
    %30 = vector.broadcast %29 : vector<1x168xf32> to vector<224x168xf32>
    %31 = arith.addf %28, %30 : vector<224x168xf32>
    %cst_27 = arith.constant 0.000000e+00 : f32
    %32 = vector.broadcast %cst_27 : f32 to vector<224x168xf32>
    %33 = arith.maximumf %31, %32 : vector<224x168xf32>
    %34 = vector.extract_strided_slice %33 {offsets = [0, 0], sizes = [216, 168], strides = [1, 1]} : vector<224x168xf32> to vector<216x168xf32>
    %35 = vector.extract_strided_slice %33 {offsets = [8, 0], sizes = [216, 168], strides = [1, 1]} : vector<224x168xf32> to vector<216x168xf32>
    %36 = arith.maximumf %34, %35 : vector<216x168xf32>
    %c0_28 = arith.constant 0 : index
    %c0_29 = arith.constant 0 : index
    %37 = vector.load %arg6[%c0_28, %c0_29] : memref<112x216xf32, #tpu.memory_space<vmem>>, vector<112x216xf32>
    %cst_30 = arith.constant dense<0.000000e+00> : vector<112x168xf32>
    %38 = tpu.matmul %37, %36, %cst_30 {dimension_numbers = #tpu.dot_dimension_numbers<[1], [0], [0], [1], [0, 0, 1, 1], [], []>} : vector<112x216xf32>, vector<216x168xf32>, vector<112x168xf32> -> vector<112x168xf32>
    %c0_31 = arith.constant 0 : index
    %c0_32 = arith.constant 0 : index
    %39 = vector.load %arg4[%c0_31, %c0_32] : memref<168x128xf32, #tpu.memory_space<vmem>>, vector<168x128xf32>
    %cst_33 = arith.constant dense<0.000000e+00> : vector<112x128xf32>
    %40 = tpu.matmul %38, %39, %cst_33 {dimension_numbers = #tpu.dot_dimension_numbers<[1], [0], [0], [1], [0, 0, 1, 1], [], []>} : vector<112x168xf32>, vector<168x128xf32>, vector<112x128xf32> -> vector<112x128xf32>
    %c0_34 = arith.constant 0 : index
    %c0_35 = arith.constant 0 : index
    %41 = vector.load %arg5[%c0_34, %c0_35] : memref<168x128xf32, #tpu.memory_space<vmem>>, vector<168x128xf32>
    %cst_36 = arith.constant dense<0.000000e+00> : vector<112x128xf32>
    %42 = tpu.matmul %38, %41, %cst_36 {dimension_numbers = #tpu.dot_dimension_numbers<[1], [0], [0], [1], [0, 0, 1, 1], [], []>} : vector<112x168xf32>, vector<168x128xf32>, vector<112x128xf32> -> vector<112x128xf32>
    %43 = arith.maximumf %40, %42 : vector<112x128xf32>
    %44 = vector.extract_strided_slice %43 {offsets = [0, 0], sizes = [80, 128], strides = [1, 1]} : vector<112x128xf32> to vector<80x128xf32>
    %c0_37 = arith.constant 0 : index
    %c0_38 = arith.constant 0 : index
    %c0_39 = arith.constant 0 : index
    %45 = vector.load %arg7[%c0_37, %c0_38, %c0_39] : memref<5x128x160xf32, #tpu.memory_space<vmem>>, vector<1x128x160xf32>
    %46 = vector.shape_cast %45 : vector<1x128x160xf32> to vector<128x160xf32>
    %cst_40 = arith.constant dense<0.000000e+00> : vector<80x160xf32>
    %47 = tpu.matmul %44, %46, %cst_40 {dimension_numbers = #tpu.dot_dimension_numbers<[1], [0], [0], [1], [0, 0, 1, 1], [], []>} : vector<80x128xf32>, vector<128x160xf32>, vector<80x160xf32> -> vector<80x160xf32>
    %48 = vector.extract_strided_slice %43 {offsets = [8, 0], sizes = [80, 128], strides = [1, 1]} : vector<112x128xf32> to vector<80x128xf32>
    %c1_41 = arith.constant 1 : index
    %c0_42 = arith.constant 0 : index
    %c0_43 = arith.constant 0 : index
    %49 = vector.load %arg7[%c1_41, %c0_42, %c0_43] : memref<5x128x160xf32, #tpu.memory_space<vmem>>, vector<1x128x160xf32>
    %50 = vector.shape_cast %49 : vector<1x128x160xf32> to vector<128x160xf32>
    %cst_44 = arith.constant dense<0.000000e+00> : vector<80x160xf32>
    %51 = tpu.matmul %48, %50, %cst_44 {dimension_numbers = #tpu.dot_dimension_numbers<[1], [0], [0], [1], [0, 0, 1, 1], [], []>} : vector<80x128xf32>, vector<128x160xf32>, vector<80x160xf32> -> vector<80x160xf32>
    %52 = arith.addf %47, %51 : vector<80x160xf32>
    %53 = vector.extract_strided_slice %43 {offsets = [16, 0], sizes = [80, 128], strides = [1, 1]} : vector<112x128xf32> to vector<80x128xf32>
    %c2_45 = arith.constant 2 : index
    %c0_46 = arith.constant 0 : index
    %c0_47 = arith.constant 0 : index
    %54 = vector.load %arg7[%c2_45, %c0_46, %c0_47] : memref<5x128x160xf32, #tpu.memory_space<vmem>>, vector<1x128x160xf32>
    %55 = vector.shape_cast %54 : vector<1x128x160xf32> to vector<128x160xf32>
    %cst_48 = arith.constant dense<0.000000e+00> : vector<80x160xf32>
    %56 = tpu.matmul %53, %55, %cst_48 {dimension_numbers = #tpu.dot_dimension_numbers<[1], [0], [0], [1], [0, 0, 1, 1], [], []>} : vector<80x128xf32>, vector<128x160xf32>, vector<80x160xf32> -> vector<80x160xf32>
    %57 = arith.addf %52, %56 : vector<80x160xf32>
    %58 = vector.extract_strided_slice %43 {offsets = [24, 0], sizes = [80, 128], strides = [1, 1]} : vector<112x128xf32> to vector<80x128xf32>
    %c3_49 = arith.constant 3 : index
    %c0_50 = arith.constant 0 : index
    %c0_51 = arith.constant 0 : index
    %59 = vector.load %arg7[%c3_49, %c0_50, %c0_51] : memref<5x128x160xf32, #tpu.memory_space<vmem>>, vector<1x128x160xf32>
    %60 = vector.shape_cast %59 : vector<1x128x160xf32> to vector<128x160xf32>
    %cst_52 = arith.constant dense<0.000000e+00> : vector<80x160xf32>
    %61 = tpu.matmul %58, %60, %cst_52 {dimension_numbers = #tpu.dot_dimension_numbers<[1], [0], [0], [1], [0, 0, 1, 1], [], []>} : vector<80x128xf32>, vector<128x160xf32>, vector<80x160xf32> -> vector<80x160xf32>
    %62 = arith.addf %57, %61 : vector<80x160xf32>
    %63 = vector.extract_strided_slice %43 {offsets = [32, 0], sizes = [80, 128], strides = [1, 1]} : vector<112x128xf32> to vector<80x128xf32>
    %c4_53 = arith.constant 4 : index
    %c0_54 = arith.constant 0 : index
    %c0_55 = arith.constant 0 : index
    %64 = vector.load %arg7[%c4_53, %c0_54, %c0_55] : memref<5x128x160xf32, #tpu.memory_space<vmem>>, vector<1x128x160xf32>
    %65 = vector.shape_cast %64 : vector<1x128x160xf32> to vector<128x160xf32>
    %cst_56 = arith.constant dense<0.000000e+00> : vector<80x160xf32>
    %66 = tpu.matmul %63, %65, %cst_56 {dimension_numbers = #tpu.dot_dimension_numbers<[1], [0], [0], [1], [0, 0, 1, 1], [], []>} : vector<80x128xf32>, vector<128x160xf32>, vector<80x160xf32> -> vector<80x160xf32>
    %67 = arith.addf %62, %66 : vector<80x160xf32>
    %c0_57 = arith.constant 0 : index
    %c0_58 = arith.constant 0 : index
    %68 = vector.load %arg8[%c0_57, %c0_58] : memref<1x160xf32, #tpu.memory_space<vmem>>, vector<1x160xf32>
    %69 = vector.broadcast %68 : vector<1x160xf32> to vector<80x160xf32>
    %70 = arith.addf %67, %69 : vector<80x160xf32>
    %cst_59 = arith.constant 0.000000e+00 : f32
    %71 = vector.broadcast %cst_59 : f32 to vector<80x160xf32>
    %72 = arith.maximumf %70, %71 : vector<80x160xf32>
    %73 = vector.extract_strided_slice %72 {offsets = [0, 0], sizes = [72, 160], strides = [1, 1]} : vector<80x160xf32> to vector<72x160xf32>
    %74 = vector.extract_strided_slice %72 {offsets = [8, 0], sizes = [72, 160], strides = [1, 1]} : vector<80x160xf32> to vector<72x160xf32>
    %75 = arith.maximumf %73, %74 : vector<72x160xf32>
    %c0_60 = arith.constant 0 : index
    %c0_61 = arith.constant 0 : index
    %76 = vector.load %arg9[%c0_60, %c0_61] : memref<160x128xf32, #tpu.memory_space<vmem>>, vector<160x128xf32>
    %cst_62 = arith.constant dense<0.000000e+00> : vector<72x128xf32>
    %77 = tpu.matmul %75, %76, %cst_62 {dimension_numbers = #tpu.dot_dimension_numbers<[1], [0], [0], [1], [0, 0, 1, 1], [], []>} : vector<72x160xf32>, vector<160x128xf32>, vector<72x128xf32> -> vector<72x128xf32>
    %c0_63 = arith.constant 0 : index
    %c0_64 = arith.constant 0 : index
    %78 = vector.load %arg10[%c0_63, %c0_64] : memref<160x128xf32, #tpu.memory_space<vmem>>, vector<160x128xf32>
    %cst_65 = arith.constant dense<0.000000e+00> : vector<72x128xf32>
    %79 = tpu.matmul %75, %78, %cst_65 {dimension_numbers = #tpu.dot_dimension_numbers<[1], [0], [0], [1], [0, 0, 1, 1], [], []>} : vector<72x160xf32>, vector<160x128xf32>, vector<72x128xf32> -> vector<72x128xf32>
    %80 = arith.maximumf %77, %79 : vector<72x128xf32>
    %81 = vector.extract_strided_slice %80 {offsets = [0, 0], sizes = [8, 128], strides = [1, 1]} : vector<72x128xf32> to vector<8x128xf32>
    %82 = vector.extract_strided_slice %80 {offsets = [16, 0], sizes = [8, 128], strides = [1, 1]} : vector<72x128xf32> to vector<8x128xf32>
    %83 = vector.extract_strided_slice %80 {offsets = [32, 0], sizes = [8, 128], strides = [1, 1]} : vector<72x128xf32> to vector<8x128xf32>
    %84 = vector.extract_strided_slice %80 {offsets = [48, 0], sizes = [8, 128], strides = [1, 1]} : vector<72x128xf32> to vector<8x128xf32>
    %85 = vector.extract_strided_slice %80 {offsets = [64, 0], sizes = [8, 128], strides = [1, 1]} : vector<72x128xf32> to vector<8x128xf32>
    %86 = tpu.concatenate %81, %82, %83, %84, %85 in 1 : vector<8x128xf32>, vector<8x128xf32>, vector<8x128xf32>, vector<8x128xf32>, vector<8x128xf32> -> vector<8x640xf32>
    %c0_66 = arith.constant 0 : index
    %c0_67 = arith.constant 0 : index
    %87 = vector.load %arg11[%c0_66, %c0_67] : memref<640x128xf32, #tpu.memory_space<vmem>>, vector<640x128xf32>
    %cst_68 = arith.constant dense<0.000000e+00> : vector<8x128xf32>
    %88 = tpu.matmul %86, %87, %cst_68 {dimension_numbers = #tpu.dot_dimension_numbers<[1], [0], [0], [1], [0, 0, 1, 1], [], []>} : vector<8x640xf32>, vector<640x128xf32>, vector<8x128xf32> -> vector<8x128xf32>
    %c0_69 = arith.constant 0 : index
    %c0_70 = arith.constant 0 : index
    %89 = vector.load %arg12[%c0_69, %c0_70] : memref<1x128xf32, #tpu.memory_space<vmem>>, vector<1x128xf32>
    %90 = vector.broadcast %89 : vector<1x128xf32> to vector<8x128xf32>
    %91 = arith.addf %88, %90 : vector<8x128xf32>
    %cst_71 = arith.constant 0.000000e+00 : f32
    %92 = vector.broadcast %cst_71 : f32 to vector<8x128xf32>
    %93 = arith.maximumf %91, %92 : vector<8x128xf32>
    %c0_72 = arith.constant 0 : index
    %c0_73 = arith.constant 0 : index
    %94 = vector.load %arg13[%c0_72, %c0_73] : memref<128x128xf32, #tpu.memory_space<vmem>>, vector<128x128xf32>
    %cst_74 = arith.constant dense<0.000000e+00> : vector<8x128xf32>
    %95 = tpu.matmul %93, %94, %cst_74 {dimension_numbers = #tpu.dot_dimension_numbers<[1], [0], [0], [1], [0, 0, 1, 1], [], []>} : vector<8x128xf32>, vector<128x128xf32>, vector<8x128xf32> -> vector<8x128xf32>
    %c0_75 = arith.constant 0 : index
    %c0_76 = arith.constant 0 : index
    %96 = vector.load %arg14[%c0_75, %c0_76] : memref<1x128xf32, #tpu.memory_space<vmem>>, vector<1x128xf32>
    %97 = vector.broadcast %96 : vector<1x128xf32> to vector<8x128xf32>
    %98 = arith.addf %95, %97 : vector<8x128xf32>
    %cst_77 = arith.constant 0.000000e+00 : f32
    %99 = vector.broadcast %cst_77 : f32 to vector<8x128xf32>
    %100 = arith.maximumf %98, %99 : vector<8x128xf32>
    %c0_78 = arith.constant 0 : index
    %c0_79 = arith.constant 0 : index
    %101 = vector.load %arg15[%c0_78, %c0_79] : memref<128x128xf32, #tpu.memory_space<vmem>>, vector<128x128xf32>
    %cst_80 = arith.constant dense<0.000000e+00> : vector<8x128xf32>
    %102 = tpu.matmul %100, %101, %cst_80 {dimension_numbers = #tpu.dot_dimension_numbers<[1], [0], [0], [1], [0, 0, 1, 1], [], []>} : vector<8x128xf32>, vector<128x128xf32>, vector<8x128xf32> -> vector<8x128xf32>
    %c0_81 = arith.constant 0 : index
    %c0_82 = arith.constant 0 : index
    %103 = vector.load %arg16[%c0_81, %c0_82] : memref<1x128xf32, #tpu.memory_space<vmem>>, vector<1x128xf32>
    %104 = vector.broadcast %103 : vector<1x128xf32> to vector<8x128xf32>
    %105 = arith.addf %102, %104 : vector<8x128xf32>
    %c0_83 = arith.constant 0 : index
    %c0_84 = arith.constant 0 : index
    %c0_85 = arith.constant 0 : index
    %106 = vector.load %arg17[%c0_83, %c0_84, %c0_85] : memref<1x8x128xf32, #tpu.memory_space<vmem>>, vector<1x8x128xf32>
    %107 = vector.shape_cast %106 : vector<1x8x128xf32> to vector<8x128xf32>
    %108 = vector.shape_cast %105 : vector<8x128xf32> to vector<1x8x128xf32>
    tpu.vector_store %arg17[%c0_83, %c0_84, %c0_85], %108 {strides = array<i32>} : memref<1x8x128xf32, #tpu.memory_space<vmem>>, vector<1x8x128xf32>,
    return
  }
  func.func @transform_0(%arg0: i32) -> (i32, i32, i32) {
    %c0_i32 = arith.constant 0 : i32
    %c0_i32_0 = arith.constant 0 : i32
    %c0_i32_1 = arith.constant 0 : i32
    return %arg0, %c0_i32, %c0_i32_0 : i32, i32, i32
  }
  func.func @transform_1(%arg0: i32) -> (i32, i32, i32) {
    %c0_i32 = arith.constant 0 : i32
    %c0_i32_0 = arith.constant 0 : i32
    %c0_i32_1 = arith.constant 0 : i32
    %c0_i32_2 = arith.constant 0 : i32
    return %c0_i32, %c0_i32_0, %c0_i32_1 : i32, i32, i32
  }
  func.func @transform_2(%arg0: i32) -> (i32, i32) {
    %c0_i32 = arith.constant 0 : i32
    %c0_i32_0 = arith.constant 0 : i32
    %c0_i32_1 = arith.constant 0 : i32
    return %c0_i32, %c0_i32_0 : i32, i32
  }
  func.func @transform_3(%arg0: i32) -> (i32, i32) {
    %c0_i32 = arith.constant 0 : i32
    %c0_i32_0 = arith.constant 0 : i32
    %c0_i32_1 = arith.constant 0 : i32
    return %c0_i32, %c0_i32_0 : i32, i32
  }
  func.func @transform_4(%arg0: i32) -> (i32, i32) {
    %c0_i32 = arith.constant 0 : i32
    %c0_i32_0 = arith.constant 0 : i32
    %c0_i32_1 = arith.constant 0 : i32
    return %c0_i32, %c0_i32_0 : i32, i32
  }
  func.func @transform_5(%arg0: i32) -> (i32, i32) {
    %c0_i32 = arith.constant 0 : i32
    %c0_i32_0 = arith.constant 0 : i32
    %c0_i32_1 = arith.constant 0 : i32
    return %c0_i32, %c0_i32_0 : i32, i32
  }
  func.func @transform_6(%arg0: i32) -> (i32, i32, i32) {
    %c0_i32 = arith.constant 0 : i32
    %c0_i32_0 = arith.constant 0 : i32
    %c0_i32_1 = arith.constant 0 : i32
    %c0_i32_2 = arith.constant 0 : i32
    return %c0_i32, %c0_i32_0, %c0_i32_1 : i32, i32, i32
  }
  func.func @transform_7(%arg0: i32) -> (i32, i32) {
    %c0_i32 = arith.constant 0 : i32
    %c0_i32_0 = arith.constant 0 : i32
    %c0_i32_1 = arith.constant 0 : i32
    return %c0_i32, %c0_i32_0 : i32, i32
  }
  func.func @transform_8(%arg0: i32) -> (i32, i32) {
    %c0_i32 = arith.constant 0 : i32
    %c0_i32_0 = arith.constant 0 : i32
    %c0_i32_1 = arith.constant 0 : i32
    return %c0_i32, %c0_i32_0 : i32, i32
  }
  func.func @transform_9(%arg0: i32) -> (i32, i32) {
    %c0_i32 = arith.constant 0 : i32
    %c0_i32_0 = arith.constant 0 : i32
    %c0_i32_1 = arith.constant 0 : i32
    return %c0_i32, %c0_i32_0 : i32, i32
  }
  func.func @transform_10(%arg0: i32) -> (i32, i32) {
    %c0_i32 = arith.constant 0 : i32
    %c0_i32_0 = arith.constant 0 : i32
    %c0_i32_1 = arith.constant 0 : i32
    return %c0_i32, %c0_i32_0 : i32, i32
  }
  func.func @transform_11(%arg0: i32) -> (i32, i32) {
    %c0_i32 = arith.constant 0 : i32
    %c0_i32_0 = arith.constant 0 : i32
    %c0_i32_1 = arith.constant 0 : i32
    return %c0_i32, %c0_i32_0 : i32, i32
  }
  func.func @transform_12(%arg0: i32) -> (i32, i32) {
    %c0_i32 = arith.constant 0 : i32
    %c0_i32_0 = arith.constant 0 : i32
    %c0_i32_1 = arith.constant 0 : i32
    return %c0_i32, %c0_i32_0 : i32, i32
  }
  func.func @transform_13(%arg0: i32) -> (i32, i32) {
    %c0_i32 = arith.constant 0 : i32
    %c0_i32_0 = arith.constant 0 : i32
    %c0_i32_1 = arith.constant 0 : i32
    return %c0_i32, %c0_i32_0 : i32, i32
  }
  func.func @transform_14(%arg0: i32) -> (i32, i32) {
    %c0_i32 = arith.constant 0 : i32
    %c0_i32_0 = arith.constant 0 : i32
    %c0_i32_1 = arith.constant 0 : i32
    return %c0_i32, %c0_i32_0 : i32, i32
  }
  func.func @transform_15(%arg0: i32) -> (i32, i32) {
    %c0_i32 = arith.constant 0 : i32
    %c0_i32_0 = arith.constant 0 : i32
    %c0_i32_1 = arith.constant 0 : i32
    return %c0_i32, %c0_i32_0 : i32, i32
  }
  func.func @transform_16(%arg0: i32) -> (i32, i32, i32) {
    %c0_i32 = arith.constant 0 : i32
    %c0_i32_0 = arith.constant 0 : i32
    %c0_i32_1 = arith.constant 0 : i32
    return %arg0, %c0_i32, %c0_i32_0 : i32, i32, i32
  }
}

</mosaic_0001>

<bundles_post_ra>
// kernel: net_forward.1
= control target key start
LH: loop header
LB: loop body
LE: loop exit
PB: predicated region body
PF: predicated region fallthrough
CT: control target
= control target key end

     0   :  { %s8807_s0 = inlined_call_operand.vmem [shape: f32[2,256,128], index: 0, kind: input, shape index: {}]   ;;  %s8808_s1 = inlined_call_operand.vmem [shape: f32[5,128,168], index: 1, kind: input, shape index: {}]   ;;  %s8809_s2 = inlined_call_operand.vmem [shape: f32[1,168], index: 2, kind: input, shape index: {}]   ;;  %s8810_s3 = inlined_call_operand.vmem [shape: f32[168,128], index: 3, kind: input, shape index: {}]   ;;  %s8811_s4 = inlined_call_operand.vmem [shape: f32[168,128], index: 4, kind: input, shape index: {}]   ;;  %s8812_s5 = inlined_call_operand.vmem [shape: f32[112,216], index: 5, kind: input, shape index: {}]   ;;  %s8813_s6 = inlined_call_operand.vmem [shape: f32[5,128,160], index: 6, kind: input, shape index: {}]   ;;  %s8814_s7 = inlined_call_operand.vmem [shape: f32[1,160], index: 7, kind: input, shape index: {}]   ;;  %s8815_s8 = inlined_call_operand.vmem [shape: f32[160,128], index: 8, kind: input, shape index: {}]   ;;  %s8816_s9 = inlined_call_operand.vmem [shape: f32[160,128], index: 9, kind: input, shape index: {}]   ;;  %s8817_s10 = inlined_call_operand.vmem [shape: f32[640,128], index: 10, kind: input, shape index: {}]   ;;  %s8818_s11 = inlined_call_operand.vmem [shape: f32[1,128], index: 11, kind: input, shape index: {}]   ;;  %s8819_s12 = inlined_call_operand.vmem [shape: f32[128,128], index: 12, kind: input, shape index: {}]   ;;  %s8820_s13 = inlined_call_operand.vmem [shape: f32[1,128], index: 13, kind: input, shape index: {}]   ;;  %s8821_s14 = inlined_call_operand.vmem [shape: f32[128,128], index: 14, kind: input, shape index: {}]   ;;  %s8822_s15 = inlined_call_operand.vmem [shape: f32[1,128], index: 15, kind: input, shape index: {}]   ;;  %s8823_s16 = inlined_call_operand.hbm [shape: f32[2,8,128], index: 16, kind: output, shape index: {}]  }
   0x1   :  { %8837 = sst [smem:[#allocation98_spill]] %s8807_s0 }
   0x2   :  { %8838 = sst [smem:[#allocation99_spill]] %s8808_s1 }
   0x3   :  { %8839 = sst [smem:[#allocation100_spill]] %s8823_s16 }
   0x4   :  { %21 = vsyncpa [#allocation3], 0 }
   0x5   :  { %23 = vsyncpa [#allocation3 + $0x1], 0  ;;  %s5408_s21 = smov 0   ;;  %s5410_s22 = smov 0  }
   0x6   :  { %s5412_s23 = smov 0   ;;  %s5414_s24 = smov 0  }
   0x7 LB: > { %8840 = sst [smem:[#allocation5_spill]] %s5306_s21  ;;  %s5429_s25 = sadd.s32 4294967295, %s5318_s24   ;;  %s5318_s24 = sphi %s5414_s24, %s9070_s24   ;;  %s5314_s23 = sphi %s5412_s23, %s9072_s23   ;;  %s5310_s22 = sphi %s5410_s22, %s9074_s22   ;;  %s5306_s21 = sphi %s5408_s21, %s9073_s21  }
   0x8   : > { %8841 = sst [smem:[#allocation6_spill]] %s5314_s23  ;;  %s4660_s26 = sadd.s32 4294967294, %s5318_s24  }
   0x9   : > { %8842 = sst [smem:[#allocation7_spill]] %s5318_s24  ;;  %s5433_s27 = sadd.s32 1, %s5318_s24  }
   0xa   : > { %8843 = sst [smem:[#allocation8_spill]] %s5433_s27  ;;  %s377_s28 = sadd.s32 1, %s5314_s23 }
   0xb   : > { %s374_s29 = ssub.s32 %s5318_s24, %s5433_s27  ;;  %p387_p0 = scmp.ne.s32.totalorder %s5314_s23, %s5310_s22 }
   0xc   : > { %p375_p1 = scmp.eq.s32.totalorder %s374_s29, 0  ;;  %p388_p2 = scmp.eq.s32.totalorder %s5429_s25, 1 }
   0xd   : > { %p393_p3 = scmp.ne.s32.totalorder %s5310_s22, %s5306_s21  ;;  %p394_p4 = scmp.eq.s32.totalorder %s4660_s26, 1 }
   0xe   : > { %s5444_s30 = scalar_select %p375_p1, %s5314_s23, %s377_s28  }
   0xf   : > { %p5446_p5 = por %p388_p2, %p387_p0  ;;  %p5450_p6 = por %p394_p4, %p393_p3 }
  0x10   : > { %8844 = sst [smem:[#allocation9_spill]] %s5444_s30  ;;  %p4663_p7 = scmp.ge.s32.totalorder %s5318_s24, 1 }
  0x11   : > { %s8846_s17 = scalar_select %p5450_p6, 1, 0 }
  0x12   : > { %p465_p8 = scmp.lt.s32.totalorder %s5318_s24, 3 }
  0x13   : > { %8847 = sst [smem:[#allocation10_spill]] %s8846_s17 }
  0x14   : > { %p466_p9 = pnand %p4663_p7, %p465_p8 }
  0x16   : > { %469 = sbr.rel (%p466_p9) target bundleno = 2152 (0x868), region = 84 }
  0x1b   : > { %s8848_s1 = sld [smem:[#allocation99_spill]]  ;;  %p515_p10 = scmp.lt.s32.totalorder %s5429_s25, 1  ;;  %vm2336_vm0 = vcmask 719872   ;;  %vm2549_vm1 = vcmask 326656   ;;  %vm3836_vm2 = vcmask 261120   ;;  %vm5321_vm3 = vmmov 0  }
  0x1c   : > { %s8849_s24 = sld [smem:[#allocation98_spill]]  ;;  %s512_s28 = sand.u32 1, %s5310_s22  }
  0x1d   : > { %s5604_s23 = scalar_select %p515_p10, %s5429_s25, 1 }
  0x1e   : > { %s4664_s21 = sshll.u32 %s512_s28, 3  ;;  %s4987_s27 = sshll.u32 %s5429_s25, 7 }
  0x1f   : > { %s4990_s26 = sshll.u32 %s5604_s23, 8  ;;  %s514_s17 = scalar_lea.vmem [#allocation2], %s4664_s21 }
  0x20   : > { %s4601_s18 = sshll.u32 %s514_s17, 4  ;;  %s4588_s20 = scalar_lea.sflag [#allocation3], %s512_s28  ;;  %s4602_s18 = int_to_ptr.vmem [resolvable:$true] %s4601_s18 }
  0x21   : > { %v4698_v0 = vld [vmem:[%s8848_s1 + $0x1f8] sm:$0xff]  ;;  %v4697_v2 = vld [vmem:[%s8848_s1 + $0x1f0] sm:$0xff]  ;;  %v4696_v4 = vld [vmem:[%s8848_s1 + $0x1e8] sm:$0xff]  ;;  %s5322_s29 = smov [#allocation2]  }
  0x22   : > { %v579_v1 = vld [vmem:[%s8848_s1 + $0xf8] sm:$0xff]  ;;  %614 = vmatprep.subr.mxu0 %v4698_v0  ;;  %v578_v3 = vld [vmem:[%s8848_s1 + $0xf0] sm:$0xff]  ;;  %v577_v5 = vld [vmem:[%s8848_s1 + $0xe8] sm:$0xff]  ;;  %s5652_s16 = scalar_lea.vmem %s8849_s24, %s4990_s26  ;;  %s9065_s24 = sld [smem:[#allocation100_spill]] }
  0x23   : > { %847 = vmatprep.subr.mxu1 %v579_v1  ;;  %615 = vmatpush1.msra.mxu0 %v4697_v2  ;;  %v4695_v6 = vld [vmem:[%s8848_s1 + $0x1e0] sm:$0xff]  ;;  %v4694_v8 = vld [vmem:[%s8848_s1 + $0x1d8] sm:$0xff]  ;;  %v4693_v10 = vld [vmem:[%s8848_s1 + $0x1d0] sm:$0xff]  ;;  %v8831_v2 = vmov 0.0   ;;  %s5262_s25 = sshll.u32 %s5322_s29, 4  ;;  %s5263_s25 = int_to_ptr.vmem [resolvable:$false] %s5262_s25 }
  0x24   : > { %848 = vmatpush1.msra.mxu1 %v578_v3  ;;  %v576_v7 = vld [vmem:[%s8848_s1 + $0xe0] sm:$0xff]  ;;  %616 = vmatprep.subr.mxu0 %v4696_v4  ;;  %v575_v9 = vld [vmem:[%s8848_s1 + $0xd8] sm:$0xff]  ;;  %v574_v11 = vld [vmem:[%s8848_s1 + $0xd0] sm:$0xff]  ;;  %s5264_s21 = scalar_lea.vmem %s5263_s25, 256  ;;  %p5265_p0 = scmp.lt.s32.totalorder %s4602_s18, %s5263_s25 }
  0x25   : > { %849 = vmatprep.subr.mxu1 %v577_v5  ;;  %617 = vmatpush1.msra.mxu0 %v4695_v6  ;;  %v4692_v12 = vld [vmem:[%s8848_s1 + $0x1c8] sm:$0xff]  ;;  %v4691_v14 = vld [vmem:[%s8848_s1 + $0x1c0] sm:$0xff]  ;;  %v4690_v16 = vld [vmem:[%s8848_s1 + $0x1b8] sm:$0xff] }
  0x26   : > { %850 = vmatpush1.msra.mxu1 %v576_v7  ;;  %v573_v13 = vld [vmem:[%s8848_s1 + $0xc8] sm:$0xff]  ;;  %618 = vmatprep.subr.mxu0 %v4694_v8  ;;  %v572_v15 = vld [vmem:[%s8848_s1 + $0xc0] sm:$0xff]  ;;  %v571_v17 = vld [vmem:[%s8848_s1 + $0xb8] sm:$0xff] }
  0x27   : > { %851 = vmatprep.subr.mxu1 %v575_v9  ;;  %619 = vmatpush1.msra.mxu0 %v4693_v10  ;;  %v4689_v18 = vld [vmem:[%s8848_s1 + $0x1b0] sm:$0xff]  ;;  %v4688_v20 = vld [vmem:[%s8848_s1 + $0x1a8] sm:$0xff]  ;;  %v4687_v22 = vld [vmem:[%s8848_s1 + $0x1a0] sm:$0xff] }
  0x28   : > { %852 = vmatpush1.msra.mxu1 %v574_v11  ;;  %620 = vmatprep.subr.mxu0 %v4692_v12  ;;  %v570_v19 = vld [vmem:[%s8848_s1 + $0xb0] sm:$0xff]  ;;  %v569_v21 = vld [vmem:[%s8848_s1 + $0xa8] sm:$0xff]  ;;  %v568_v23 = vld [vmem:[%s8848_s1 + $0xa0] sm:$0xff]  ;;  %s9066_s26 = smov %s9065_s24  ;;  %s8772_s23 = scalar_lea.hbm %s9065_s24, %s4987_s27 }
  0x29   : > { %853 = vmatprep.subr.mxu1 %v573_v13  ;;  %621 = vmatpush1.msra.mxu0 %v4691_v14  ;;  %v4686_v24 = vld [vmem:[%s8848_s1 + $0x198] sm:$0xff]  ;;  %v4685_v26 = vld [vmem:[%s8848_s1 + $0x190] sm:$0xff]  ;;  %v4684_v28 = vld [vmem:[%s8848_s1 + $0x188] sm:$0xff] }
  0x2a   : > { %854 = vmatpush1.msra.mxu1 %v572_v15  ;;  %622 = vmatprep.subr.mxu0 %v4690_v16  ;;  %v567_v25 = vld [vmem:[%s8848_s1 + $0x98] sm:$0xff]  ;;  %v566_v27 = vld [vmem:[%s8848_s1 + $0x90] sm:$0xff]  ;;  %v565_v29 = vld [vmem:[%s8848_s1 + $0x88] sm:$0xff] }
  0x2b   : > { %855 = vmatprep.subr.mxu1 %v571_v17  ;;  %623 = vmatpush1.msra.mxu0 %v4689_v18  ;;  %v4683_v30 = vld [vmem:[%s8848_s1 + $0x180] sm:$0xff]  ;;  %v4682_v32 = vld [vmem:[%s8848_s1 + $0x178] sm:$0xff]  ;;  %v4681_v34 = vld [vmem:[%s8848_s1 + $0x170] sm:$0xff] }
  0x2c   : > { %856 = vmatpush1.msra.mxu1 %v570_v19  ;;  %624 = vmatprep.subr.mxu0 %v4688_v20  ;;  %v564_v31 = vld [vmem:[%s8848_s1 + $0x80] sm:$0xff]  ;;  %v563_v33 = vld [vmem:[%s8848_s1 + $0x78] sm:$0xff]  ;;  %v562_v35 = vld [vmem:[%s8848_s1 + $0x70] sm:$0xff] }
  0x2d   : > { %857 = vmatprep.subr.mxu1 %v569_v21  ;;  %625 = vmatpush1.msra.mxu0 %v4687_v22  ;;  %v4680_v36 = vld [vmem:[%s8848_s1 + $0x168] sm:$0xff]  ;;  %v4679_v38 = vld [vmem:[%s8848_s1 + $0x160] sm:$0xff]  ;;  %v4678_v40 = vld [vmem:[%s8848_s1 + $0x158] sm:$0xff] }
  0x2e   : > { %858 = vmatpush1.msra.mxu1 %v568_v23  ;;  %626 = vmatprep.subr.mxu0 %v4686_v24  ;;  %v561_v37 = vld [vmem:[%s8848_s1 + $0x68] sm:$0xff]  ;;  %v560_v39 = vld [vmem:[%s8848_s1 + $0x60] sm:$0xff]  ;;  %v559_v41 = vld [vmem:[%s8848_s1 + $0x58] sm:$0xff] }
  0x2f   : > { %859 = vmatprep.subr.mxu1 %v567_v25  ;;  %627 = vmatpush1.msra.mxu0 %v4685_v26  ;;  %v4677_v42 = vld [vmem:[%s8848_s1 + $0x150] sm:$0xff]  ;;  %v4676_v44 = vld [vmem:[%s8848_s1 + $0x148] sm:$0xff]  ;;  %v4675_v46 = vld [vmem:[%s8848_s1 + $0x140] sm:$0xff] }
  0x30   : > { %860 = vmatpush1.msra.mxu1 %v566_v27  ;;  %628 = vmatprep.subr.mxu0 %v4684_v28  ;;  %v558_v43 = vld [vmem:[%s8848_s1 + $0x50] sm:$0xff]  ;;  %v557_v45 = vld [vmem:[%s8848_s1 + $0x48] sm:$0xff]  ;;  %v556_v47 = vld [vmem:[%s8848_s1 + $0x40] sm:$0xff] }
  0x31   : > { %861 = vmatprep.subr.mxu1 %v565_v29  ;;  %629 = vmatpush1.msra.mxu0 %v4683_v30  ;;  %v4674_v48 = vld [vmem:[%s8848_s1 + $0x138] sm:$0xff]  ;;  %v4673_v50 = vld [vmem:[%s8848_s1 + $0x130] sm:$0xff]  ;;  %v4672_v52 = vld [vmem:[%s8848_s1 + $0x128] sm:$0xff] }
  0x32   : > { %862 = vmatpush1.msra.mxu1 %v564_v31  ;;  %630 = vmatprep.subr.mxu0 %v4682_v32  ;;  %v555_v49 = vld [vmem:[%s8848_s1 + $0x38] sm:$0xff]  ;;  %v554_v51 = vld [vmem:[%s8848_s1 + $0x30] sm:$0xff]  ;;  %v553_v53 = vld [vmem:[%s8848_s1 + $0x28] sm:$0xff] }
  0x33   : > { %863 = vmatprep.subr.mxu1 %v563_v33  ;;  %631 = vmatpush1.msra.mxu0 %v4681_v34  ;;  %v4671_v54 = vld [vmem:[%s8848_s1 + $0x120] sm:$0xff]  ;;  %v4670_v56 = vld [vmem:[%s8848_s1 + $0x118] sm:$0xff]  ;;  %v4669_v58 = vld [vmem:[%s8848_s1 + $0x110] sm:$0xff] }
  0x34   : > { %864 = vmatpush1.msra.mxu1 %v562_v35  ;;  %632 = vmatprep.subr.mxu0 %v4680_v36  ;;  %v552_v55 = vld [vmem:[%s8848_s1 + $0x20] sm:$0xff]  ;;  %v551_v57 = vld [vmem:[%s8848_s1 + $0x18] sm:$0xff]  ;;  %v550_v59 = vld [vmem:[%s8848_s1 + $0x10] sm:$0xff] }
  0x35   : > { %865 = vmatprep.subr.mxu1 %v561_v37  ;;  %633 = vmatpush1.msra.mxu0 %v4679_v38  ;;  %v4668_v60 = vld [vmem:[%s8848_s1 + $0x108] sm:$0xff]  ;;  %v4667_v62 = vld [vmem:[%s8848_s1 + $0x100] sm:$0xff]  ;;  %v4730_v3 = vld [vmem:[%s8848_s1 + $0x2f8] sm:$0xff] }
  0x36   : > { %866 = vmatpush1.msra.mxu1 %v560_v39  ;;  %634 = vmatprep.subr.mxu0 %v4678_v40  ;;  %v549_v61 = vld [vmem:[%s8848_s1 + $0x8] sm:$0xff]  ;;  %v548_v63 = vld [vmem:[%s8848_s1] sm:$0xff]  ;;  %v4762_v4 = vld [vmem:[%s8848_s1 + $0x3f8] sm:$0xff] }
  0x37   : > { %867 = vmatprep.subr.mxu1 %v559_v41  ;;  %635 = vmatpush1.msra.mxu0 %v4677_v42  ;;  %v521_v0 = vld [vmem:[%s5652_s16 + $0x8] sm:$0xff]  ;;  %v520_v1 = vld [vmem:[%s5652_s16] sm:$0xff]  ;;  %v4729_v5 = vld [vmem:[%s8848_s1 + $0x2f0] sm:$0xff] }
  0x38   : > { %868 = vmatpush1.msra.mxu1 %v558_v43  ;;  %636 = vmatprep.subr.mxu0 %v4676_v44  ;;  %v4761_v6 = vld [vmem:[%s8848_s1 + $0x3f0] sm:$0xff]  ;;  %v4728_v8 = vld [vmem:[%s8848_s1 + $0x2e8] sm:$0xff]  ;;  %v4727_v10 = vld [vmem:[%s8848_s1 + $0x2e0] sm:$0xff] }
  0x39   : > { %869 = vmatprep.subr.mxu1 %v557_v45  ;;  %637 = vmatpush1.msra.mxu0 %v4675_v46  ;;  %v5679_v7 = vld [vmem:[%s5652_s16 + $0x10] sm:$0xff]  ;;  %v4760_v9 = vld [vmem:[%s8848_s1 + $0x3e8] sm:$0xff]  ;;  %v4759_v11 = vld [vmem:[%s8848_s1 + $0x3e0] sm:$0xff] }
  0x3a   : > { %870 = vmatpush1.msra.mxu1 %v556_v47  ;;  %638 = vmatprep.subr.mxu0 %v4674_v48  ;;  %v5697_v12 = vld [vmem:[%s5652_s16 + $0x18] sm:$0xff]  ;;  %v4725_v15 = vld [vmem:[%s8848_s1 + $0x2d0] sm:$0xff]  ;;  %v5716_v17 = vld [vmem:[%s5652_s16 + $0x20] sm:$0xff] }
  0x3b   : > { %871 = vmatprep.subr.mxu1 %v555_v49  ;;  %639 = vmatpush1.msra.mxu0 %v4673_v50  ;;  %v4726_v13 = vld [vmem:[%s8848_s1 + $0x2d8] sm:$0xff]  ;;  %v4757_v16 = vld [vmem:[%s8848_s1 + $0x3d0] sm:$0xff]  ;;  %v4724_v18 = vld [vmem:[%s8848_s1 + $0x2c8] sm:$0xff] }
  0x3c   : > { %872 = vmatpush1.msra.mxu1 %v554_v51  ;;  %640 = vmatprep.subr.mxu0 %v4672_v52  ;;  %v4758_v14 = vld [vmem:[%s8848_s1 + $0x3d8] sm:$0xff]  ;;  %v4756_v19 = vld [vmem:[%s8848_s1 + $0x3c8] sm:$0xff]  ;;  %v4723_v20 = vld [vmem:[%s8848_s1 + $0x2c0] sm:$0xff] }
  0x3d   : > { %873 = vmatprep.subr.mxu1 %v553_v53  ;;  %641 = vmatpush1.msra.mxu0 %v4671_v54  ;;  %v4755_v21 = vld [vmem:[%s8848_s1 + $0x3c0] sm:$0xff]  ;;  %v5735_v22 = vld [vmem:[%s5652_s16 + $0x28] sm:$0xff]  ;;  %v4722_v23 = vld [vmem:[%s8848_s1 + $0x2b8] sm:$0xff] }
  0x3e   : > { %874 = vmatpush1.msra.mxu1 %v552_v55  ;;  %642 = vmatprep.subr.mxu0 %v4670_v56  ;;  %v4754_v24 = vld [vmem:[%s8848_s1 + $0x3b8] sm:$0xff]  ;;  %v4721_v25 = vld [vmem:[%s8848_s1 + $0x2b0] sm:$0xff]  ;;  %v4720_v28 = vld [vmem:[%s8848_s1 + $0x2a8] sm:$0xff] }
  0x3f   : > { %875 = vmatprep.subr.mxu1 %v551_v57  ;;  %643 = vmatpush1.msra.mxu0 %v4669_v58  ;;  %v4753_v26 = vld [vmem:[%s8848_s1 + $0x3b0] sm:$0xff]  ;;  %v4752_v29 = vld [vmem:[%s8848_s1 + $0x3a8] sm:$0xff]  ;;  %v4719_v30 = vld [vmem:[%s8848_s1 + $0x2a0] sm:$0xff] }
  0x40   : > { %876 = vmatpush1.msra.mxu1 %v550_v59  ;;  %644 = vmatprep.subr.mxu0 %v4668_v60  ;;  %v5754_v27 = vld [vmem:[%s5652_s16 + $0x30] sm:$0xff]  ;;  %v4751_v31 = vld [vmem:[%s8848_s1 + $0x3a0] sm:$0xff]  ;;  %v5773_v32 = vld [vmem:[%s5652_s16 + $0x38] sm:$0xff] }
  0x41   : > { %877 = vmatprep.subr.mxu1 %v549_v61  ;;  %645 = vmatpush1.msra.mxu0 %v4667_v62  ;;  %v4718_v33 = vld [vmem:[%s8848_s1 + $0x298] sm:$0xff]  ;;  %v4717_v35 = vld [vmem:[%s8848_s1 + $0x290] sm:$0xff]  ;;  %v5792_v37 = vld [vmem:[%s5652_s16 + $0x40] sm:$0xff] }
  0x42   : > { %678 = vmatprep.mubr.f32.mxu0 %v8831_v2  ;;  %878 = vmatpush1.msra.mxu1 %v548_v63  ;;  %v4750_v34 = vld [vmem:[%s8848_s1 + $0x398] sm:$0xff]  ;;  %v4749_v36 = vld [vmem:[%s8848_s1 + $0x390] sm:$0xff]  ;;  %v4716_v38 = vld [vmem:[%s8848_s1 + $0x288] sm:$0xff] }
  0x43   : > { %911 = vmatprep.mubr.f32.mxu1 %v8831_v2  ;;  %679 = vmatmul.mubr.f32.vlgmr.msra.gmra.mxu0 %v521_v0  ;;  %v4748_v39 = vld [vmem:[%s8848_s1 + $0x388] sm:$0xff]  ;;  %v4715_v40 = vld [vmem:[%s8848_s1 + $0x280] sm:$0xff]  ;;  %v4714_v43 = vld [vmem:[%s8848_s1 + $0x278] sm:$0xff] }
  0x44   : > { %912 = vmatmul.mubr.f32.vlgmr.msra.gmra.mxu1 %v520_v1  ;;  %684 = vmatprep.mubr.f32.mxu0 %v8831_v2  ;;  %v4747_v41 = vld [vmem:[%s8848_s1 + $0x380] sm:$0xff]  ;;  %v5811_v42 = vld [vmem:[%s5652_s16 + $0x48] sm:$0xff]  ;;  %v4746_v44 = vld [vmem:[%s8848_s1 + $0x378] sm:$0xff] }
  0x45   : > { %917 = vmatprep.mubr.f32.mxu1 %v8831_v2  ;;  %1141 = vmatprep.subr.mxu0 %v4730_v3  ;;  %v4713_v45 = vld [vmem:[%s8848_s1 + $0x270] sm:$0xff]  ;;  %v4712_v48 = vld [vmem:[%s8848_s1 + $0x268] sm:$0xff]  ;;  %v4711_v50 = vld [vmem:[%s8848_s1 + $0x260] sm:$0xff] }
  0x46   : > { %1491 = vmatprep.subr.mxu1 %v4762_v4  ;;  %1142 = vmatpush1.msra.mxu0 %v4729_v5  ;;  %v4745_v46 = vld [vmem:[%s8848_s1 + $0x370] sm:$0xff]  ;;  %v4744_v49 = vld [vmem:[%s8848_s1 + $0x368] sm:$0xff]  ;;  %v4743_v51 = vld [vmem:[%s8848_s1 + $0x360] sm:$0xff] }
  0x47   : > { %1492 = vmatpush1.msra.mxu1 %v4761_v6  ;;  %685 = vmatmul.mubr.f32.gmra.mxu0 %v5679_v7  ;;  %v5830_v47 = vld [vmem:[%s5652_s16 + $0x50] sm:$0xff]  ;;  %v5849_v52 = vld [vmem:[%s5652_s16 + $0x58] sm:$0xff]  ;;  %v5868_v57 = vld [vmem:[%s5652_s16 + $0x60] sm:$0xff] }
  0x48   : > { %918 = vmatmul.mubr.f32.gmra.mxu1 %v521_v0  ;;  %690 = vmatprep.mubr.f32.mxu0 %v8831_v2  ;;  %v4710_v53 = vld [vmem:[%s8848_s1 + $0x258] sm:$0xff]  ;;  %v4709_v55 = vld [vmem:[%s8848_s1 + $0x250] sm:$0xff]  ;;  %v4708_v58 = vld [vmem:[%s8848_s1 + $0x248] sm:$0xff] }
  0x49   : > { %923 = vmatprep.mubr.f32.mxu1 %v8831_v2  ;;  %1143 = vmatprep.subr.mxu0 %v4728_v8  ;;  %v4742_v54 = vld [vmem:[%s8848_s1 + $0x358] sm:$0xff]  ;;  %v4741_v56 = vld [vmem:[%s8848_s1 + $0x350] sm:$0xff]  ;;  %v4740_v59 = vld [vmem:[%s8848_s1 + $0x348] sm:$0xff] }
  0x4a   : > { %1493 = vmatprep.subr.mxu1 %v4760_v9  ;;  %1144 = vmatpush1.msra.mxu0 %v4727_v10  ;;  %v4707_v60 = vld [vmem:[%s8848_s1 + $0x240] sm:$0xff]  ;;  %v5887_v62 = vld [vmem:[%s5652_s16 + $0x68] sm:$0xff]  ;;  %v4706_v63 = vld [vmem:[%s8848_s1 + $0x238] sm:$0xff] }
  0x4b   : > { %1494 = vmatpush1.msra.mxu1 %v4759_v11  ;;  %691 = vmatmul.mubr.f32.gmra.mxu0 %v5697_v12  ;;  %v4739_v61 = vld [vmem:[%s8848_s1 + $0x340] sm:$0xff]  ;;  %v4738_v0 = vld [vmem:[%s8848_s1 + $0x338] sm:$0xff]  ;;  %v4705_v1 = vld [vmem:[%s8848_s1 + $0x230] sm:$0xff] }
  0x4c   : > { %924 = vmatmul.mubr.f32.gmra.mxu1 %v5679_v7  ;;  %696 = vmatprep.mubr.f32.mxu0 %v8831_v2  ;;  %v4737_v3 = vld [vmem:[%s8848_s1 + $0x330] sm:$0xff]  ;;  %v4704_v5 = vld [vmem:[%s8848_s1 + $0x228] sm:$0xff]  ;;  %v4703_v8 = vld [vmem:[%s8848_s1 + $0x220] sm:$0xff] }
  0x4d   : > { %929 = vmatprep.mubr.f32.mxu1 %v8831_v2  ;;  %1145 = vmatprep.subr.mxu0 %v4726_v13  ;;  %v5906_v4 = vld [vmem:[%s5652_s16 + $0x70] sm:$0xff]  ;;  %v4736_v6 = vld [vmem:[%s8848_s1 + $0x328] sm:$0xff]  ;;  %v4735_v9 = vld [vmem:[%s8848_s1 + $0x320] sm:$0xff] }
  0x4e   : > { %1495 = vmatprep.subr.mxu1 %v4758_v14  ;;  %1146 = vmatpush1.msra.mxu0 %v4725_v15  ;;  %v5925_v10 = vld [vmem:[%s5652_s16 + $0x78] sm:$0xff]  ;;  %v4701_v14 = vld [vmem:[%s8848_s1 + $0x210] sm:$0xff] }
  0x4f   : > { %1496 = vmatpush1.msra.mxu1 %v4757_v16  ;;  %697 = vmatmul.mubr.f32.gmra.mxu0 %v5716_v17  ;;  %v4702_v11 = vld [vmem:[%s8848_s1 + $0x218] sm:$0xff]  ;;  %v4733_v15 = vld [vmem:[%s8848_s1 + $0x310] sm:$0xff]  ;;  %v5944_v16 = vld [vmem:[%s5652_s16 + $0x80] sm:$0xff] }
  0x50   : > { %930 = vmatmul.mubr.f32.gmra.mxu1 %v5697_v12  ;;  %702 = vmatprep.mubr.f32.mxu0 %v8831_v2  ;;  %v4734_v13 = vld [vmem:[%s8848_s1 + $0x318] sm:$0xff] }
  0x51   : > { %935 = vmatprep.mubr.f32.mxu1 %v8831_v2  ;;  %1147 = vmatprep.subr.mxu0 %v4724_v18  ;;  %v4700_v18 = vld [vmem:[%s8848_s1 + $0x208] sm:$0xff] }
  0x52   : > { %1497 = vmatprep.subr.mxu1 %v4756_v19  ;;  %1148 = vmatpush1.msra.mxu0 %v4723_v20  ;;  %v4732_v19 = vld [vmem:[%s8848_s1 + $0x308] sm:$0xff]  ;;  %v4699_v20 = vld [vmem:[%s8848_s1 + $0x200] sm:$0xff] }
  0x53   : > { %1498 = vmatpush1.msra.mxu1 %v4755_v21  ;;  %703 = vmatmul.mubr.f32.gmra.mxu0 %v5735_v22  ;;  %v4731_v21 = vld [vmem:[%s8848_s1 + $0x300] sm:$0xff] }
  0x54   : > { %936 = vmatmul.mubr.f32.gmra.mxu1 %v5716_v17  ;;  %708 = vmatprep.mubr.f32.mxu0 %v8831_v2 }
  0x55   : > { %941 = vmatprep.mubr.f32.mxu1 %v8831_v2  ;;  %1149 = vmatprep.subr.mxu0 %v4722_v23  ;;  %v5963_v23 = vld [vmem:[%s5652_s16 + $0x88] sm:$0xff] }
  0x56   : > { %1499 = vmatprep.subr.mxu1 %v4754_v24  ;;  %1150 = vmatpush1.msra.mxu0 %v4721_v25  ;;  %v4794_v24 = vld [vmem:[%s8848_s1 + $0x4f8] sm:$0xff]  ;;  %v5973_v25 = vld [vmem:[%s5652_s16 + $0x90] sm:$0xff] }
  0x57   : > { %1500 = vmatpush1.msra.mxu1 %v4753_v26  ;;  %709 = vmatmul.mubr.f32.gmra.mxu0 %v5754_v27  ;;  %v5980_v26 = vld [vmem:[%s5652_s16 + $0x98] sm:$0xff] }
  0x58   : > { %942 = vmatmul.mubr.f32.gmra.mxu1 %v5735_v22  ;;  %714 = vmatprep.mubr.f32.mxu0 %v8831_v2 }
  0x59   : > { %947 = vmatprep.mubr.f32.mxu1 %v8831_v2  ;;  %1151 = vmatprep.subr.mxu0 %v4720_v28  ;;  %v5987_v28 = vld [vmem:[%s5652_s16 + $0xa0] sm:$0xff] }
  0x5a   : > { %1501 = vmatprep.subr.mxu1 %v4752_v29  ;;  %1152 = vmatpush1.msra.mxu0 %v4719_v30  ;;  %v5994_v29 = vld [vmem:[%s5652_s16 + $0xa8] sm:$0xff]  ;;  %v6001_v30 = vld [vmem:[%s5652_s16 + $0xb0] sm:$0xff] }
  0x5b   : > { %1502 = vmatpush1.msra.mxu1 %v4751_v31  ;;  %715 = vmatmul.mubr.f32.gmra.mxu0 %v5773_v32  ;;  %v6008_v31 = vld [vmem:[%s5652_s16 + $0xb8] sm:$0xff] }
  0x5c   : > { %948 = vmatmul.mubr.f32.gmra.mxu1 %v5754_v27  ;;  %720 = vmatprep.mubr.f32.mxu0 %v8831_v2 }
  0x5d   : > { %953 = vmatprep.mubr.f32.mxu1 %v8831_v2  ;;  %1153 = vmatprep.subr.mxu0 %v4718_v33  ;;  %v6015_v33 = vld [vmem:[%s5652_s16 + $0xc0] sm:$0xff] }
  0x5e   : > { %1503 = vmatprep.subr.mxu1 %v4750_v34  ;;  %1154 = vmatpush1.msra.mxu0 %v4717_v35  ;;  %v6022_v34 = vld [vmem:[%s5652_s16 + $0xc8] sm:$0xff]  ;;  %v6029_v35 = vld [vmem:[%s5652_s16 + $0xd0] sm:$0xff] }
  0x5f   : > { %1504 = vmatpush1.msra.mxu1 %v4749_v36  ;;  %721 = vmatmul.mubr.f32.gmra.mxu0 %v5792_v37  ;;  %v6036_v36 = vld [vmem:[%s5652_s16 + $0xd8] sm:$0xff] }
  0x60   : > { %954 = vmatmul.mubr.f32.gmra.mxu1 %v5773_v32  ;;  %726 = vmatprep.mubr.f32.mxu0 %v8831_v2 }
  0x61   : > { %959 = vmatprep.mubr.f32.mxu1 %v8831_v2  ;;  %1155 = vmatprep.subr.mxu0 %v4716_v38  ;;  %v6043_v38 = vld [vmem:[%s5652_s16 + $0xe0] sm:$0xff] }
  0x62   : > { %1505 = vmatprep.subr.mxu1 %v4748_v39  ;;  %1156 = vmatpush1.msra.mxu0 %v4715_v40  ;;  %v4793_v39 = vld [vmem:[%s8848_s1 + $0x4f0] sm:$0xff]  ;;  %v4792_v40 = vld [vmem:[%s8848_s1 + $0x4e8] sm:$0xff] }
  0x63   : > { %1506 = vmatpush1.msra.mxu1 %v4747_v41  ;;  %727 = vmatmul.mubr.f32.gmra.mxu0 %v5811_v42  ;;  %v4791_v41 = vld [vmem:[%s8848_s1 + $0x4e0] sm:$0xff] }
  0x64   : > { %960 = vmatmul.mubr.f32.gmra.mxu1 %v5792_v37  ;;  %732 = vmatprep.mubr.f32.mxu0 %v8831_v2 }
  0x65   : > { %965 = vmatprep.mubr.f32.mxu1 %v8831_v2  ;;  %1157 = vmatprep.subr.mxu0 %v4714_v43  ;;  %v4789_v43 = vld [vmem:[%s8848_s1 + $0x4d0] sm:$0xff] }
  0x66   : > { %1507 = vmatprep.subr.mxu1 %v4746_v44  ;;  %1158 = vmatpush1.msra.mxu0 %v4713_v45  ;;  %v4787_v44 = vld [vmem:[%s8848_s1 + $0x4c0] sm:$0xff]  ;;  %v4785_v45 = vld [vmem:[%s8848_s1 + $0x4b0] sm:$0xff] }
  0x67   : > { %1508 = vmatpush1.msra.mxu1 %v4745_v46  ;;  %733 = vmatmul.mubr.f32.gmra.mxu0 %v5830_v47  ;;  %v4783_v46 = vld [vmem:[%s8848_s1 + $0x4a0] sm:$0xff] }
  0x68   : > { %966 = vmatmul.mubr.f32.gmra.mxu1 %v5811_v42  ;;  %738 = vmatprep.mubr.f32.mxu0 %v8831_v2 }
  0x69   : > { %971 = vmatprep.mubr.f32.mxu1 %v8831_v2  ;;  %1159 = vmatprep.subr.mxu0 %v4712_v48  ;;  %v4781_v48 = vld [vmem:[%s8848_s1 + $0x490] sm:$0xff] }
  0x6a   : > { %1509 = vmatprep.subr.mxu1 %v4744_v49  ;;  %1160 = vmatpush1.msra.mxu0 %v4711_v50  ;;  %v4779_v49 = vld [vmem:[%s8848_s1 + $0x480] sm:$0xff]  ;;  %v4777_v50 = vld [vmem:[%s8848_s1 + $0x470] sm:$0xff] }
  0x6b   : > { %1510 = vmatpush1.msra.mxu1 %v4743_v51  ;;  %739 = vmatmul.mubr.f32.gmra.mxu0 %v5849_v52  ;;  %v4775_v51 = vld [vmem:[%s8848_s1 + $0x460] sm:$0xff] }
  0x6c   : > { %972 = vmatmul.mubr.f32.gmra.mxu1 %v5830_v47  ;;  %744 = vmatprep.mubr.f32.mxu0 %v8831_v2 }
  0x6d   : > { %977 = vmatprep.mubr.f32.mxu1 %v8831_v2  ;;  %1161 = vmatprep.subr.mxu0 %v4710_v53  ;;  %v4773_v53 = vld [vmem:[%s8848_s1 + $0x450] sm:$0xff] }
  0x6e   : > { %1511 = vmatprep.subr.mxu1 %v4742_v54  ;;  %1162 = vmatpush1.msra.mxu0 %v4709_v55  ;;  %v4771_v54 = vld [vmem:[%s8848_s1 + $0x440] sm:$0xff]  ;;  %v4770_v55 = vld [vmem:[%s8848_s1 + $0x438] sm:$0xff] }
  0x6f   : > { %1512 = vmatpush1.msra.mxu1 %v4741_v56  ;;  %745 = vmatmul.mubr.f32.gmra.mxu0 %v5868_v57  ;;  %v4769_v56 = vld [vmem:[%s8848_s1 + $0x430] sm:$0xff] }
  0x70   : > { %978 = vmatmul.mubr.f32.gmra.mxu1 %v5849_v52  ;;  %750 = vmatprep.mubr.f32.mxu0 %v8831_v2 }
  0x71   : > { %983 = vmatprep.mubr.f32.mxu1 %v8831_v2  ;;  %1163 = vmatprep.subr.mxu0 %v4708_v58  ;;  %v4767_v58 = vld [vmem:[%s8848_s1 + $0x420] sm:$0xff] }
  0x72   : > { %1513 = vmatprep.subr.mxu1 %v4740_v59  ;;  %1164 = vmatpush1.msra.mxu0 %v4707_v60  ;;  %v4766_v59 = vld [vmem:[%s8848_s1 + $0x418] sm:$0xff]  ;;  %v4765_v60 = vld [vmem:[%s8848_s1 + $0x410] sm:$0xff] }
  0x73   : > { %1514 = vmatpush1.msra.mxu1 %v4739_v61  ;;  %751 = vmatmul.mubr.f32.gmra.mxu0 %v5887_v62  ;;  %v4764_v61 = vld [vmem:[%s8848_s1 + $0x408] sm:$0xff] }
  0x74   : > { %984 = vmatmul.mubr.f32.gmra.mxu1 %v5868_v57  ;;  %756 = vmatprep.mubr.f32.mxu0 %v8831_v2 }
  0x75   : > { %989 = vmatprep.mubr.f32.mxu1 %v8831_v2  ;;  %1165 = vmatprep.subr.mxu0 %v4706_v63 }
  0x76   : > { %1515 = vmatprep.subr.mxu1 %v4738_v0  ;;  %1166 = vmatpush1.msra.mxu0 %v4705_v1 }
  0x77   : > { %1516 = vmatpush1.msra.mxu1 %v4737_v3  ;;  %757 = vmatmul.mubr.f32.gmra.mxu0 %v5906_v4 }
  0x78   : > { %990 = vmatmul.mubr.f32.gmra.mxu1 %v5887_v62  ;;  %762 = vmatprep.mubr.f32.mxu0 %v8831_v2 }
  0x79   : > { %995 = vmatprep.mubr.f32.mxu1 %v8831_v2  ;;  %1167 = vmatprep.subr.mxu0 %v4704_v5 }
  0x7a   : > { %1517 = vmatprep.subr.mxu1 %v4736_v6  ;;  %1168 = vmatpush1.msra.mxu0 %v4703_v8 }
  0x7b   : > { %1518 = vmatpush1.msra.mxu1 %v4735_v9  ;;  %763 = vmatmul.mubr.f32.gmra.mxu0 %v5925_v10 }
  0x7c   : > { %996 = vmatmul.mubr.f32.gmra.mxu1 %v5906_v4  ;;  %768 = vmatprep.mubr.f32.mxu0 %v8831_v2 }
  0x7d   : > { %1001 = vmatprep.mubr.f32.mxu1 %v8831_v2  ;;  %1169 = vmatprep.subr.mxu0 %v4702_v11 }
  0x7e   : > { %1519 = vmatprep.subr.mxu1 %v4734_v13  ;;  %1170 = vmatpush1.msra.mxu0 %v4701_v14 }
  0x7f   : > { %1520 = vmatpush1.msra.mxu1 %v4733_v15  ;;  %769 = vmatmul.mubr.f32.gmra.mxu0 %v5944_v16 }
  0x80   : > { %1002 = vmatmul.mubr.f32.gmra.mxu1 %v5925_v10  ;;  %774 = vmatprep.mubr.f32.mxu0 %v8831_v2 }
  0x81   : > { %1007 = vmatprep.mubr.f32.mxu1 %v8831_v2  ;;  %1171 = vmatprep.subr.mxu0 %v4700_v18 }
  0x82   : > { %1521 = vmatprep.subr.mxu1 %v4732_v19  ;;  %1172 = vmatpush1.msra.mxu0 %v4699_v20 }
  0x83   : > { %1522 = vmatpush1.msra.mxu1 %v4731_v21  ;;  %775 = vmatmul.mubr.f32.gmra.mxu0 %v5963_v23 }
  0x84   : > { %1008 = vmatmul.mubr.f32.gmra.mxu1 %v5944_v16  ;;  %780 = vmatprep.mubr.f32.mxu0 %v8831_v2 }
  0x85   : > { %1013 = vmatprep.mubr.f32.mxu1 %v8831_v2  ;;  %1841 = vmatprep.subr.mxu0 %v4794_v24 }
  0x87   : > { %781 = vmatmul.mubr.f32.gmra.mxu0 %v5973_v25 }
  0x88   : > { %1014 = vmatmul.mubr.f32.gmra.mxu1 %v5963_v23  ;;  %786 = vmatprep.mubr.f32.mxu0 %v8831_v2 }
  0x89   : > { %1019 = vmatprep.mubr.f32.mxu1 %v8831_v2 }
  0x8b   : > { %787 = vmatmul.mubr.f32.gmra.mxu0 %v5980_v26 }
  0x8c   : > { %1020 = vmatmul.mubr.f32.gmra.mxu1 %v5973_v25  ;;  %792 = vmatprep.mubr.f32.mxu0 %v8831_v2 }
  0x8d   : > { %1025 = vmatprep.mubr.f32.mxu1 %v8831_v2 }
  0x8f   : > { %793 = vmatmul.mubr.f32.gmra.mxu0 %v5987_v28 }
  0x90   : > { %1026 = vmatmul.mubr.f32.gmra.mxu1 %v5980_v26  ;;  %798 = vmatprep.mubr.f32.mxu0 %v8831_v2 }
  0x91   : > { %1031 = vmatprep.mubr.f32.mxu1 %v8831_v2 }
  0x93   : > { %799 = vmatmul.mubr.f32.gmra.mxu0 %v5994_v29 }
  0x94   : > { %1032 = vmatmul.mubr.f32.gmra.mxu1 %v5987_v28  ;;  %804 = vmatprep.mubr.f32.mxu0 %v8831_v2 }
  0x95   : > { %1037 = vmatprep.mubr.f32.mxu1 %v8831_v2 }
  0x97   : > { %805 = vmatmul.mubr.f32.gmra.mxu0 %v6001_v30 }
  0x98   : > { %1038 = vmatmul.mubr.f32.gmra.mxu1 %v5994_v29  ;;  %810 = vmatprep.mubr.f32.mxu0 %v8831_v2 }
  0x99   : > { %1043 = vmatprep.mubr.f32.mxu1 %v8831_v2 }
  0x9b   : > { %811 = vmatmul.mubr.f32.gmra.mxu0 %v6008_v31 }
  0x9c   : > { %1044 = vmatmul.mubr.f32.gmra.mxu1 %v6001_v30  ;;  %816 = vmatprep.mubr.f32.mxu0 %v8831_v2 }
  0x9d   : > { %1049 = vmatprep.mubr.f32.mxu1 %v8831_v2 }
  0x9f   : > { %817 = vmatmul.mubr.f32.gmra.mxu0 %v6015_v33 }
  0xa0   : > { %1050 = vmatmul.mubr.f32.gmra.mxu1 %v6008_v31  ;;  %822 = vmatprep.mubr.f32.mxu0 %v8831_v2 }
  0xa1   : > { %1055 = vmatprep.mubr.f32.mxu1 %v8831_v2 }
  0xa3   : > { %823 = vmatmul.mubr.f32.gmra.mxu0 %v6022_v34 }
  0xa4   : > { %1056 = vmatmul.mubr.f32.gmra.mxu1 %v6015_v33  ;;  %828 = vmatprep.mubr.f32.mxu0 %v8831_v2 }
  0xa5   : > { %1061 = vmatprep.mubr.f32.mxu1 %v8831_v2 }
  0xa7   : > { %829 = vmatmul.mubr.f32.gmra.mxu0 %v6029_v35 }
  0xa8   : > { %1062 = vmatmul.mubr.f32.gmra.mxu1 %v6022_v34  ;;  %834 = vmatprep.mubr.f32.mxu0 %v8831_v2 }
  0xa9   : > { %1067 = vmatprep.mubr.f32.mxu1 %v8831_v2 }
  0xab   : > { %835 = vmatmul.mubr.f32.gmra.mxu0 %v6036_v36 }
  0xac   : > { %1068 = vmatmul.mubr.f32.gmra.mxu1 %v6029_v35  ;;  %840 = vmatprep.mubr.f32.mxu0 %v8831_v2 }
  0xad   : > { %1073 = vmatprep.mubr.f32.mxu1 %v8831_v2 }
  0xaf   : > { %841 = vmatmul.mubr.f32.gmra.mxu0 %v6043_v38 }
  0xb0   : > { %1074 = vmatmul.mubr.f32.gmra.mxu1 %v6036_v36  ;;  %1205 = vmatprep.mubr.f32.mxu0 %v8831_v2 }
  0xb1   : > { %1555 = vmatprep.mubr.f32.mxu1 %v8831_v2 }
  0xb3   : > { %1206 = vmatmul.mubr.f32.vlgmr.msra.gmra.mxu0 %v5679_v7  ;;  %v4790_v7 = vld [vmem:[%s8848_s1 + $0x4d8] sm:$0xff] }
  0xb4   : > { %1556 = vmatmul.mubr.f32.vlgmr.msra.gmra.mxu1 %v5697_v12  ;;  %1211 = vmatprep.mubr.f32.mxu0 %v8831_v2 }
  0xb5   : > { %1561 = vmatprep.mubr.f32.mxu1 %v8831_v2  ;;  %1842 = vmatpush1.msra.mxu0 %v4793_v39 }
  0xb6   : > { %1843 = vmatprep.subr.mxu0 %v4792_v40 }
  0xb7   : > { %1212 = vmatmul.mubr.f32.gmra.mxu0 %v5697_v12  ;;  %v4788_v12 = vld [vmem:[%s8848_s1 + $0x4c8] sm:$0xff] }
  0xb8   : > { %1562 = vmatmul.mubr.f32.gmra.mxu1 %v5716_v17  ;;  %1217 = vmatprep.mubr.f32.mxu0 %v8831_v2 }
  0xb9   : > { %1567 = vmatprep.mubr.f32.mxu1 %v8831_v2  ;;  %1844 = vmatpush1.msra.mxu0 %v4791_v41 }
  0xba   : > { %1845 = vmatprep.subr.mxu0 %v4790_v7  ;;  %v6293_v7 = vld [vmem:[%s5652_s16 + $0xf0] sm:$0xff] }
  0xbb   : > { %1218 = vmatmul.mubr.f32.gmra.mxu0 %v5716_v17  ;;  %v4786_v17 = vld [vmem:[%s8848_s1 + $0x4b8] sm:$0xff] }
  0xbc   : > { %1568 = vmatmul.mubr.f32.gmra.mxu1 %v5735_v22  ;;  %1223 = vmatprep.mubr.f32.mxu0 %v8831_v2 }
  0xbd   : > { %1573 = vmatprep.mubr.f32.mxu1 %v8831_v2  ;;  %1846 = vmatpush1.msra.mxu0 %v4789_v43 }
  0xbe   : > { %1847 = vmatprep.subr.mxu0 %v4788_v12 }
  0xbf   : > { %1224 = vmatmul.mubr.f32.gmra.mxu0 %v5735_v22  ;;  %v4784_v22 = vld [vmem:[%s8848_s1 + $0x4a8] sm:$0xff] }
  0xc0   : > { %1574 = vmatmul.mubr.f32.gmra.mxu1 %v5754_v27  ;;  %1229 = vmatprep.mubr.f32.mxu0 %v8831_v2 }
  0xc1   : > { %1579 = vmatprep.mubr.f32.mxu1 %v8831_v2  ;;  %1848 = vmatpush1.msra.mxu0 %v4787_v44 }
  0xc2   : > { %1849 = vmatprep.subr.mxu0 %v4786_v17 }
  0xc3   : > { %1230 = vmatmul.mubr.f32.gmra.mxu0 %v5754_v27  ;;  %v4782_v27 = vld [vmem:[%s8848_s1 + $0x498] sm:$0xff] }
  0xc4   : > { %1580 = vmatmul.mubr.f32.gmra.mxu1 %v5773_v32  ;;  %1235 = vmatprep.mubr.f32.mxu0 %v8831_v2 }
  0xc5   : > { %1585 = vmatprep.mubr.f32.mxu1 %v8831_v2  ;;  %1850 = vmatpush1.msra.mxu0 %v4785_v45  ;;  %v1780_v45 = vld [vmem:[%s5652_s16 + $0x20] sm:$0xff] }
  0xc6   : > { %1851 = vmatprep.subr.mxu0 %v4784_v22 }
  0xc7   : > { %1236 = vmatmul.mubr.f32.gmra.mxu0 %v5773_v32  ;;  %v4780_v32 = vld [vmem:[%s8848_s1 + $0x488] sm:$0xff] }
  0xc8   : > { %1586 = vmatmul.mubr.f32.gmra.mxu1 %v5792_v37  ;;  %1241 = vmatprep.mubr.f32.mxu0 %v8831_v2 }
  0xc9   : > { %1591 = vmatprep.mubr.f32.mxu1 %v8831_v2  ;;  %1852 = vmatpush1.msra.mxu0 %v4783_v46 }
  0xca   : > { %1853 = vmatprep.subr.mxu0 %v4782_v27 }
  0xcb   : > { %1242 = vmatmul.mubr.f32.gmra.mxu0 %v5792_v37  ;;  %v4778_v37 = vld [vmem:[%s8848_s1 + $0x478] sm:$0xff] }
  0xcc   : > { %1592 = vmatmul.mubr.f32.gmra.mxu1 %v5811_v42  ;;  %1247 = vmatprep.mubr.f32.mxu0 %v8831_v2 }
  0xcd   : > { %1597 = vmatprep.mubr.f32.mxu1 %v8831_v2  ;;  %1854 = vmatpush1.msra.mxu0 %v4781_v48 }
  0xce   : > { %1855 = vmatprep.subr.mxu0 %v4780_v32 }
  0xcf   : > { %1248 = vmatmul.mubr.f32.gmra.mxu0 %v5811_v42  ;;  %v4776_v42 = vld [vmem:[%s8848_s1 + $0x468] sm:$0xff] }
  0xd0   : > { %1598 = vmatmul.mubr.f32.gmra.mxu1 %v5830_v47  ;;  %1253 = vmatprep.mubr.f32.mxu0 %v8831_v2 }
  0xd1   : > { %1603 = vmatprep.mubr.f32.mxu1 %v8831_v2  ;;  %1856 = vmatpush1.msra.mxu0 %v4779_v49  ;;  %v1781_v49 = vld [vmem:[%s5652_s16 + $0x28] sm:$0xff] }
  0xd2   : > { %1857 = vmatprep.subr.mxu0 %v4778_v37 }
  0xd3   : > { %1254 = vmatmul.mubr.f32.gmra.mxu0 %v5830_v47  ;;  %v4774_v47 = vld [vmem:[%s8848_s1 + $0x458] sm:$0xff] }
  0xd4   : > { %1604 = vmatmul.mubr.f32.gmra.mxu1 %v5849_v52  ;;  %1259 = vmatprep.mubr.f32.mxu0 %v8831_v2 }
  0xd5   : > { %1609 = vmatprep.mubr.f32.mxu1 %v8831_v2  ;;  %1858 = vmatpush1.msra.mxu0 %v4777_v50 }
  0xd6   : > { %1859 = vmatprep.subr.mxu0 %v4776_v42 }
  0xd7   : > { %1260 = vmatmul.mubr.f32.gmra.mxu0 %v5849_v52  ;;  %v4772_v52 = vld [vmem:[%s8848_s1 + $0x448] sm:$0xff] }
  0xd8   : > { %1610 = vmatmul.mubr.f32.gmra.mxu1 %v5868_v57  ;;  %1265 = vmatprep.mubr.f32.mxu0 %v8831_v2 }
  0xd9   : > { %1615 = vmatprep.mubr.f32.mxu1 %v8831_v2  ;;  %1860 = vmatpush1.msra.mxu0 %v4775_v51 }
  0xda   : > { %1861 = vmatprep.subr.mxu0 %v4774_v47 }
  0xdb   : > { %1266 = vmatmul.mubr.f32.gmra.mxu0 %v5868_v57  ;;  %v4768_v57 = vld [vmem:[%s8848_s1 + $0x428] sm:$0xff] }
  0xdc   : > { %1616 = vmatmul.mubr.f32.gmra.mxu1 %v5887_v62  ;;  %1271 = vmatprep.mubr.f32.mxu0 %v8831_v2 }
  0xdd   : > { %1621 = vmatprep.mubr.f32.mxu1 %v8831_v2  ;;  %1862 = vmatpush1.msra.mxu0 %v4773_v53  ;;  %v1782_v53 = vld [vmem:[%s5652_s16 + $0x30] sm:$0xff] }
  0xde   : > { %1863 = vmatprep.subr.mxu0 %v4772_v52 }
  0xdf   : > { %1272 = vmatmul.mubr.f32.gmra.mxu0 %v5887_v62  ;;  %v4763_v62 = vld [vmem:[%s8848_s1 + $0x400] sm:$0xff]  ;;  %s5258_s1 = scalar_lea.vmem %s4602_s18, 128 }
  0xe0   : > { %1622 = vmatmul.mubr.f32.gmra.mxu1 %v5906_v4  ;;  %1277 = vmatprep.mubr.f32.mxu0 %v8831_v2  ;;  %p5259_p11 = scmp.ne.s32.totalorder %s4602_s18, %s5258_s1  ;;  %p5266_p1 = scmp.lt.s32.totalorder %s5264_s21, %s5258_s1 }
  0xe1   : > { %1627 = vmatprep.mubr.f32.mxu1 %v8831_v2  ;;  %1864 = vmatpush1.msra.mxu0 %v4771_v54 }
  0xe2   : > { %1865 = vmatprep.subr.mxu0 %v4770_v55  ;;  %p5260_p12 = pnand %p5259_p11, %p5446_p5  ;;  %p5267_p2 = por %p5266_p1, %p5265_p0 }
  0xe3   : > { %1278 = vmatmul.mubr.f32.gmra.mxu0 %v5906_v4 }
  0xe4   : > { %1628 = vmatmul.mubr.f32.gmra.mxu1 %v5925_v10  ;;  %1283 = vmatprep.mubr.f32.mxu0 %v8831_v2  ;;  %p5261_p13 = pneg %p5260_p12 }
  0xe5   : > { %1633 = vmatprep.mubr.f32.mxu1 %v8831_v2  ;;  %1866 = vmatpush1.msra.mxu0 %v4769_v56 }
  0xe6   : > { %1867 = vmatprep.subr.mxu0 %v4768_v57  ;;  %p5268_p3 = pnand %p5267_p2, %p5261_p13 }
  0xe7   : > { %1284 = vmatmul.mubr.f32.gmra.mxu0 %v5925_v10 }
  0xe8   : > { %1634 = vmatmul.mubr.f32.gmra.mxu1 %v5944_v16  ;;  %1289 = vmatprep.mubr.f32.mxu0 %v8831_v2 }
  0xe9   : > { %1639 = vmatprep.mubr.f32.mxu1 %v8831_v2  ;;  %1868 = vmatpush1.msra.mxu0 %v4767_v58  ;;  %v1783_v58 = vld [vmem:[%s5652_s16 + $0x38] sm:$0xff] }
  0xea   : > { %1869 = vmatprep.subr.mxu0 %v4766_v59 }
  0xeb   : > { %1290 = vmatmul.mubr.f32.gmra.mxu0 %v5944_v16 }
  0xec   : > { %1640 = vmatmul.mubr.f32.gmra.mxu1 %v5963_v23  ;;  %1295 = vmatprep.mubr.f32.mxu0 %v8831_v2 }
  0xed   : > { %1645 = vmatprep.mubr.f32.mxu1 %v8831_v2  ;;  %1870 = vmatpush1.msra.mxu0 %v4765_v60 }
  0xee   : > { %1871 = vmatprep.subr.mxu0 %v4764_v61 }
  0xef   : > { %1296 = vmatmul.mubr.f32.gmra.mxu0 %v5963_v23 }
  0xf0   : > { %1646 = vmatmul.mubr.f32.gmra.mxu1 %v5973_v25  ;;  %1301 = vmatprep.mubr.f32.mxu0 %v8831_v2 }
  0xf1   : > { %1651 = vmatprep.mubr.f32.mxu1 %v8831_v2  ;;  %1872 = vmatpush1.msra.mxu0 %v4763_v62 }
  0xf2   : > { %2748 = vmatprep.subr.mxu0 %v8831_v2 }
  0xf3   : > { %1302 = vmatmul.mubr.f32.gmra.mxu0 %v5973_v25 }
  0xf4   : > { %1652 = vmatmul.mubr.f32.gmra.mxu1 %v5980_v26  ;;  %1307 = vmatprep.mubr.f32.mxu0 %v8831_v2 }
  0xf5   : > { %1657 = vmatprep.mubr.f32.mxu1 %v8831_v2 }
  0xf7   : > { %1308 = vmatmul.mubr.f32.gmra.mxu0 %v5980_v26 }
  0xf8   : > { %1658 = vmatmul.mubr.f32.gmra.mxu1 %v5987_v28  ;;  %1313 = vmatprep.mubr.f32.mxu0 %v8831_v2 }
  0xf9   : > { %1663 = vmatprep.mubr.f32.mxu1 %v8831_v2 }
  0xfb   : > { %1314 = vmatmul.mubr.f32.gmra.mxu0 %v5987_v28 }
  0xfc   : > { %1664 = vmatmul.mubr.f32.gmra.mxu1 %v5994_v29  ;;  %1319 = vmatprep.mubr.f32.mxu0 %v8831_v2 }
  0xfd   : > { %1669 = vmatprep.mubr.f32.mxu1 %v8831_v2 }
  0xff   : > { %1320 = vmatmul.mubr.f32.gmra.mxu0 %v5994_v29 }
 0x100   : > { %1670 = vmatmul.mubr.f32.gmra.mxu1 %v6001_v30  ;;  %1325 = vmatprep.mubr.f32.mxu0 %v8831_v2 }
 0x101   : > { %1675 = vmatprep.mubr.f32.mxu1 %v8831_v2 }
 0x103   : > { %v680_v63 = vpop.f32.mrf.mxu0  ;;  %1326 = vmatmul.mubr.f32.gmra.mxu0 %v6001_v30 }
 0x104   : > { %v913_v0 = vpop.f32.mrf.mxu1  ;;  %1676 = vmatmul.mubr.f32.gmra.mxu1 %v6008_v31  ;;  %1331 = vmatprep.mubr.f32.mxu0 %v8831_v2 }
 0x105   : > { %v6225_v1 = vadd.f32 %v913_v0, %v680_v63  ;;  %1681 = vmatprep.mubr.f32.mxu1 %v8831_v2  ;;  %v6229_v3 = vpop.f32.mrf.mxu0  ;;  %v1784_v0 = vld [vmem:[%s5652_s16 + $0x40] sm:$0xff] }
 0x106   : > { %v6231_v4 = vpop.f32.mrf.mxu1 }
 0x107   : > { %v686_v5 = vpop.f32.mrf.mxu0  ;;  %1332 = vmatmul.mubr.f32.gmra.mxu0 %v6008_v31 }
 0x108   : > { %v919_v6 = vpop.f32.mrf.mxu1  ;;  %1682 = vmatmul.mubr.f32.gmra.mxu1 %v6015_v33  ;;  %1337 = vmatprep.mubr.f32.mxu0 %v8831_v2 }
 0x109   : > { %v6235_v8 = vadd.f32 %v919_v6, %v686_v5  ;;  %1687 = vmatprep.mubr.f32.mxu1 %v8831_v2  ;;  %v6239_v9 = vpop.f32.mrf.mxu0 }
 0x10a   : > { %v6241_v10 = vpop.f32.mrf.mxu1 }
 0x10b   : > { %v692_v11 = vpop.f32.mrf.mxu0  ;;  %1338 = vmatmul.mubr.f32.gmra.mxu0 %v6015_v33 }
 0x10c   : > { %v925_v13 = vpop.f32.mrf.mxu1  ;;  %1688 = vmatmul.mubr.f32.gmra.mxu1 %v6022_v34  ;;  %1343 = vmatprep.mubr.f32.mxu0 %v8831_v2 }
 0x10d   : > { %v6245_v14 = vadd.f32 %v925_v13, %v692_v11  ;;  %1693 = vmatprep.mubr.f32.mxu1 %v8831_v2  ;;  %v6249_v15 = vpop.f32.mrf.mxu0 }
 0x10e   : > { %v6251_v16 = vpop.f32.mrf.mxu1 }
 0x10f   : > { %v698_v18 = vpop.f32.mrf.mxu0  ;;  %1344 = vmatmul.mubr.f32.gmra.mxu0 %v6022_v34  ;;  %v6280_v34 = vld [vmem:[%s5652_s16 + $0xe8] sm:$0xff] }
 0x110   : > { %v931_v19 = vpop.f32.mrf.mxu1  ;;  %1694 = vmatmul.mubr.f32.gmra.mxu1 %v6029_v35  ;;  %1349 = vmatprep.mubr.f32.mxu0 %v8831_v2 }
 0x111   : > { %v6255_v20 = vadd.f32 %v931_v19, %v698_v18  ;;  %1699 = vmatprep.mubr.f32.mxu1 %v8831_v2  ;;  %v6259_v21 = vpop.f32.mrf.mxu0  ;;  %v1785_v19 = vld [vmem:[%s5652_s16 + $0x48] sm:$0xff] }
 0x112   : > { %v6261_v23 = vpop.f32.mrf.mxu1 }
 0x113   : > { %v704_v24 = vpop.f32.mrf.mxu0  ;;  %1350 = vmatmul.mubr.f32.gmra.mxu0 %v6029_v35 }
 0x114   : > { %v937_v25 = vpop.f32.mrf.mxu1  ;;  %1700 = vmatmul.mubr.f32.gmra.mxu1 %v6036_v36  ;;  %1355 = vmatprep.mubr.f32.mxu0 %v8831_v2 }
 0x115   : > { %v6265_v26 = vadd.f32 %v937_v25, %v704_v24  ;;  %1705 = vmatprep.mubr.f32.mxu1 %v8831_v2  ;;  %v6269_v28 = vpop.f32.mrf.mxu0 }
 0x116   : > { %v6271_v29 = vpop.f32.mrf.mxu1 }
 0x117   : > { %v710_v30 = vpop.f32.mrf.mxu0  ;;  %1356 = vmatmul.mubr.f32.gmra.mxu0 %v6036_v36 }
 0x118   : > { %v943_v31 = vpop.f32.mrf.mxu1  ;;  %1706 = vmatmul.mubr.f32.gmra.mxu1 %v6043_v38  ;;  %1361 = vmatprep.mubr.f32.mxu0 %v8831_v2 }
 0x119   : > { %v6275_v33 = vadd.f32 %v943_v31, %v710_v30  ;;  %1711 = vmatprep.mubr.f32.mxu1 %v8831_v2  ;;  %v6282_v35 = vpop.f32.mrf.mxu0 }
 0x11a   : > { %v6284_v39 = vpop.f32.mrf.mxu1 }
 0x11b   : > { %v716_v40 = vpop.f32.mrf.mxu0  ;;  %1362 = vmatmul.mubr.f32.gmra.mxu0 %v6043_v38 }
 0x11c   : > { %v949_v41 = vpop.f32.mrf.mxu1  ;;  %1712 = vmatmul.mubr.f32.gmra.mxu1 %v6280_v34  ;;  %1367 = vmatprep.mubr.f32.mxu0 %v8831_v2 }
 0x11d   : > { %v6288_v36 = vadd.f32 %v949_v41, %v716_v40  ;;  %1717 = vmatprep.mubr.f32.mxu1 %v8831_v2  ;;  %v6295_v43 = vpop.f32.mrf.mxu0  ;;  %v1786_v41 = vld [vmem:[%s5652_s16 + $0x50] sm:$0xff] }
 0x11e   : > { %v6297_v12 = vpop.f32.mrf.mxu1 }
 0x11f   : > { %v722_v44 = vpop.f32.mrf.mxu0  ;;  %1368 = vmatmul.mubr.f32.gmra.mxu0 %v6280_v34 }
 0x120   : > { %v955_v17 = vpop.f32.mrf.mxu1  ;;  %1718 = vmatmul.mubr.f32.gmra.mxu1 %v6293_v7  ;;  %1905 = vmatprep.mubr.f32.mxu0 %v8831_v2 }
 0x121   : > { %v6301_v38 = vadd.f32 %v955_v17, %v722_v44  ;;  %v6305_v22 = vpop.f32.mrf.mxu0 }
 0x122   : > { %8850 = vst [vmem:[#allocation11_spill] sm:$0xff] %v6305_v22  ;;  %v6307_v46 = vpop.f32.mrf.mxu1 }
 0x123   : > { %8851 = vst [vmem:[#allocation12_spill] sm:$0xff] %v6307_v46  ;;  %v728_v27 = vpop.f32.mrf.mxu0  ;;  %1906 = vmatmul.mubr.f32.vlgmr.msra.gmra.mxu0 %v1780_v45 }
 0x124   : > { %v961_v48 = vpop.f32.mrf.mxu1  ;;  %1911 = vmatprep.mubr.f32.mxu0 %v8831_v2 }
 0x125   : > { %v6309_v32 = vadd.f32 %v961_v48, %v728_v27  ;;  %v6313_v37 = vpop.f32.mrf.mxu0 }
 0x126   : > { %8852 = vst [vmem:[#allocation13_spill] sm:$0xff] %v6313_v37  ;;  %v6315_v50 = vpop.f32.mrf.mxu1 }
 0x127   : > { %8853 = vst [vmem:[#allocation14_spill] sm:$0xff] %v6315_v50  ;;  %v734_v42 = vpop.f32.mrf.mxu0  ;;  %1912 = vmatmul.mubr.f32.gmra.mxu0 %v1781_v49  ;;  %v1787_v49 = vld [vmem:[%s5652_s16 + $0x58] sm:$0xff] }
 0x128   : > { %v967_v51 = vpop.f32.mrf.mxu1  ;;  %1917 = vmatprep.mubr.f32.mxu0 %v8831_v2 }
 0x129   : > { %v6317_v47 = vadd.f32 %v967_v51, %v734_v42  ;;  %v6321_v52 = vpop.f32.mrf.mxu0 }
 0x12a   : > { %8854 = vst [vmem:[#allocation15_spill] sm:$0xff] %v6321_v52  ;;  %v6323_v54 = vpop.f32.mrf.mxu1 }
 0x12b   : > { %8855 = vst [vmem:[#allocation16_spill] sm:$0xff] %v6323_v54  ;;  %v740_v55 = vpop.f32.mrf.mxu0  ;;  %1918 = vmatmul.mubr.f32.gmra.mxu0 %v1782_v53 }
 0x12c   : > { %v973_v56 = vpop.f32.mrf.mxu1  ;;  %1923 = vmatprep.mubr.f32.mxu0 %v8831_v2 }
 0x12d   : > { %v6325_v57 = vadd.f32 %v973_v56, %v740_v55  ;;  %v6329_v59 = vpop.f32.mrf.mxu0 }
 0x12e   : > { %8856 = vst [vmem:[#allocation17_spill] sm:$0xff] %v6329_v59  ;;  %v6331_v60 = vpop.f32.mrf.mxu1 }
 0x12f   : > { %8857 = vst [vmem:[#allocation18_spill] sm:$0xff] %v6331_v60  ;;  %v746_v61 = vpop.f32.mrf.mxu0  ;;  %1924 = vmatmul.mubr.f32.gmra.mxu0 %v1783_v58  ;;  %v1788_v58 = vld [vmem:[%s5652_s16 + $0x60] sm:$0xff] }
 0x130   : > { %v979_v62 = vpop.f32.mrf.mxu1  ;;  %1929 = vmatprep.mubr.f32.mxu0 %v8831_v2 }
 0x131   : > { %v6333_v63 = vadd.f32 %v979_v62, %v746_v61  ;;  %v6337_v5 = vpop.f32.mrf.mxu0 }
 0x132   : > { %8858 = vst [vmem:[#allocation19_spill] sm:$0xff] %v6337_v5  ;;  %v6339_v6 = vpop.f32.mrf.mxu1 }
 0x133   : > { %8859 = vst [vmem:[#allocation20_spill] sm:$0xff] %v6339_v6  ;;  %v752_v11 = vpop.f32.mrf.mxu0  ;;  %1930 = vmatmul.mubr.f32.gmra.mxu0 %v1784_v0 }
 0x134   : > { %v985_v13 = vpop.f32.mrf.mxu1  ;;  %1935 = vmatprep.mubr.f32.mxu0 %v8831_v2 }
 0x135   : > { %v6341_v18 = vadd.f32 %v985_v13, %v752_v11  ;;  %v6345_v24 = vpop.f32.mrf.mxu0 }
 0x136   : > { %8860 = vst [vmem:[#allocation21_spill] sm:$0xff] %v6345_v24  ;;  %v6347_v25 = vpop.f32.mrf.mxu1 }
 0x137   : > { %8861 = vst [vmem:[#allocation22_spill] sm:$0xff] %v6347_v25  ;;  %v758_v30 = vpop.f32.mrf.mxu0  ;;  %1936 = vmatmul.mubr.f32.gmra.mxu0 %v1785_v19  ;;  %v1789_v19 = vld [vmem:[%s5652_s16 + $0x68] sm:$0xff] }
 0x138   : > { %v991_v31 = vpop.f32.mrf.mxu1  ;;  %1941 = vmatprep.mubr.f32.mxu0 %v8831_v2 }
 0x139   : > { %v6349_v40 = vadd.f32 %v991_v31, %v758_v30  ;;  %v6353_v44 = vpop.f32.mrf.mxu0 }
 0x13a   : > { %8862 = vst [vmem:[#allocation23_spill] sm:$0xff] %v6353_v44  ;;  %v6355_v17 = vpop.f32.mrf.mxu1 }
 0x13b   : > { %8863 = vst [vmem:[#allocation24_spill] sm:$0xff] %v6355_v17  ;;  %v764_v45 = vpop.f32.mrf.mxu0  ;;  %1942 = vmatmul.mubr.f32.gmra.mxu0 %v1786_v41 }
 0x13c   : > { %v997_v27 = vpop.f32.mrf.mxu1  ;;  %1947 = vmatprep.mubr.f32.mxu0 %v8831_v2 }
 0x13d   : > { %v6357_v48 = vadd.f32 %v997_v27, %v764_v45  ;;  %v6361_v42 = vpop.f32.mrf.mxu0 }
 0x13e   : > { %8864 = vst [vmem:[#allocation25_spill] sm:$0xff] %v6361_v42  ;;  %v6363_v51 = vpop.f32.mrf.mxu1 }
 0x13f   : > { %8865 = vst [vmem:[#allocation26_spill] sm:$0xff] %v6363_v51  ;;  %v770_v53 = vpop.f32.mrf.mxu0  ;;  %1948 = vmatmul.mubr.f32.gmra.mxu0 %v1787_v49  ;;  %v1790_v49 = vld [vmem:[%s5652_s16 + $0x70] sm:$0xff] }
 0x140   : > { %v1003_v55 = vpop.f32.mrf.mxu1  ;;  %1953 = vmatprep.mubr.f32.mxu0 %v8831_v2 }
 0x141   : > { %v6365_v56 = vadd.f32 %v1003_v55, %v770_v53  ;;  %v6369_v61 = vpop.f32.mrf.mxu0 }
 0x142   : > { %8866 = vst [vmem:[#allocation27_spill] sm:$0xff] %v6369_v61  ;;  %v6371_v62 = vpop.f32.mrf.mxu1 }
 0x143   : > { %8867 = vst [vmem:[#allocation28_spill] sm:$0xff] %v6371_v62  ;;  %v776_v0 = vpop.f32.mrf.mxu0  ;;  %1954 = vmatmul.mubr.f32.gmra.mxu0 %v1788_v58 }
 0x144   : > { %v1009_v11 = vpop.f32.mrf.mxu1  ;;  %1959 = vmatprep.mubr.f32.mxu0 %v8831_v2 }
 0x145   : > { %v6373_v13 = vadd.f32 %v1009_v11, %v776_v0  ;;  %v6377_v30 = vpop.f32.mrf.mxu0 }
 0x146   : > { %8868 = vst [vmem:[#allocation29_spill] sm:$0xff] %v6377_v30  ;;  %v6379_v31 = vpop.f32.mrf.mxu1 }
 0x147   : > { %8869 = vst [vmem:[#allocation30_spill] sm:$0xff] %v6379_v31  ;;  %v782_v41 = vpop.f32.mrf.mxu0  ;;  %1960 = vmatmul.mubr.f32.gmra.mxu0 %v1789_v19  ;;  %v1791_v31 = vld [vmem:[%s5652_s16 + $0x78] sm:$0xff] }
 0x148   : > { %v1015_v45 = vpop.f32.mrf.mxu1  ;;  %1965 = vmatprep.mubr.f32.mxu0 %v8831_v2 }
 0x149   : > { %v6381_v27 = vadd.f32 %v1015_v45, %v782_v41  ;;  %v6385_v53 = vpop.f32.mrf.mxu0 }
 0x14a   : > { %8870 = vst [vmem:[#allocation31_spill] sm:$0xff] %v6385_v53  ;;  %v6387_v55 = vpop.f32.mrf.mxu1 }
 0x14b   : > { %8871 = vst [vmem:[#allocation32_spill] sm:$0xff] %v6387_v55  ;;  %v788_v58 = vpop.f32.mrf.mxu0  ;;  %1966 = vmatmul.mubr.f32.gmra.mxu0 %v1790_v49  ;;  %v1792_v55 = vld [vmem:[%s5652_s16 + $0x80] sm:$0xff] }
 0x14c   : > { %v1021_v0 = vpop.f32.mrf.mxu1  ;;  %1971 = vmatprep.mubr.f32.mxu0 %v8831_v2 }
 0x14d   : > { %v6389_v11 = vadd.f32 %v1021_v0, %v788_v58  ;;  %v6393_v19 = vpop.f32.mrf.mxu0 }
 0x14e   : > { %8872 = vst [vmem:[#allocation33_spill] sm:$0xff] %v6393_v19  ;;  %v6395_v41 = vpop.f32.mrf.mxu1 }
 0x14f   : > { %8873 = vst [vmem:[#allocation34_spill] sm:$0xff] %v6395_v41  ;;  %v794_v45 = vpop.f32.mrf.mxu0  ;;  %1972 = vmatmul.mubr.f32.gmra.mxu0 %v1791_v31  ;;  %v1793_v41 = vld [vmem:[%s5652_s16 + $0x88] sm:$0xff] }
 0x150   : > { %v1027_v30 = vpop.f32.mrf.mxu1  ;;  %1977 = vmatprep.mubr.f32.mxu0 %v8831_v2 }
 0x151   : > { %v6397_v62 = vadd.f32 %v1027_v30, %v794_v45  ;;  %v6401_v49 = vpop.f32.mrf.mxu0 }
 0x152   : > { %8874 = vst [vmem:[#allocation35_spill] sm:$0xff] %v6401_v49  ;;  %v6403_v58 = vpop.f32.mrf.mxu1 }
 0x153   : > { %8875 = vst [vmem:[#allocation36_spill] sm:$0xff] %v6403_v58  ;;  %v800_v0 = vpop.f32.mrf.mxu0  ;;  %1978 = vmatmul.mubr.f32.gmra.mxu0 %v1792_v55  ;;  %v1794_v58 = vld [vmem:[%s5652_s16 + $0x90] sm:$0xff] }
 0x154   : > { %v1033_v53 = vpop.f32.mrf.mxu1  ;;  %1983 = vmatprep.mubr.f32.mxu0 %v8831_v2 }
 0x155   : > { %v6405_v61 = vadd.f32 %v1033_v53, %v800_v0  ;;  %v6409_v31 = vpop.f32.mrf.mxu0 }
 0x156   : > { %8876 = vst [vmem:[#allocation37_spill] sm:$0xff] %v6409_v31  ;;  %v6411_v30 = vpop.f32.mrf.mxu1 }
 0x157   : > { %8877 = vst [vmem:[#allocation38_spill] sm:$0xff] %v6411_v30  ;;  %v806_v45 = vpop.f32.mrf.mxu0  ;;  %1984 = vmatmul.mubr.f32.gmra.mxu0 %v1793_v41  ;;  %v1795_v30 = vld [vmem:[%s5652_s16 + $0x98] sm:$0xff] }
 0x158   : > { %v1039_v19 = vpop.f32.mrf.mxu1  ;;  %1989 = vmatprep.mubr.f32.mxu0 %v8831_v2 }
 0x159   : > { %v6413_v51 = vadd.f32 %v1039_v19, %v806_v45  ;;  %v6417_v55 = vpop.f32.mrf.mxu0 }
 0x15a   : > { %8878 = vst [vmem:[#allocation39_spill] sm:$0xff] %v6417_v55  ;;  %v6419_v53 = vpop.f32.mrf.mxu1 }
 0x15b   : > { %8879 = vst [vmem:[#allocation40_spill] sm:$0xff] %v6419_v53  ;;  %v812_v0 = vpop.f32.mrf.mxu0  ;;  %1990 = vmatmul.mubr.f32.gmra.mxu0 %v1794_v58  ;;  %v1796_v53 = vld [vmem:[%s5652_s16 + $0xa0] sm:$0xff] }
 0x15c   : > { %v1045_v49 = vpop.f32.mrf.mxu1  ;;  %1995 = vmatprep.mubr.f32.mxu0 %v8831_v2 }
 0x15d   : > { %v6421_v42 = vadd.f32 %v1045_v49, %v812_v0  ;;  %v6425_v41 = vpop.f32.mrf.mxu0 }
 0x15e   : > { %8880 = vst [vmem:[#allocation41_spill] sm:$0xff] %v6425_v41  ;;  %v6427_v19 = vpop.f32.mrf.mxu1 }
 0x15f   : > { %8881 = vst [vmem:[#allocation42_spill] sm:$0xff] %v6427_v19  ;;  %v818_v45 = vpop.f32.mrf.mxu0  ;;  %1996 = vmatmul.mubr.f32.gmra.mxu0 %v1795_v30  ;;  %v1797_v19 = vld [vmem:[%s5652_s16 + $0xa8] sm:$0xff] }
 0x160   : > { %v1051_v31 = vpop.f32.mrf.mxu1  ;;  %2001 = vmatprep.mubr.f32.mxu0 %v8831_v2 }
 0x161   : > { %v6429_v17 = vadd.f32 %v1051_v31, %v818_v45  ;;  %v6433_v58 = vpop.f32.mrf.mxu0 }
 0x162   : > { %8882 = vst [vmem:[#allocation43_spill] sm:$0xff] %v6433_v58  ;;  %v6435_v49 = vpop.f32.mrf.mxu1 }
 0x163   : > { %8883 = vst [vmem:[#allocation44_spill] sm:$0xff] %v6435_v49  ;;  %v824_v0 = vpop.f32.mrf.mxu0  ;;  %2002 = vmatmul.mubr.f32.gmra.mxu0 %v1796_v53  ;;  %v1798_v49 = vld [vmem:[%s5652_s16 + $0xb0] sm:$0xff] }
 0x164   : > { %v1057_v55 = vpop.f32.mrf.mxu1  ;;  %2007 = vmatprep.mubr.f32.mxu0 %v8831_v2 }
 0x165   : > { %v6437_v44 = vadd.f32 %v1057_v55, %v824_v0  ;;  %v6441_v30 = vpop.f32.mrf.mxu0 }
 0x166   : > { %8884 = vst [vmem:[#allocation45_spill] sm:$0xff] %v6441_v30  ;;  %v6443_v31 = vpop.f32.mrf.mxu1 }
 0x167   : > { %8885 = vst [vmem:[#allocation46_spill] sm:$0xff] %v6443_v31  ;;  %v830_v45 = vpop.f32.mrf.mxu0  ;;  %2008 = vmatmul.mubr.f32.gmra.mxu0 %v1797_v19  ;;  %v1799_v31 = vld [vmem:[%s5652_s16 + $0xb8] sm:$0xff] }
 0x168   : > { %v1063_v41 = vpop.f32.mrf.mxu1  ;;  %2013 = vmatprep.mubr.f32.mxu0 %v8831_v2 }
 0x169   : > { %v6445_v25 = vadd.f32 %v1063_v41, %v830_v45  ;;  %v6449_v53 = vpop.f32.mrf.mxu0 }
 0x16a   : > { %8886 = vst [vmem:[#allocation47_spill] sm:$0xff] %v6449_v53  ;;  %v6451_v55 = vpop.f32.mrf.mxu1 }
 0x16b   : > { %8887 = vst [vmem:[#allocation48_spill] sm:$0xff] %v6451_v55  ;;  %v836_v0 = vpop.f32.mrf.mxu0  ;;  %2014 = vmatmul.mubr.f32.gmra.mxu0 %v1798_v49  ;;  %v1800_v55 = vld [vmem:[%s5652_s16 + $0xc0] sm:$0xff] }
 0x16c   : > { %v1069_v58 = vpop.f32.mrf.mxu1  ;;  %2019 = vmatprep.mubr.f32.mxu0 %v8831_v2 }
 0x16d   : > { %v6453_v24 = vadd.f32 %v1069_v58, %v836_v0  ;;  %v6457_v19 = vpop.f32.mrf.mxu0 }
 0x16e   : > { %8888 = vst [vmem:[#allocation49_spill] sm:$0xff] %v6457_v19  ;;  %v6459_v41 = vpop.f32.mrf.mxu1 }
 0x16f   : > { %8889 = vst [vmem:[#allocation50_spill] sm:$0xff] %v6459_v41  ;;  %v842_v45 = vpop.f32.mrf.mxu0  ;;  %2020 = vmatmul.mubr.f32.gmra.mxu0 %v1799_v31  ;;  %v1801_v41 = vld [vmem:[%s5652_s16 + $0xc8] sm:$0xff] }
 0x170   : > { %v1075_v30 = vpop.f32.mrf.mxu1  ;;  %2025 = vmatprep.mubr.f32.mxu0 %v8831_v2 }
 0x171   : > { %v6461_v6 = vadd.f32 %v1075_v30, %v842_v45  ;;  %v6465_v53 = vpop.f32.mrf.mxu0 }
 0x172   : > { %8890 = vst [vmem:[#allocation51_spill] sm:$0xff] %v6465_v53  ;;  %v6467_v58 = vpop.f32.mrf.mxu1 }
 0x173   : > { %8891 = vst [vmem:[#allocation52_spill] sm:$0xff] %v6467_v58  ;;  %v1207_v49 = vpop.f32.mrf.mxu0  ;;  %2026 = vmatmul.mubr.f32.gmra.mxu0 %v1800_v55  ;;  %v1802_v55 = vld [vmem:[%s5652_s16 + $0xd0] sm:$0xff] }
 0x174   : > { %v1557_v0 = vpop.f32.mrf.mxu1  ;;  %v1374_v19 = vadd.f32 %v1207_v49, %v6225_v1  ;;  %2031 = vmatprep.mubr.f32.mxu0 %v8831_v2 }
 0x175   : > { %v6472_v5 = vpop.f32.mrf.mxu0 }
 0x176   : > { %v6474_v30 = vpop.f32.mrf.mxu1  ;;  %v6476_v31 = vadd.f32 %v1557_v0, %v1374_v19 }
 0x177   : > { %v1213_v45 = vpop.f32.mrf.mxu0  ;;  %2032 = vmatmul.mubr.f32.gmra.mxu0 %v1801_v41  ;;  %v1803_v41 = vld [vmem:[%s5652_s16 + $0xd8] sm:$0xff] }
 0x178   : > { %v1563_v53 = vpop.f32.mrf.mxu1  ;;  %v1376_v58 = vadd.f32 %v1213_v45, %v6235_v8  ;;  %2037 = vmatprep.mubr.f32.mxu0 %v8831_v2 }
 0x179   : > { %v6481_v60 = vpop.f32.mrf.mxu0 }
 0x17a   : > { %v6483_v1 = vpop.f32.mrf.mxu1  ;;  %v6485_v49 = vadd.f32 %v1563_v53, %v1376_v58  ;;  %v1804_v58 = vld [vmem:[%s5652_s16 + $0xe0] sm:$0xff] }
 0x17b   : > { %v1219_v59 = vpop.f32.mrf.mxu0  ;;  %2038 = vmatmul.mubr.f32.gmra.mxu0 %v1802_v55 }
 0x17c   : > { %v1569_v54 = vpop.f32.mrf.mxu1  ;;  %v1378_v19 = vadd.f32 %v1219_v59, %v6245_v14  ;;  %2043 = vmatprep.mubr.f32.mxu0 %v8831_v2 }
 0x17d   : > { %v6490_v0 = vpop.f32.mrf.mxu0 }
 0x17e   : > { %v6492_v8 = vpop.f32.mrf.mxu1  ;;  %v6494_v45 = vadd.f32 %v1569_v54, %v1378_v19 }
 0x17f   : > { %v1225_v52 = vpop.f32.mrf.mxu0  ;;  %2044 = vmatmul.mubr.f32.gmra.mxu0 %v1803_v41 }
 0x180   : > { %v1575_v50 = vpop.f32.mrf.mxu1  ;;  %v1380_v53 = vadd.f32 %v1225_v52, %v6255_v20  ;;  %2049 = vmatprep.mubr.f32.mxu0 %v8831_v2 }
 0x181   : > { %v6499_v55 = vpop.f32.mrf.mxu0 }
 0x182   : > { %v6501_v14 = vpop.f32.mrf.mxu1  ;;  %v6503_v59 = vadd.f32 %v1575_v50, %v1380_v53 }
 0x183   : > { %v1231_v37 = vpop.f32.mrf.mxu0  ;;  %2050 = vmatmul.mubr.f32.gmra.mxu0 %v1804_v58 }
 0x184   : > { %v1581_v46 = vpop.f32.mrf.mxu1  ;;  %v1382_v54 = vadd.f32 %v1231_v37, %v6265_v26  ;;  %2055 = vmatprep.mubr.f32.mxu0 %v8831_v2 }
 0x185   : > { %v6507_v19 = vpop.f32.mrf.mxu0 }
 0x186   : > { %v6509_v20 = vpop.f32.mrf.mxu1  ;;  %v6511_v52 = vadd.f32 %v1581_v46, %v1382_v54  ;;  %v1807_v46 = vld [vmem:[%s5652_s16 + $0xf8] sm:$0xff] }
 0x187   : > { %v1237_v41 = vpop.f32.mrf.mxu0  ;;  %2056 = vmatmul.mubr.f32.gmra.mxu0 %v6280_v34 }
 0x188   : > { %v1587_v22 = vpop.f32.mrf.mxu1  ;;  %v1384_v50 = vadd.f32 %v1237_v41, %v6275_v33  ;;  %2061 = vmatprep.mubr.f32.mxu0 %v8831_v2 }
 0x189   : > { %v6516_v53 = vpop.f32.mrf.mxu0 }
 0x18a   : > { %v6518_v26 = vadd.f32 %v1587_v22, %v1384_v50 }
 0x18b   : > { %v1243_v37 = vpop.f32.mrf.mxu0  ;;  %2062 = vmatmul.mubr.f32.gmra.mxu0 %v6293_v7 }
 0x18c   : > { %8892 = vst [vmem:[#allocation53_spill] sm:$0xff] %v6518_v26  ;;  %v6522_v58 = vadd.f32 %v1243_v37, %v6288_v36  ;;  %2067 = vmatprep.mubr.f32.mxu0 %v8831_v2  ;;  %v6543_v26 = vpop.f32.mrf.mxu1 }
 0x18d   : > { %v6526_v54 = vpop.f32.mrf.mxu0 }
 0x18e   : > { %8893 = vst [vmem:[#allocation54_spill] sm:$0xff] %v6522_v58 }
 0x18f   : > { %v1249_v34 = vpop.f32.mrf.mxu0  ;;  %2068 = vmatmul.mubr.f32.gmra.mxu0 %v1807_v46 }
 0x190   : > { %v6529_v33 = vadd.f32 %v1249_v34, %v6301_v38 }
 0x191   : > { %v6531_v41 = vpop.f32.mrf.mxu0 }
 0x192   : > { %8894 = vst [vmem:[#allocation55_spill] sm:$0xff] %v6529_v33  ;;  %v6550_v33 = vpop.f32.mrf.mxu1 }
 0x193   : > { %v1255_v22 = vpop.f32.mrf.mxu0 }
 0x194   : > { %v6534_v50 = vadd.f32 %v1255_v22, %v6309_v32 }
 0x195   : > { %v6536_v7 = vpop.f32.mrf.mxu0 }
 0x197   : > { %v1261_v36 = vpop.f32.mrf.mxu0 }
 0x198   : > { %v6539_v37 = vadd.f32 %v1261_v36, %v6317_v47  ;;  %v6557_v36 = vpop.f32.mrf.mxu1 }
 0x199   : > { %v6541_v2 = vpop.f32.mrf.mxu0 }
 0x19a   : > { %8895 = vst [vmem:[#allocation56_spill] sm:$0xff] %v6539_v37  ;;  %8896 = vst [vmem:[#allocation57_spill] sm:$0xff] %v6541_v2 }
 0x19b   : > { %v1267_v58 = vpop.f32.mrf.mxu0 }
 0x19c   : > { %v6546_v38 = vadd.f32 %v1267_v58, %v6325_v57  ;;  %v6564_v58 = vpop.f32.mrf.mxu1 }
 0x19d   : > { %v6548_v46 = vpop.f32.mrf.mxu0 }
 0x19e   : > { %8897 = vst [vmem:[#allocation58_spill] sm:$0xff] %v6546_v38  ;;  %8898 = vst [vmem:[#allocation59_spill] sm:$0xff] %v6548_v46 }
 0x19f   : > { %v1273_v34 = vpop.f32.mrf.mxu0 }
 0x1a0   : > { %v6553_v32 = vadd.f32 %v1273_v34, %v6333_v63  ;;  %v6571_v34 = vpop.f32.mrf.mxu1 }
 0x1a1   : > { %v6555_v22 = vpop.f32.mrf.mxu0 }
 0x1a2   : > { %8899 = vst [vmem:[#allocation60_spill] sm:$0xff] %v6553_v32  ;;  %8900 = vst [vmem:[#allocation61_spill] sm:$0xff] %v6555_v22 }
 0x1a3   : > { %v1279_v47 = vpop.f32.mrf.mxu0 }
 0x1a4   : > { %v6560_v37 = vadd.f32 %v1279_v47, %v6341_v18  ;;  %v6578_v47 = vpop.f32.mrf.mxu1 }
 0x1a5   : > { %v6562_v2 = vpop.f32.mrf.mxu0 }
 0x1a6   : > { %8901 = vst [vmem:[#allocation62_spill] sm:$0xff] %v6560_v37  ;;  %8902 = vst [vmem:[#allocation63_spill] sm:$0xff] %v6562_v2 }
 0x1a7   : > { %v1285_v57 = vpop.f32.mrf.mxu0 }
 0x1a8   : > { %v6567_v38 = vadd.f32 %v1285_v57, %v6349_v40  ;;  %v6585_v57 = vpop.f32.mrf.mxu1 }
 0x1a9   : > { %v6569_v46 = vpop.f32.mrf.mxu0 }
 0x1aa   : > { %8903 = vst [vmem:[#allocation64_spill] sm:$0xff] %v6567_v38  ;;  %8904 = vst [vmem:[#allocation65_spill] sm:$0xff] %v6569_v46 }
 0x1ab   : > { %v1291_v63 = vpop.f32.mrf.mxu0 }
 0x1ac   : > { %v6574_v32 = vadd.f32 %v1291_v63, %v6357_v48  ;;  %v6592_v63 = vpop.f32.mrf.mxu1 }
 0x1ad   : > { %v6576_v22 = vpop.f32.mrf.mxu0 }
 0x1ae   : > { %8905 = vst [vmem:[#allocation66_spill] sm:$0xff] %v6574_v32  ;;  %8906 = vst [vmem:[#allocation67_spill] sm:$0xff] %v6576_v22 }
 0x1af   : > { %v1297_v18 = vpop.f32.mrf.mxu0 }
 0x1b0   : > { %v6581_v37 = vadd.f32 %v1297_v18, %v6365_v56  ;;  %v6599_v18 = vpop.f32.mrf.mxu1 }
 0x1b1   : > { %v6583_v2 = vpop.f32.mrf.mxu0 }
 0x1b2   : > { %8907 = vst [vmem:[#allocation68_spill] sm:$0xff] %v6581_v37  ;;  %8908 = vst [vmem:[#allocation69_spill] sm:$0xff] %v6583_v2 }
 0x1b3   : > { %v1303_v40 = vpop.f32.mrf.mxu0 }
 0x1b4   : > { %v6588_v38 = vadd.f32 %v1303_v40, %v6373_v13  ;;  %v6606_v40 = vpop.f32.mrf.mxu1 }
 0x1b5   : > { %v6590_v46 = vpop.f32.mrf.mxu0 }
 0x1b6   : > { %8909 = vst [vmem:[#allocation70_spill] sm:$0xff] %v6588_v38  ;;  %8910 = vst [vmem:[#allocation71_spill] sm:$0xff] %v6590_v46 }
 0x1b7   : > { %v1309_v48 = vpop.f32.mrf.mxu0 }
 0x1b8   : > { %v6595_v32 = vadd.f32 %v1309_v48, %v6381_v27  ;;  %v6613_v48 = vpop.f32.mrf.mxu1 }
 0x1b9   : > { %v6597_v22 = vpop.f32.mrf.mxu0 }
 0x1ba   : > { %8911 = vst [vmem:[#allocation72_spill] sm:$0xff] %v6595_v32  ;;  %8912 = vst [vmem:[#allocation73_spill] sm:$0xff] %v6597_v22 }
 0x1bb   : > { %v1315_v56 = vpop.f32.mrf.mxu0 }
 0x1bc   : > { %v6602_v37 = vadd.f32 %v1315_v56, %v6389_v11  ;;  %v6620_v56 = vpop.f32.mrf.mxu1 }
 0x1bd   : > { %v6604_v2 = vpop.f32.mrf.mxu0 }
 0x1be   : > { %8913 = vst [vmem:[#allocation74_spill] sm:$0xff] %v6602_v37  ;;  %8914 = vst [vmem:[#allocation75_spill] sm:$0xff] %v6604_v2 }
 0x1bf   : > { %v1321_v13 = vpop.f32.mrf.mxu0 }
 0x1c0   : > { %v6609_v38 = vadd.f32 %v1321_v13, %v6397_v62  ;;  %v6627_v13 = vpop.f32.mrf.mxu1 }
 0x1c1   : > { %v6611_v46 = vpop.f32.mrf.mxu0 }
 0x1c2   : > { %8915 = vst [vmem:[#allocation76_spill] sm:$0xff] %v6609_v38  ;;  %8916 = vst [vmem:[#allocation77_spill] sm:$0xff] %v6611_v46 }
 0x1c3   : > { %v1327_v27 = vpop.f32.mrf.mxu0 }
 0x1c4   : > { %v6616_v32 = vadd.f32 %v1327_v27, %v6405_v61  ;;  %v6634_v27 = vpop.f32.mrf.mxu1 }
 0x1c5   : > { %v6618_v22 = vpop.f32.mrf.mxu0  ;;  %8923 = vst [vmem:[#allocation84_spill] sm:$0xff] %v6634_v27 }
 0x1c6   : > { %8917 = vst [vmem:[#allocation78_spill] sm:$0xff] %v6616_v32  ;;  %8918 = vst [vmem:[#allocation79_spill] sm:$0xff] %v6618_v22 }
 0x1c7   : > { %v1333_v11 = vpop.f32.mrf.mxu0 }
 0x1c8   : > { %v6623_v37 = vadd.f32 %v1333_v11, %v6413_v51  ;;  %v6641_v11 = vpop.f32.mrf.mxu1 }
 0x1c9   : > { %v6625_v2 = vpop.f32.mrf.mxu0 }
 0x1ca   : > { %8919 = vst [vmem:[#allocation80_spill] sm:$0xff] %v6623_v37  ;;  %8920 = vst [vmem:[#allocation81_spill] sm:$0xff] %v6625_v2 }
 0x1cb   : > { %v1339_v62 = vpop.f32.mrf.mxu0 }
 0x1cc   : > { %v6630_v38 = vadd.f32 %v1339_v62, %v6421_v42  ;;  %v6648_v62 = vpop.f32.mrf.mxu1 }
 0x1cd   : > { %v6632_v46 = vpop.f32.mrf.mxu0 }
 0x1ce   : > { %8921 = vst [vmem:[#allocation82_spill] sm:$0xff] %v6630_v38  ;;  %8922 = vst [vmem:[#allocation83_spill] sm:$0xff] %v6632_v46  ;;  %v2132_v46 = vlaneseq }
 0x1cf   : > { %v1345_v61 = vpop.f32.mrf.mxu0 }
 0x1d0   : > { %v6637_v32 = vadd.f32 %v1345_v61, %v6429_v17  ;;  %v6655_v61 = vpop.f32.mrf.mxu1 }
 0x1d1   : > { %v6639_v22 = vpop.f32.mrf.mxu0 }
 0x1d2   : > { %8924 = vst [vmem:[#allocation85_spill] sm:$0xff] %v6637_v32  ;;  %8925 = vst [vmem:[#allocation86_spill] sm:$0xff] %v6639_v22  ;;  %v6660_v22 = vshrl.u32 %v2132_v46, 7 }
 0x1d3   : > { %v1351_v51 = vpop.f32.mrf.mxu0 }
 0x1d4   : > { %v6644_v37 = vadd.f32 %v1351_v51, %v6437_v44  ;;  %8930 = vst [vmem:[#allocation91_spill] sm:$0xff] %v6660_v22  ;;  %v916_v51 = vadd.f32 %v6231_v4, %v6229_v3  ;;  %v922_v3 = vadd.f32 %v6241_v10, %v6239_v9 }
 0x1d5   : > { %v6646_v2 = vpop.f32.mrf.mxu0 }
 0x1d6   : > { %8926 = vst [vmem:[#allocation87_spill] sm:$0xff] %v6644_v37  ;;  %8927 = vst [vmem:[#allocation88_spill] sm:$0xff] %v6646_v2 }
 0x1d7   : > { %v1357_v42 = vpop.f32.mrf.mxu0 }
 0x1d8   : > { %v6651_v38 = vadd.f32 %v1357_v42, %v6445_v25  ;;  %v1375_v25 = vadd.f32 %v6472_v5, %v916_v51  ;;  %v6667_v42 = vpop.f32.mrf.mxu1 }
 0x1d9   : > { %v6653_v27 = vpop.f32.mrf.mxu0 }
 0x1da   : > { %8928 = vst [vmem:[#allocation89_spill] sm:$0xff] %v6651_v38  ;;  %8929 = vst [vmem:[#allocation90_spill] sm:$0xff] %v6653_v27  ;;  %v8833_v27 = vsub.s32 0, %v6660_v22  ;;  %v1725_v5 = vadd.f32 %v6474_v30, %v1375_v25 }
 0x1db   : > { %v1363_v17 = vpop.f32.mrf.mxu0 }
 0x1dc   : > { %v6658_v32 = vadd.f32 %v1363_v17, %v6453_v24  ;;  %v2130_v24 = vld [vmem:[%s8809_s2] sm:$0x3]  ;;  %v1377_v17 = vadd.f32 %v6481_v60, %v922_v3 }
 0x1dd   : > { %v6662_v44 = vpop.f32.mrf.mxu0  ;;  %v6688_v51 = vrot.slane %v2130_v24, %v8833_v27 }
 0x1de   : > { %v1727_v25 = vadd.f32 %v6483_v1, %v1377_v17 }
 0x1df   : > { %v1369_v37 = vpop.f32.mrf.mxu0 }
 0x1e0   : > { %v6670_v38 = vadd.f32 %v1369_v37, %v6461_v6  ;;  %v6683_v6 = vpop.f32.mrf.mxu1 }
 0x1e1   : > { %v6673_v2 = vpop.f32.mrf.mxu0 }
 0x1e2   : > { %8931 = vst [vmem:[#allocation92_spill] sm:$0xff] %v6670_v38  ;;  %8932 = vst [vmem:[#allocation93_spill] sm:$0xff] %v6673_v2  ;;  %v928_v38 = vadd.f32 %v6251_v16, %v6249_v15  ;;  %v8933_v2 = vsub.s32 1, %v6660_v22  ;;  %v6698_v3 = vpop.f32.mrf.mxu1  ;;  %v934_v15 = vadd.f32 %v6261_v23, %v6259_v21  ;;  %v940_v21 = vadd.f32 %v6271_v29, %v6269_v28 }
 0x1e3   : > { %v1907_v4 = vpop.f32.mrf.mxu0 }
 0x1e4   : > { %v2074_v37 = vadd.f32 %v1907_v4, %v6476_v31  ;;  %v6694_v9 = vrot.slane %v2130_v24, %v8933_v2  ;;  %v1379_v30 = vadd.f32 %v6490_v0, %v928_v38  ;;  %v1381_v38 = vadd.f32 %v6499_v55, %v934_v15 }
 0x1e5   : > { %v1909_v46 = vpop.f32.mrf.mxu0 }
 0x1e6   : > { %v2075_v10 = vadd.f32 %v1909_v46, %v1725_v5  ;;  %v2142_v31 = vadd.f32 %v6688_v51, %v2074_v37  ;;  %v1729_v0 = vadd.f32 %v6492_v8, %v1379_v30  ;;  %v6708_v46 = vpop.f32.mrf.mxu1  ;;  %v2309_v30 = vld [vmem:[%s8812_s5 + $0x8] sm:$0xff] }
 0x1e7   : > { %v1913_v60 = vpop.f32.mrf.mxu0  ;;  %4795 = vmatprep.mubr.msk.f32.mxu1 %vm2336_vm0, %v2309_v30 }
 0x1e8   : > { %v2076_v4 = vadd.f32 %v1913_v60, %v6485_v49  ;;  %v2143_v16 = vadd.f32 %v6694_v9, %v2075_v10  ;;  %v2198_v5 = vmax.f32 %v2142_v31, 0.0  ;;  %v1383_v31 = vadd.f32 %v6507_v19, %v940_v21 }
 0x1e9   : > { %v1915_v27 = vpop.f32.mrf.mxu0 }
 0x1ea   : > { %v2144_v2 = vadd.f32 %v6688_v51, %v2076_v4  ;;  %v2077_v24 = vadd.f32 %v1915_v27, %v1727_v25  ;;  %v2199_v23 = vmax.f32 %v2143_v16, 0.0  ;;  %v1731_v25 = vadd.f32 %v6501_v14, %v1381_v38  ;;  %v6722_v4 = vpop.f32.mrf.mxu1 }
 0x1eb   : > { %v1919_v1 = vpop.f32.mrf.mxu0 }
 0x1ec   : > { %v2200_v17 = vmax.f32 %v2144_v2, 0.0  ;;  %v2145_v49 = vadd.f32 %v6694_v9, %v2077_v24  ;;  %v2078_v37 = vadd.f32 %v1919_v1, %v6494_v45  ;;  %v946_v2 = vadd.f32 %v6284_v39, %v6282_v35 }
 0x1ed   : > { %v1921_v10 = vpop.f32.mrf.mxu0  ;;  %v1733_v1 = vadd.f32 %v6509_v20, %v1383_v31  ;;  %v952_v39 = vadd.f32 %v6297_v12, %v6295_v43  ;;  %v8939_v12 = vld [vmem:[#allocation11_spill] sm:$0xff] }
 0x1ee   : > { %v6714_v60 = vmax.f32 %v2198_v5, %v2200_v17  ;;  %v2201_v27 = vmax.f32 %v2145_v49, 0.0  ;;  %v2146_v8 = vadd.f32 %v6688_v51, %v2078_v37  ;;  %v2079_v55 = vadd.f32 %v1921_v10, %v1729_v0 }
 0x1ef   : > { %v1925_v45 = vpop.f32.mrf.mxu0  ;;  %v1385_v5 = vadd.f32 %v6516_v53, %v946_v2  ;;  %v1387_v30 = vadd.f32 %v6526_v54, %v952_v39  ;;  %v8941_v2 = vld [vmem:[#allocation54_spill] sm:$0xff] }
 0x1f0   : > { %8934 = vst [vmem:[#allocation94_spill] sm:$0xff] %v6714_v60  ;;  %v2202_v28 = vmax.f32 %v2146_v8, 0.0  ;;  %v2147_v29 = vadd.f32 %v6694_v9, %v2079_v55  ;;  %v2080_v15 = vadd.f32 %v1925_v45, %v6503_v59  ;;  %v6726_v16 = vmax.f32 %v2199_v23, %v2201_v27  ;;  %v6736_v59 = vpop.f32.mrf.mxu1  ;;  %v8938_v45 = vld [vmem:[#allocation53_spill] sm:$0xff] }
 0x1f1   : > { %v1927_v24 = vpop.f32.mrf.mxu0  ;;  %v1735_v55 = vadd.f32 %v6543_v26, %v1385_v5  ;;  %v1737_v5 = vadd.f32 %v6557_v36, %v1387_v30 }
 0x1f2   : > { %8935 = vst [vmem:[#allocation95_spill] sm:$0xff] %v6726_v16  ;;  %v6731_v14 = vmax.f32 %v2200_v17, %v2202_v28  ;;  %v2203_v19 = vmax.f32 %v2147_v29, 0.0  ;;  %v2148_v0 = vadd.f32 %v6688_v51, %v2080_v15  ;;  %v2081_v38 = vadd.f32 %v1927_v24, %v1731_v25  ;;  %v6749_v31 = vpop.f32.mrf.mxu1 }
 0x1f3   : > { %v1931_v49 = vpop.f32.mrf.mxu0  ;;  %v1736_v24 = vadd.f32 %v6550_v33, %v8941_v2  ;;  %v8942_v33 = vld [vmem:[#allocation13_spill] sm:$0xff] }
 0x1f4   : > { %8936 = vst [vmem:[#allocation96_spill] sm:$0xff] %v6731_v14  ;;  %v2204_v37 = vmax.f32 %v2148_v0, 0.0  ;;  %v2149_v21 = vadd.f32 %v6694_v9, %v2081_v38  ;;  %v2082_v23 = vadd.f32 %v1931_v49, %v6511_v52  ;;  %v6740_v35 = vmax.f32 %v2201_v27, %v2203_v19 }
 0x1f5   : > { %v1933_v17 = vpop.f32.mrf.mxu0 }
 0x1f6   : > { %8937 = vst [vmem:[#allocation97_spill] sm:$0xff] %v6740_v35  ;;  %v6744_v10 = vmax.f32 %v2202_v28, %v2204_v37  ;;  %v2205_v8 = vmax.f32 %v2149_v21, 0.0  ;;  %v2150_v20 = vadd.f32 %v6688_v51, %v2082_v23  ;;  %v2083_v53 = vadd.f32 %v1933_v17, %v1733_v1  ;;  %v8940_v28 = vld [vmem:[#allocation12_spill] sm:$0xff]  ;;  %v8989_v35 = vld [vmem:[#allocation77_spill] sm:$0xff] }
 0x1f7   : > { %v1937_v25 = vpop.f32.mrf.mxu0  ;;  %v958_v15 = vadd.f32 %v8940_v28, %v8939_v12 }
 0x1f8   : > { %v2206_v52 = vmax.f32 %v2150_v20, 0.0  ;;  %v2151_v27 = vadd.f32 %v6694_v9, %v2083_v53  ;;  %v2084_v29 = vadd.f32 %v1937_v25, %v8938_v45  ;;  %v6753_v43 = vmax.f32 %v2203_v19, %v2205_v8  ;;  %v6764_v19 = vpop.f32.mrf.mxu1  ;;  %v8944_v25 = vld [vmem:[#allocation55_spill] sm:$0xff] }
 0x1f9   : > { %v1939_v0 = vpop.f32.mrf.mxu0  ;;  %v1389_v49 = vadd.f32 %v6531_v41, %v958_v15 }
 0x1fa   : > { %v6759_v26 = vmax.f32 %v2204_v37, %v2206_v52  ;;  %v2207_v54 = vmax.f32 %v2151_v27, 0.0  ;;  %v2152_v38 = vadd.f32 %v6688_v51, %v2084_v29  ;;  %v2085_v1 = vadd.f32 %v1939_v0, %v1735_v55  ;;  %v8943_v37 = vld [vmem:[#allocation14_spill] sm:$0xff] }
 0x1fb   : > { %v1943_v21 = vpop.f32.mrf.mxu0  ;;  %v964_v53 = vadd.f32 %v8943_v37, %v8942_v33  ;;  %v1738_v27 = vadd.f32 %v6564_v58, %v8944_v25  ;;  %v1739_v29 = vadd.f32 %v6571_v34, %v1389_v49  ;;  %v8945_v58 = vld [vmem:[#allocation15_spill] sm:$0xff] }
 0x1fc   : > { %v2208_v23 = vmax.f32 %v2152_v38, 0.0  ;;  %v2153_v39 = vadd.f32 %v6694_v9, %v2085_v1  ;;  %v2086_v17 = vadd.f32 %v1943_v21, %v1736_v24  ;;  %v6767_v20 = vmax.f32 %v2205_v8, %v2207_v54  ;;  %v6778_v8 = vpop.f32.mrf.mxu1 }
 0x1fd   : > { %v1945_v55 = vpop.f32.mrf.mxu0  ;;  %v1391_v12 = vadd.f32 %v6536_v7, %v964_v53  ;;  %v1740_v1 = vadd.f32 %v6578_v47, %v6534_v50  ;;  %v8948_v50 = vld [vmem:[#allocation17_spill] sm:$0xff]  ;;  %v8949_v47 = vld [vmem:[#allocation18_spill] sm:$0xff] }
 0x1fe   : > { %v6773_v45 = vmax.f32 %v2206_v52, %v2208_v23  ;;  %v2209_v36 = vmax.f32 %v2153_v39, 0.0  ;;  %v2154_v41 = vadd.f32 %v6688_v51, %v2086_v17  ;;  %v2087_v30 = vadd.f32 %v1945_v55, %v1737_v5  ;;  %v8946_v52 = vld [vmem:[#allocation16_spill] sm:$0xff]  ;;  %v8947_v17 = vld [vmem:[#allocation57_spill] sm:$0xff] }
 0x1ff   : > { %v1949_v28 = vpop.f32.mrf.mxu0  ;;  %v970_v38 = vadd.f32 %v8946_v52, %v8945_v58  ;;  %v1741_v39 = vadd.f32 %v6585_v57, %v1391_v12  ;;  %v8951_v58 = vld [vmem:[#allocation59_spill] sm:$0xff] }
 0x200   : > { %v2210_v15 = vmax.f32 %v2154_v41, 0.0  ;;  %v2155_v2 = vadd.f32 %v6694_v9, %v2087_v30  ;;  %v2088_v24 = vadd.f32 %v1949_v28, %v1738_v27  ;;  %v6781_v0 = vmax.f32 %v2207_v54, %v2209_v36  ;;  %v6792_v54 = vpop.f32.mrf.mxu1  ;;  %v8950_v41 = vld [vmem:[#allocation56_spill] sm:$0xff] }
 0x201   : > { %v1951_v5 = vpop.f32.mrf.mxu0  ;;  %v1393_v33 = vadd.f32 %v8947_v17, %v970_v38  ;;  %v1742_v30 = vadd.f32 %v6592_v63, %v8950_v41  ;;  %v8952_v63 = vld [vmem:[#allocation19_spill] sm:$0xff] }
 0x202   : > { %v6787_v21 = vmax.f32 %v2208_v23, %v2210_v15  ;;  %v2211_v34 = vmax.f32 %v2155_v2, 0.0  ;;  %v2156_v7 = vadd.f32 %v6688_v51, %v2088_v24  ;;  %v2089_v49 = vadd.f32 %v1951_v5, %v1739_v29 }
 0x203   : > { %v1955_v37 = vpop.f32.mrf.mxu0  ;;  %v976_v23 = vadd.f32 %v8949_v47, %v8948_v50  ;;  %v1743_v24 = vadd.f32 %v6599_v18, %v1393_v33 }
 0x204   : > { %v2212_v53 = vmax.f32 %v2156_v7, 0.0  ;;  %v2157_v25 = vadd.f32 %v6694_v9, %v2089_v49  ;;  %v2090_v27 = vadd.f32 %v1955_v37, %v1740_v1  ;;  %v6795_v55 = vmax.f32 %v2209_v36, %v2211_v34  ;;  %v6806_v36 = vpop.f32.mrf.mxu1  ;;  %v8954_v37 = vld [vmem:[#allocation58_spill] sm:$0xff] }
 0x205   : > { %v1957_v29 = vpop.f32.mrf.mxu0  ;;  %v1395_v52 = vadd.f32 %v8951_v58, %v976_v23  ;;  %v8955_v23 = vld [vmem:[#allocation61_spill] sm:$0xff] }
 0x206   : > { %v6801_v28 = vmax.f32 %v2210_v15, %v2212_v53  ;;  %v2213_v57 = vmax.f32 %v2157_v25, 0.0  ;;  %v2158_v12 = vadd.f32 %v6688_v51, %v2090_v27  ;;  %v2091_v2 = vadd.f32 %v1957_v29, %v1741_v39  ;;  %v8953_v15 = vld [vmem:[#allocation20_spill] sm:$0xff] }
 0x207   : > { %v1961_v38 = vpop.f32.mrf.mxu0  ;;  %v982_v17 = vadd.f32 %v8953_v15, %v8952_v63  ;;  %v1744_v25 = vadd.f32 %v6606_v40, %v8954_v37  ;;  %v1745_v47 = vadd.f32 %v6613_v48, %v1395_v52  ;;  %v8956_v40 = vld [vmem:[#allocation21_spill] sm:$0xff]  ;;  %v8959_v37 = vld [vmem:[#allocation63_spill] sm:$0xff] }
 0x208   : > { %v2214_v1 = vmax.f32 %v2158_v12, 0.0  ;;  %v2159_v5 = vadd.f32 %v6694_v9, %v2091_v2  ;;  %v2092_v7 = vadd.f32 %v1961_v38, %v1742_v30  ;;  %v6809_v49 = vmax.f32 %v2211_v34, %v2213_v57  ;;  %v6820_v34 = vpop.f32.mrf.mxu1 }
 0x209   : > { %v1963_v39 = vpop.f32.mrf.mxu0  ;;  %v1397_v41 = vadd.f32 %v8955_v23, %v982_v17 }
 0x20a   : > { %v6815_v27 = vmax.f32 %v2212_v53, %v2214_v1  ;;  %v2215_v18 = vmax.f32 %v2159_v5, 0.0  ;;  %v2160_v33 = vadd.f32 %v6688_v51, %v2092_v7  ;;  %v2093_v50 = vadd.f32 %v1963_v39, %v1743_v24  ;;  %v8957_v53 = vld [vmem:[#allocation22_spill] sm:$0xff]  ;;  %v8958_v5 = vld [vmem:[#allocation60_spill] sm:$0xff] }
 0x20b   : > { %v1967_v30 = vpop.f32.mrf.mxu0  ;;  %v988_v38 = vadd.f32 %v8957_v53, %v8956_v40  ;;  %v1746_v7 = vadd.f32 %v6620_v56, %v8958_v5  ;;  %v1747_v17 = vadd.f32 %v6627_v13, %v1397_v41  ;;  %v8960_v56 = vld [vmem:[#allocation23_spill] sm:$0xff]  ;;  %v8963_v53 = vld [vmem:[#allocation84_spill] sm:$0xff] }
 0x20c   : > { %v2216_v29 = vmax.f32 %v2160_v33, 0.0  ;;  %v2161_v12 = vadd.f32 %v6694_v9, %v2093_v50  ;;  %v2094_v2 = vadd.f32 %v1967_v30, %v1744_v25  ;;  %v6823_v58 = vmax.f32 %v2213_v57, %v2215_v18  ;;  %v6834_v57 = vpop.f32.mrf.mxu1 }
 0x20d   : > { %v1969_v24 = vpop.f32.mrf.mxu0  ;;  %v1399_v39 = vadd.f32 %v8959_v37, %v988_v38 }
 0x20e   : > { %v6829_v63 = vmax.f32 %v2214_v1, %v2216_v29  ;;  %v2217_v48 = vmax.f32 %v2161_v12, 0.0  ;;  %v2162_v52 = vadd.f32 %v6688_v51, %v2094_v2  ;;  %v2095_v15 = vadd.f32 %v1969_v24, %v1745_v47  ;;  %v8961_v1 = vld [vmem:[#allocation24_spill] sm:$0xff]  ;;  %v8962_v12 = vld [vmem:[#allocation62_spill] sm:$0xff] }
 0x20f   : > { %v1973_v25 = vpop.f32.mrf.mxu0  ;;  %v994_v40 = vadd.f32 %v8961_v1, %v8960_v56  ;;  %v1748_v2 = vadd.f32 %v8963_v53, %v8962_v12  ;;  %v1749_v24 = vadd.f32 %v6641_v11, %v1399_v39  ;;  %v8965_v12 = vld [vmem:[#allocation25_spill] sm:$0xff] }
 0x210   : > { %v2218_v33 = vmax.f32 %v2162_v52, 0.0  ;;  %v2163_v50 = vadd.f32 %v6694_v9, %v2095_v15  ;;  %v2096_v23 = vadd.f32 %v1973_v25, %v1746_v7  ;;  %v6837_v30 = vmax.f32 %v2215_v18, %v2217_v48  ;;  %v8964_v52 = vld [vmem:[#allocation65_spill] sm:$0xff]  ;;  %v6848_v18 = vpop.f32.mrf.mxu1 }
 0x211   : > { %v1975_v47 = vpop.f32.mrf.mxu0  ;;  %v1401_v15 = vadd.f32 %v8964_v52, %v994_v40  ;;  %v8968_v52 = vld [vmem:[#allocation67_spill] sm:$0xff] }
 0x212   : > { %v6843_v5 = vmax.f32 %v2216_v29, %v2218_v33  ;;  %v2219_v13 = vmax.f32 %v2163_v50, 0.0  ;;  %v2164_v41 = vadd.f32 %v6688_v51, %v2096_v23  ;;  %v2097_v38 = vadd.f32 %v1975_v47, %v1747_v17  ;;  %v8966_v29 = vld [vmem:[#allocation26_spill] sm:$0xff]  ;;  %v8967_v50 = vld [vmem:[#allocation64_spill] sm:$0xff] }
 0x213   : > { %v1979_v7 = vpop.f32.mrf.mxu0  ;;  %v1000_v53 = vadd.f32 %v8966_v29, %v8965_v12  ;;  %v1750_v23 = vadd.f32 %v6648_v62, %v8967_v50  ;;  %v8969_v62 = vld [vmem:[#allocation27_spill] sm:$0xff] }
 0x214   : > { %v2220_v37 = vmax.f32 %v2164_v41, 0.0  ;;  %v2165_v25 = vadd.f32 %v6694_v9, %v2097_v38  ;;  %v2098_v56 = vadd.f32 %v1979_v7, %v1748_v2  ;;  %v6851_v1 = vmax.f32 %v2217_v48, %v2219_v13  ;;  %v6862_v48 = vpop.f32.mrf.mxu1 }
 0x215   : > { %v1981_v17 = vpop.f32.mrf.mxu0  ;;  %v1751_v41 = vadd.f32 %v6655_v61, %v1401_v15  ;;  %v1403_v38 = vadd.f32 %v8968_v52, %v1000_v53  ;;  %v8972_v52 = vld [vmem:[#allocation69_spill] sm:$0xff] }
 0x216   : > { %v6857_v47 = vmax.f32 %v2218_v33, %v2220_v37  ;;  %v2221_v11 = vmax.f32 %v2165_v25, 0.0  ;;  %v2166_v39 = vadd.f32 %v6688_v51, %v2098_v56  ;;  %v2099_v40 = vadd.f32 %v1981_v17, %v1749_v24  ;;  %v8970_v33 = vld [vmem:[#allocation28_spill] sm:$0xff]  ;;  %v8971_v25 = vld [vmem:[#allocation66_spill] sm:$0xff] }
 0x217   : > { %v1985_v2 = vpop.f32.mrf.mxu0  ;;  %v1006_v50 = vadd.f32 %v8970_v33, %v8969_v62  ;;  %v1752_v56 = vadd.f32 %v6667_v42, %v8971_v25  ;;  %v8973_v42 = vld [vmem:[#allocation29_spill] sm:$0xff] }
 0x218   : > { %v2222_v7 = vmax.f32 %v2166_v39, 0.0  ;;  %v2167_v12 = vadd.f32 %v6694_v9, %v2099_v40  ;;  %v2100_v29 = vadd.f32 %v1985_v2, %v1750_v23  ;;  %v6865_v22 = vmax.f32 %v2219_v13, %v2221_v11  ;;  %v6876_v13 = vpop.f32.mrf.mxu1 }
 0x219   : > { %v1987_v24 = vpop.f32.mrf.mxu0  ;;  %v1753_v39 = vadd.f32 %v6683_v6, %v1403_v38  ;;  %v1405_v40 = vadd.f32 %v8972_v52, %v1006_v50  ;;  %v8976_v52 = vld [vmem:[#allocation71_spill] sm:$0xff] }
 0x21a   : > { %v6871_v17 = vmax.f32 %v2220_v37, %v2222_v7  ;;  %v2223_v61 = vmax.f32 %v2167_v12, 0.0  ;;  %v2168_v15 = vadd.f32 %v6688_v51, %v2100_v29  ;;  %v2101_v53 = vadd.f32 %v1987_v24, %v1751_v41  ;;  %v8974_v37 = vld [vmem:[#allocation30_spill] sm:$0xff]  ;;  %v8975_v12 = vld [vmem:[#allocation68_spill] sm:$0xff] }
 0x21b   : > { %v1991_v23 = vpop.f32.mrf.mxu0  ;;  %v1012_v25 = vadd.f32 %v8974_v37, %v8973_v42  ;;  %v1754_v29 = vadd.f32 %v6698_v3, %v8975_v12  ;;  %v8977_v3 = vld [vmem:[#allocation31_spill] sm:$0xff] }
 0x21c   : > { %v2224_v2 = vmax.f32 %v2168_v15, 0.0  ;;  %v2169_v62 = vadd.f32 %v6694_v9, %v2101_v53  ;;  %v2102_v33 = vadd.f32 %v1991_v23, %v1752_v56  ;;  %v6879_v60 = vmax.f32 %v2221_v11, %v2223_v61  ;;  %v6890_v11 = vpop.f32.mrf.mxu1 }
 0x21d   : > { %v1993_v41 = vpop.f32.mrf.mxu0  ;;  %v1755_v15 = vadd.f32 %v6708_v46, %v1405_v40  ;;  %v1407_v53 = vadd.f32 %v8976_v52, %v1012_v25  ;;  %v8980_v52 = vld [vmem:[#allocation73_spill] sm:$0xff] }
 0x21e   : > { %v6885_v24 = vmax.f32 %v2222_v7, %v2224_v2  ;;  %v2225_v6 = vmax.f32 %v2169_v62, 0.0  ;;  %v2170_v38 = vadd.f32 %v6688_v51, %v2102_v33  ;;  %v2103_v50 = vadd.f32 %v1993_v41, %v1753_v39  ;;  %v8978_v7 = vld [vmem:[#allocation32_spill] sm:$0xff]  ;;  %v8979_v62 = vld [vmem:[#allocation70_spill] sm:$0xff] }
 0x21f   : > { %v1997_v56 = vpop.f32.mrf.mxu0  ;;  %v1018_v12 = vadd.f32 %v8978_v7, %v8977_v3  ;;  %v1756_v33 = vadd.f32 %v6722_v4, %v8979_v62  ;;  %v2742_v4 = vld [vmem:[%s8811_s4 + $0x78] sm:$0xff] }
 0x220   : > { %v2226_v23 = vmax.f32 %v2170_v38, 0.0  ;;  %v2171_v42 = vadd.f32 %v6694_v9, %v2103_v50  ;;  %v2104_v37 = vadd.f32 %v1997_v56, %v1754_v29  ;;  %v6893_v16 = vmax.f32 %v2223_v61, %v2225_v6  ;;  %v6904_v61 = vpop.f32.mrf.mxu1  ;;  %2749 = vmatpush1.msra.mxu0 %v2742_v4 }
 0x221   : > { %v1999_v39 = vpop.f32.mrf.mxu0  ;;  %v1757_v38 = vadd.f32 %v6736_v59, %v1407_v53  ;;  %v1409_v50 = vadd.f32 %v8980_v52, %v1018_v12  ;;  %v8981_v59 = vld [vmem:[#allocation33_spill] sm:$0xff] }
 0x222   : > { %v6899_v41 = vmax.f32 %v2224_v2, %v2226_v23  ;;  %v2227_v46 = vmax.f32 %v2171_v42, 0.0  ;;  %v2172_v40 = vadd.f32 %v6688_v51, %v2104_v37  ;;  %v2105_v25 = vadd.f32 %v1999_v39, %v1755_v15  ;;  %v2741_v2 = vld [vmem:[%s8811_s4 + $0x70] sm:$0xff]  ;;  %v8982_v15 = vld [vmem:[#allocation34_spill] sm:$0xff]  ;;  %v8983_v42 = vld [vmem:[#allocation72_spill] sm:$0xff] }
 0x223   : > { %v2003_v29 = vpop.f32.mrf.mxu0  ;;  %v1024_v53 = vadd.f32 %v8982_v15, %v8981_v59  ;;  %v1758_v37 = vadd.f32 %v6749_v31, %v8983_v42  ;;  %v1759_v52 = vadd.f32 %v6764_v19, %v1409_v50  ;;  %v6928_v31 = vpop.f32.mrf.mxu1  ;;  %v8986_v42 = vld [vmem:[#allocation35_spill] sm:$0xff]  ;;  %v8988_v50 = vld [vmem:[#allocation74_spill] sm:$0xff] }
 0x224   : > { %v2228_v56 = vmax.f32 %v2172_v40, 0.0  ;;  %v2173_v3 = vadd.f32 %v6694_v9, %v2105_v25  ;;  %v2106_v7 = vadd.f32 %v2003_v29, %v1756_v33  ;;  %v6907_v14 = vmax.f32 %v2225_v6, %v2227_v46  ;;  %v2740_v25 = vld [vmem:[%s8811_s4 + $0x68] sm:$0xff]  ;;  %v8985_v29 = vld [vmem:[#allocation75_spill] sm:$0xff] }
 0x225   : > { %v2005_v12 = vpop.f32.mrf.mxu0  ;;  %v8984_v40 = vmov 0.0   ;;  %v1411_v59 = vadd.f32 %v8985_v29, %v1024_v53  ;;  %v1760_v53 = vadd.f32 %v6778_v8, %v8988_v50  ;;  %v6946_v8 = vpop.f32.mrf.mxu1  ;;  %v8990_v50 = vld [vmem:[#allocation37_spill] sm:$0xff] }
 0x226   : > { %v6919_v62 = vmax.f32 %v2226_v23, %v2228_v56  ;;  %v2229_v6 = vmax.f32 %v2173_v3, 0.0  ;;  %v2174_v33 = vadd.f32 %v6688_v51, %v2106_v7  ;;  %v2107_v39 = vadd.f32 %v2005_v12, %v1757_v38  ;;  %2750 = vmatprep.subr.mxu0 %v8984_v40  ;;  %v2739_v38 = vld [vmem:[%s8811_s4 + $0x60] sm:$0xff]  ;;  %v8987_v12 = vld [vmem:[#allocation36_spill] sm:$0xff] }
 0x227   : > { %v2009_v15 = vpop.f32.mrf.mxu0  ;;  %2751 = vmatpush1.msra.mxu0 %v2741_v2  ;;  %v1030_v19 = vadd.f32 %v8987_v12, %v8986_v42 }
 0x228   : > { %v2230_v23 = vmax.f32 %v2174_v33, 0.0  ;;  %v2175_v3 = vadd.f32 %v6694_v9, %v2107_v39  ;;  %v2108_v4 = vadd.f32 %v2009_v15, %v1758_v37  ;;  %v2283_v7 = vmax.f32 %v2227_v46, %v2229_v6  ;;  %2752 = vmatprep.subr.mxu0 %v8984_v40  ;;  %v2738_v46 = vld [vmem:[%s8811_s4 + $0x58] sm:$0xff] }
 0x229   : > { %v2011_v2 = vpop.f32.mrf.mxu0  ;;  %2753 = vmatpush1.msra.mxu0 %v2740_v25  ;;  %v1761_v15 = vadd.f32 %v6792_v54, %v1411_v59  ;;  %v1413_v42 = vadd.f32 %v8989_v35, %v1030_v19  ;;  %v8992_v59 = vld [vmem:[#allocation76_spill] sm:$0xff] }
 0x22a   : > { %v2284_v29 = vmax.f32 %v2228_v56, %v2230_v23  ;;  %v2231_v33 = vmax.f32 %v2175_v3, 0.0  ;;  %v2176_v39 = vadd.f32 %v6688_v51, %v2108_v4  ;;  %v2109_v37 = vadd.f32 %v2011_v2, %v1759_v52  ;;  %2754 = vmatprep.subr.mxu0 %v8984_v40  ;;  %v2737_v52 = vld [vmem:[%s8811_s4 + $0x50] sm:$0xff]  ;;  %v8991_v2 = vld [vmem:[#allocation38_spill] sm:$0xff] }
 0x22b   : > { %v2015_v12 = vpop.f32.mrf.mxu0  ;;  %2755 = vmatpush1.msra.mxu0 %v2739_v38  ;;  %v1036_v54 = vadd.f32 %v8991_v2, %v8990_v50  ;;  %v1762_v35 = vadd.f32 %v6806_v36, %v8992_v59  ;;  %v8993_v50 = vld [vmem:[#allocation79_spill] sm:$0xff] }
 0x22c   : > { %v2232_v25 = vmax.f32 %v2176_v39, 0.0  ;;  %v2177_v56 = vadd.f32 %v6694_v9, %v2109_v37  ;;  %v2110_v3 = vadd.f32 %v2015_v12, %v1760_v53  ;;  %v2285_v4 = vmax.f32 %v2229_v6, %v2231_v33  ;;  %2756 = vmatprep.subr.mxu0 %v8984_v40  ;;  %v2736_v37 = vld [vmem:[%s8811_s4 + $0x48] sm:$0xff] }
 0x22d   : > { %v2017_v38 = vpop.f32.mrf.mxu0  ;;  %2757 = vmatpush1.msra.mxu0 %v2738_v46  ;;  %v1763_v12 = vadd.f32 %v6820_v34, %v1413_v42  ;;  %v1415_v2 = vadd.f32 %v8993_v50, %v1036_v54  ;;  %v2735_v34 = vld [vmem:[%s8811_s4 + $0x40] sm:$0xff]  ;;  %v8994_v42 = vld [vmem:[#allocation39_spill] sm:$0xff] }
 0x22e   : > { %v6957_v19 = vmax.f32 %v2230_v23, %v2232_v25  ;;  %v2233_v39 = vmax.f32 %v2177_v56, 0.0  ;;  %v2178_v53 = vadd.f32 %v6688_v51, %v2110_v3  ;;  %v2111_v6 = vadd.f32 %v2017_v38, %v1761_v15  ;;  %2379 = vmatprep.subr.mxu1 %v2285_v4  ;;  %2758 = vmatprep.subr.mxu0 %v8984_v40  ;;  %v6966_v23 = vpop.f32.mrf.mxu1  ;;  %v8995_v4 = vld [vmem:[#allocation40_spill] sm:$0xff] }
 0x22f   : > { %v2021_v36 = vpop.f32.mrf.mxu0  ;;  %2380 = vmatpush1.msra.mxu1 %v2284_v29  ;;  %2759 = vmatpush1.msra.mxu0 %v2737_v52  ;;  %v1042_v54 = vadd.f32 %v8995_v4, %v8994_v42  ;;  %v8996_v29 = vld [vmem:[#allocation78_spill] sm:$0xff] }
 0x230   : > { %v2234_v46 = vmax.f32 %v2178_v53, 0.0  ;;  %v2179_v56 = vadd.f32 %v6694_v9, %v2111_v6  ;;  %v2112_v15 = vadd.f32 %v2021_v36, %v1762_v35  ;;  %2381 = vmatprep.subr.mxu1 %v2283_v7  ;;  %v6969_v3 = vmax.f32 %v2231_v33, %v2233_v39  ;;  %2760 = vmatprep.subr.mxu0 %v8984_v40  ;;  %v2734_v53 = vld [vmem:[%s8811_s4 + $0x38] sm:$0xff]  ;;  %v8997_v6 = vld [vmem:[#allocation81_spill] sm:$0xff] }
 0x231   : > { %v1764_v52 = vadd.f32 %v6834_v57, %v8996_v29  ;;  %v2023_v59 = vpop.f32.mrf.mxu0  ;;  %2382 = vmatpush1.msra.mxu1 %v6919_v62  ;;  %2761 = vmatpush1.msra.mxu0 %v2736_v37  ;;  %v1765_v57 = vadd.f32 %v6848_v18, %v1415_v2  ;;  %v1417_v50 = vadd.f32 %v8997_v6, %v1042_v54  ;;  %v2733_v18 = vld [vmem:[%s8811_s4 + $0x30] sm:$0xff]  ;;  %v8998_v2 = vld [vmem:[#allocation41_spill] sm:$0xff]  ;;  %v2732_v29 = vld [vmem:[%s8811_s4 + $0x28] sm:$0xff] }
 0x232   : > { %v6980_v35 = vmax.f32 %v2232_v25, %v2234_v46  ;;  %v2235_v7 = vmax.f32 %v2179_v56, 0.0  ;;  %v2180_v33 = vadd.f32 %v6688_v51, %v2112_v15  ;;  %v2113_v38 = vadd.f32 %v2023_v59, %v1763_v12  ;;  %2383 = vmatprep.subr.mxu1 %v6907_v14  ;;  %2762 = vmatprep.subr.mxu0 %v8984_v40  ;;  %v6991_v25 = vpop.f32.mrf.mxu1  ;;  %v8999_v56 = vld [vmem:[#allocation42_spill] sm:$0xff]  ;;  %v9000_v15 = vld [vmem:[#allocation80_spill] sm:$0xff] }
 0x233   : > { %v2027_v62 = vpop.f32.mrf.mxu0  ;;  %2384 = vmatpush1.msra.mxu1 %v6899_v41  ;;  %2763 = vmatpush1.msra.mxu0 %v2735_v34  ;;  %v1048_v41 = vadd.f32 %v8999_v56, %v8998_v2  ;;  %v1766_v34 = vadd.f32 %v6862_v48, %v9000_v15  ;;  %v1767_v48 = vadd.f32 %v6876_v13, %v1417_v50  ;;  %v2731_v13 = vld [vmem:[%s8811_s4 + $0x20] sm:$0xff]  ;;  %v9003_v6 = vld [vmem:[#allocation44_spill] sm:$0xff]  ;;  %v9004_v50 = vld [vmem:[#allocation82_spill] sm:$0xff] }
 0x234   : > { %v2236_v37 = vmax.f32 %v2180_v33, 0.0  ;;  %v2181_v12 = vadd.f32 %v6694_v9, %v2113_v38  ;;  %v2114_v14 = vadd.f32 %v2027_v62, %v1764_v52  ;;  %2385 = vmatprep.subr.mxu1 %v6893_v16  ;;  %v6995_v36 = vmax.f32 %v2233_v39, %v2235_v7  ;;  %2764 = vmatprep.subr.mxu0 %v8984_v40  ;;  %v9001_v52 = vld [vmem:[#allocation83_spill] sm:$0xff]  ;;  %v2730_v2 = vld [vmem:[%s8811_s4 + $0x18] sm:$0xff]  ;;  %v9005_v56 = vld [vmem:[#allocation86_spill] sm:$0xff] }
 0x235   : > { %v2029_v42 = vpop.f32.mrf.mxu0  ;;  %2386 = vmatpush1.msra.mxu1 %v6885_v24  ;;  %2765 = vmatpush1.msra.mxu0 %v2734_v53  ;;  %v1419_v59 = vadd.f32 %v9001_v52, %v1048_v41  ;;  %v1768_v62 = vadd.f32 %v6890_v11, %v9004_v50  ;;  %v9010_v50 = vld [vmem:[#allocation47_spill] sm:$0xff] }
 0x236   : > { %v7006_v4 = vmax.f32 %v2234_v46, %v2236_v37  ;;  %v2237_v16 = vmax.f32 %v2181_v12, 0.0  ;;  %v2182_v39 = vadd.f32 %v6688_v51, %v2114_v14  ;;  %v2115_v54 = vadd.f32 %v2029_v42, %v1765_v57  ;;  %2387 = vmatprep.subr.mxu1 %v6879_v60  ;;  %2766 = vmatprep.subr.mxu0 %v8984_v40  ;;  %v7017_v46 = vpop.f32.mrf.mxu1  ;;  %v9002_v57 = vld [vmem:[#allocation43_spill] sm:$0xff] }
 0x237   : > { %v2033_v24 = vpop.f32.mrf.mxu0  ;;  %2388 = vmatpush1.msra.mxu1 %v6871_v17  ;;  %2767 = vmatpush1.msra.mxu0 %v2733_v18  ;;  %v1054_v17 = vadd.f32 %v9003_v6, %v9002_v57  ;;  %v1769_v11 = vadd.f32 %v6904_v61, %v1419_v59  ;;  %v2729_v61 = vld [vmem:[%s8811_s4 + $0x10] sm:$0xff] }
 0x238   : > { %v2238_v33 = vmax.f32 %v2182_v39, 0.0  ;;  %v2183_v38 = vadd.f32 %v6694_v9, %v2115_v54  ;;  %v2116_v60 = vadd.f32 %v2033_v24, %v1766_v34  ;;  %2389 = vmatprep.subr.mxu1 %v6865_v22  ;;  %v7021_v53 = vmax.f32 %v2235_v7, %v2237_v16  ;;  %2768 = vmatprep.subr.mxu0 %v8984_v40  ;;  %v9006_v39 = vld [vmem:[#allocation45_spill] sm:$0xff]  ;;  %v9007_v54 = vld [vmem:[#allocation46_spill] sm:$0xff] }
 0x239   : > { %v2035_v12 = vpop.f32.mrf.mxu0  ;;  %2390 = vmatpush1.msra.mxu1 %v6857_v47  ;;  %2769 = vmatpush1.msra.mxu0 %v2732_v29  ;;  %v1421_v41 = vadd.f32 %v9005_v56, %v1054_v17  ;;  %v9008_v29 = vld [vmem:[#allocation85_spill] sm:$0xff] }
 0x23a   : > { %v7032_v14 = vmax.f32 %v2236_v37, %v2238_v33  ;;  %v2239_v22 = vmax.f32 %v2183_v38, 0.0  ;;  %v2184_v7 = vadd.f32 %v6688_v51, %v2116_v60  ;;  %v2117_v18 = vadd.f32 %v2035_v12, %v1767_v48  ;;  %2391 = vmatprep.subr.mxu1 %v6851_v1  ;;  %2770 = vmatprep.subr.mxu0 %v8984_v40  ;;  %v7043_v37 = vpop.f32.mrf.mxu1  ;;  %v2728_v38 = vld [vmem:[%s8811_s4 + $0x8] sm:$0xff]  ;;  %v9009_v60 = vld [vmem:[#allocation88_spill] sm:$0xff]  ;;  %v2747_v56 = vld [vmem:[%s8811_s4 + $0xa0] sm:$0xff] }
 0x23b   : > { %v2039_v47 = vpop.f32.mrf.mxu0  ;;  %2392 = vmatpush1.msra.mxu1 %v6843_v5  ;;  %2771 = vmatpush1.msra.mxu0 %v2731_v13  ;;  %v1060_v5 = vadd.f32 %v9007_v54, %v9006_v39  ;;  %v1770_v48 = vadd.f32 %v6928_v31, %v9008_v29  ;;  %v1771_v31 = vadd.f32 %v6946_v8, %v1421_v41  ;;  %v2727_v8 = vld [vmem:[%s8811_s4] sm:$0xff]  ;;  %v9013_v41 = vld [vmem:[#allocation90_spill] sm:$0xff] }
 0x23c   : > { %v2240_v15 = vmax.f32 %v2184_v7, 0.0  ;;  %v2185_v34 = vadd.f32 %v6694_v9, %v2117_v18  ;;  %v2118_v1 = vadd.f32 %v2039_v47, %v1768_v62  ;;  %2393 = vmatprep.subr.mxu1 %v6837_v30  ;;  %v7047_v42 = vmax.f32 %v2237_v16, %v2239_v22  ;;  %2772 = vmatprep.subr.mxu0 %v8984_v40  ;;  %v9011_v62 = vld [vmem:[#allocation48_spill] sm:$0xff]  ;;  %v9014_v39 = vld [vmem:[#allocation49_spill] sm:$0xff]  ;;  %v9015_v54 = vld [vmem:[#allocation50_spill] sm:$0xff] }
 0x23d   : > { %v2041_v52 = vpop.f32.mrf.mxu0  ;;  %2394 = vmatpush1.msra.mxu1 %v6829_v63  ;;  %2773 = vmatpush1.msra.mxu0 %v2730_v2  ;;  %v1423_v13 = vadd.f32 %v9009_v60, %v1060_v5  ;;  %v1066_v12 = vadd.f32 %v9011_v62, %v9010_v50  ;;  %v1072_v5 = vadd.f32 %v9015_v54, %v9014_v39 }
 0x23e   : > { %v7058_v59 = vmax.f32 %v2238_v33, %v2240_v15  ;;  %v2241_v30 = vmax.f32 %v2185_v34, 0.0  ;;  %v2186_v16 = vadd.f32 %v6688_v51, %v2118_v1  ;;  %v2119_v24 = vadd.f32 %v2041_v52, %v1769_v11  ;;  %2395 = vmatprep.subr.mxu1 %v6823_v58  ;;  %2774 = vmatprep.subr.mxu0 %v8984_v40  ;;  %v1713_v33 = vpop.f32.mrf.mxu1 }
 0x23f   : > { %v2045_v63 = vpop.f32.mrf.mxu0  ;;  %2396 = vmatpush1.msra.mxu1 %v6815_v27  ;;  %2775 = vmatpush1.msra.mxu0 %v2729_v61  ;;  %v9012_v27 = vld [vmem:[#allocation87_spill] sm:$0xff]  ;;  %v1425_v47 = vadd.f32 %v9013_v41, %v1066_v12  ;;  %v9019_v12 = vld [vmem:[#allocation97_spill] sm:$0xff] }
 0x240   : > { %v2242_v57 = vmax.f32 %v2186_v16, 0.0  ;;  %v2187_v6 = vadd.f32 %v6694_v9, %v2119_v24  ;;  %v2120_v17 = vadd.f32 %v2045_v63, %v1770_v48  ;;  %2397 = vmatprep.subr.mxu1 %v6809_v49  ;;  %v7071_v58 = vmax.f32 %v2239_v22, %v2241_v30  ;;  %2776 = vmatprep.subr.mxu0 %v8984_v40  ;;  %v2745_v24 = vld [vmem:[%s8811_s4 + $0x90] sm:$0xff] }
 0x241   : > { %v1772_v7 = vadd.f32 %v6966_v23, %v9012_v27  ;;  %v2047_v18 = vpop.f32.mrf.mxu0  ;;  %2398 = vmatpush1.msra.mxu1 %v6801_v28  ;;  %2777 = vmatpush1.msra.mxu0 %v2728_v38  ;;  %v1773_v23 = vadd.f32 %v6991_v25, %v1423_v13  ;;  %v2746_v25 = vld [vmem:[%s8811_s4 + $0x98] sm:$0xff]  ;;  %v1427_v38 = vadd.f32 %v6662_v44, %v1072_v5  ;;  %v9020_v27 = vld [vmem:[#allocation93_spill] sm:$0xff] }
 0x242   : > { %v7082_v2 = vmax.f32 %v2240_v15, %v2242_v57  ;;  %v2243_v49 = vmax.f32 %v2187_v6, 0.0  ;;  %v2188_v22 = vadd.f32 %v6688_v51, %v2120_v17  ;;  %v2121_v11 = vadd.f32 %v2047_v18, %v1771_v31  ;;  %2399 = vmatprep.subr.mxu1 %v6795_v55  ;;  %2778 = vmatprep.subr.mxu0 %v8984_v40  ;;  %v1715_v15 = vpop.f32.mrf.mxu1  ;;  %v9018_v6 = vld [vmem:[#allocation52_spill] sm:$0xff] }
 0x243   : > { %v2051_v28 = vpop.f32.mrf.mxu0  ;;  %2400 = vmatpush1.msra.mxu1 %v6787_v21  ;;  %2779 = vmatpush1.msra.mxu0 %v2727_v8  ;;  %v9016_v21 = vld [vmem:[#allocation89_spill] sm:$0xff] }
 0x244   : > { %v2244_v34 = vmax.f32 %v2188_v22, 0.0  ;;  %v2189_v1 = vadd.f32 %v6694_v9, %v2121_v11  ;;  %v2122_v61 = vadd.f32 %v2051_v28, %v1772_v7  ;;  %2401 = vmatprep.subr.mxu1 %v6781_v0  ;;  %v7095_v55 = vmax.f32 %v2241_v30, %v2243_v49  ;;  %2802 = vmatprep.subr.mxu0 %v8984_v40  ;;  %v1719_v31 = vpop.f32.mrf.mxu1  ;;  %v9022_v11 = vld [vmem:[#allocation95_spill] sm:$0xff]  ;;  %v9024_v28 = vld [vmem:[#allocation94_spill] sm:$0xff] }
 0x245   : > { %v1774_v29 = vadd.f32 %v7017_v46, %v9016_v21  ;;  %v2053_v48 = vpop.f32.mrf.mxu0  ;;  %2402 = vmatpush1.msra.mxu1 %v6773_v45  ;;  %2803 = vmatpush2.msra.mxu0 %v2747_v56  ;;  %v1775_v46 = vadd.f32 %v7043_v37, %v1425_v47  ;;  %v1776_v37 = vadd.f32 %v1713_v33, %v6658_v32 }
 0x246   : > { %v7106_v52 = vmax.f32 %v2242_v57, %v2244_v34  ;;  %v2245_v0 = vmax.f32 %v2189_v1, 0.0  ;;  %v2190_v30 = vadd.f32 %v6688_v51, %v2122_v61  ;;  %v2123_v16 = vadd.f32 %v2053_v48, %v1773_v23  ;;  %2403 = vmatprep.subr.mxu1 %v6767_v20  ;;  %2804 = vmatprep.subr.mxu0 %v8984_v40  ;;  %v9017_v57 = vld [vmem:[#allocation51_spill] sm:$0xff]  ;;  %v1721_v32 = vpop.f32.mrf.mxu1  ;;  %v9023_v23 = vld [vmem:[#allocation92_spill] sm:$0xff] }
 0x247   : > { %v2057_v45 = vpop.f32.mrf.mxu0  ;;  %2404 = vmatpush1.msra.mxu1 %v6759_v26  ;;  %2805 = vmatpush2.msra.mxu0 %v2746_v25  ;;  %v1078_v17 = vadd.f32 %v9018_v6, %v9017_v57  ;;  %v1778_v41 = vadd.f32 %v1719_v31, %v9023_v23  ;;  %v2319_v57 = vld [vmem:[%s8812_s5 + $0x58] sm:$0xff]  ;;  %v2546_v23 = vld [vmem:[%s8810_s3 + $0x90] sm:$0xff] }
 0x248   : > { %v2246_v60 = vmax.f32 %v2190_v30, 0.0  ;;  %v2191_v13 = vadd.f32 %v6694_v9, %v2123_v16  ;;  %v2124_v63 = vadd.f32 %v2057_v45, %v1774_v29  ;;  %2405 = vmatprep.subr.mxu1 %v6753_v43  ;;  %v2299_v20 = vmax.f32 %v2243_v49, %v2245_v0  ;;  %2806 = vmatprep.subr.mxu0 %v8984_v40  ;;  %v9021_v49 = vld [vmem:[#allocation96_spill] sm:$0xff] }
 0x249   : > { %v2059_v44 = vpop.f32.mrf.mxu0  ;;  %2406 = vmatpush1.msra.mxu1 %v6744_v10  ;;  %2807 = vmatpush2.msra.mxu0 %v2745_v24  ;;  %v1777_v43 = vadd.f32 %v1715_v15, %v1427_v38  ;;  %v1429_v7 = vadd.f32 %v9020_v27, %v1078_v17  ;;  %v2535_v6 = vld [vmem:[%s8810_s3 + $0x38] sm:$0xff]  ;;  %v2534_v17 = vld [vmem:[%s8810_s3 + $0x30] sm:$0xff] }
 0x24a   : > { %v2300_v26 = vmax.f32 %v2244_v34, %v2246_v60  ;;  %v2247_v8 = vmax.f32 %v2191_v13, 0.0  ;;  %v2192_v50 = vadd.f32 %v6688_v51, %v2124_v63  ;;  %v2125_v62 = vadd.f32 %v2059_v44, %v1775_v46  ;;  %2407 = vmatprep.subr.mxu1 %v9019_v12  ;;  %2808 = vmatprep.subr.mxu0 %v8984_v40  ;;  %v2536_v63 = vld [vmem:[%s8810_s3 + $0x40] sm:$0xff]  ;;  %v2321_v44 = vld [vmem:[%s8812_s5 + $0x68] sm:$0xff]  ;;  %v2531_v12 = vld [vmem:[%s8810_s3 + $0x18] sm:$0xff] }
 0x24b   : > { %v2063_v18 = vpop.f32.mrf.mxu0  ;;  %2408 = vmatpush1.msra.mxu1 %v9021_v49  ;;  %v1779_v25 = vadd.f32 %v1721_v32, %v1429_v7  ;;  %v2322_v27 = vld [vmem:[%s8812_s5 + $0x70] sm:$0xff]  ;;  %v2325_v7 = vld [vmem:[%s8812_s5 + $0x88] sm:$0xff]  ;;  %v2528_v49 = vld [vmem:[%s8810_s3] sm:$0xff] }
 0x24c   : > { %v2248_v33 = vmax.f32 %v2192_v50, 0.0  ;;  %v2193_v10 = vadd.f32 %v6694_v9, %v2125_v62  ;;  %v2126_v22 = vadd.f32 %v2063_v18, %v1776_v37  ;;  %2409 = vmatprep.subr.mxu1 %v9022_v11  ;;  %v2301_v56 = vmax.f32 %v2245_v0, %v2247_v8  ;;  %v2318_v37 = vld [vmem:[%s8812_s5 + $0x50] sm:$0xff]  ;;  %v2320_v50 = vld [vmem:[%s8812_s5 + $0x60] sm:$0xff]  ;;  %v2323_v62 = vld [vmem:[%s8812_s5 + $0x78] sm:$0xff] }
 0x24d   : > { %v2065_v47 = vpop.f32.mrf.mxu0  ;;  %2410 = vmatpush1.msra.mxu1 %v9024_v28  ;;  %v2529_v18 = vld [vmem:[%s8810_s3 + $0x8] sm:$0xff]  ;;  %v2324_v32 = vld [vmem:[%s8812_s5 + $0x80] sm:$0xff]  ;;  %v2326_v11 = vld [vmem:[%s8812_s5 + $0x90] sm:$0xff] }
 0x24e   : > { %v2302_v34 = vmax.f32 %v2246_v60, %v2248_v33  ;;  %v2249_v15 = vmax.f32 %v2193_v10, 0.0  ;;  %v2194_v1 = vadd.f32 %v6688_v51, %v2126_v22  ;;  %v2127_v61 = vadd.f32 %v2065_v47, %v1777_v43  ;;  %v2530_v43 = vld [vmem:[%s8810_s3 + $0x10] sm:$0xff]  ;;  %v2548_v10 = vld [vmem:[%s8810_s3 + $0xa0] sm:$0xff]  ;;  %v2547_v22 = vld [vmem:[%s8810_s3 + $0x98] sm:$0xff] }
 0x24f   : > { %v2069_v39 = vpop.f32.mrf.mxu0  ;;  %v2331_v47 = vld [vmem:[%s8812_s5 + $0xb8] sm:$0xff]  ;;  %v2330_v28 = vld [vmem:[%s8812_s5 + $0xb0] sm:$0xff] }
 0x250   : > { %v2250_v54 = vmax.f32 %v2194_v1, 0.0  ;;  %v2195_v5 = vadd.f32 %v6694_v9, %v2127_v61  ;;  %v2128_v21 = vadd.f32 %v2069_v39, %v1778_v41  ;;  %v2303_v29 = vmax.f32 %v2247_v8, %v2249_v15  ;;  %v2532_v8 = vld [vmem:[%s8810_s3 + $0x20] sm:$0xff]  ;;  %v2335_v1 = vld [vmem:[%s8812_s5 + $0xd8] sm:$0xff]  ;;  %v2334_v61 = vld [vmem:[%s8812_s5 + $0xd0] sm:$0xff] }
 0x251   : > { %v2071_v48 = vpop.f32.mrf.mxu0  ;;  %v2328_v41 = vld [vmem:[%s8812_s5 + $0xa0] sm:$0xff]  ;;  %v2744_v39 = vld [vmem:[%s8811_s4 + $0x88] sm:$0xff] }
 0x252   : > { %v2304_v30 = vmax.f32 %v2248_v33, %v2250_v54  ;;  %v2251_v0 = vmax.f32 %v2195_v5, 0.0  ;;  %v2196_v16 = vadd.f32 %v6688_v51, %v2128_v21  ;;  %v2129_v24 = vadd.f32 %v2071_v48, %v1779_v25  ;;  %v2308_v51 = vld [vmem:[%s8812_s5] sm:$0xff]  ;;  %v2327_v33 = vld [vmem:[%s8812_s5 + $0x98] sm:$0xff]  ;;  %v2545_v25 = vld [vmem:[%s8810_s3 + $0x88] sm:$0xff]  ;;  %2809 = vmatpush2.msra.mxu0 %v2744_v39 }
 0x253   : > { %2810 = vmatprep.subr.mxu0 %v8984_v40  ;;  %v2743_v5 = vld [vmem:[%s8811_s4 + $0x80] sm:$0xff]  ;;  %v4868_v21 = vld [vmem:[%s8813_s6 + $0x1f8] sm:$0xff] }
 0x254   : > { %v2252_v46 = vmax.f32 %v2196_v16, 0.0  ;;  %v2197_v38 = vadd.f32 %v6694_v9, %v2129_v24  ;;  %v2305_v45 = vmax.f32 %v2249_v15, %v2251_v0  ;;  %v2311_v9 = vld [vmem:[%s8812_s5 + $0x18] sm:$0xff]  ;;  %v2332_v15 = vld [vmem:[%s8812_s5 + $0xc0] sm:$0xff]  ;;  %2811 = vmatpush2.msra.mxu0 %v2743_v5  ;;  %v4899_v16 = vld [vmem:[%s8813_s6 + $0x2f0] sm:$0xff] }
 0x255   : > { %v4866_v24 = vld [vmem:[%s8813_s6 + $0x1e8] sm:$0xff] }
 0x256   : > { %v2306_v31 = vmax.f32 %v2250_v54, %v2252_v46  ;;  %v2253_v60 = vmax.f32 %v2197_v38, 0.0  ;;  %v2544_v54 = vld [vmem:[%s8810_s3 + $0x80] sm:$0xff]  ;;  %v4898_v46 = vld [vmem:[%s8813_s6 + $0x2e8] sm:$0xff] }
 0x258   : > { %v2307_v13 = vmax.f32 %v2251_v0, %v2253_v60  ;;  %v4867_v0 = vld [vmem:[%s8813_s6 + $0x1f0] sm:$0xff]  ;;  %v4897_v60 = vld [vmem:[%s8813_s6 + $0x2e0] sm:$0xff] }
 0x25a   : > { %2421 = vmatprep.subr.mxu1 %v2307_v13  ;;  %v4864_v13 = vld [vmem:[%s8813_s6 + $0x1d8] sm:$0xff] }
 0x25b   : > { %2422 = vmatpush2.msra.mxu1 %v2306_v31  ;;  %v4865_v31 = vld [vmem:[%s8813_s6 + $0x1e0] sm:$0xff] }
 0x25c   : > { %2423 = vmatprep.subr.mxu1 %v2305_v45 }
 0x25d   : > { %2424 = vmatpush2.msra.mxu1 %v2304_v30 }
 0x25e   : > { %2425 = vmatprep.subr.mxu1 %v2303_v29  ;;  %v4900_v29 = vld [vmem:[%s8813_s6 + $0x2f8] sm:$0xff] }
 0x25f   : > { %2426 = vmatpush2.msra.mxu1 %v2302_v34  ;;  %v2333_v34 = vld [vmem:[%s8812_s5 + $0xc8] sm:$0xff]  ;;  %3245 = vmatprep.subr.mxu0 %v4900_v29  ;;  %v4889_v29 = vld [vmem:[%s8813_s6 + $0x2a0] sm:$0xff] }
 0x260   : > { %2427 = vmatprep.subr.mxu1 %v2301_v56  ;;  %v2329_v56 = vld [vmem:[%s8812_s5 + $0xa8] sm:$0xff] }
 0x261   : > { %2428 = vmatpush2.msra.mxu1 %v2300_v26  ;;  %v2533_v26 = vld [vmem:[%s8810_s3 + $0x28] sm:$0xff] }
 0x262   : > { %2429 = vmatprep.subr.mxu1 %v2299_v20  ;;  %v2316_v20 = vld [vmem:[%s8812_s5 + $0x40] sm:$0xff] }
 0x263   : > { %2430 = vmatpush2.msra.mxu1 %v7106_v52  ;;  %v2537_v52 = vld [vmem:[%s8810_s3 + $0x48] sm:$0xff] }
 0x264   : > { %2431 = vmatprep.subr.mxu1 %v7095_v55  ;;  %v2317_v55 = vld [vmem:[%s8812_s5 + $0x48] sm:$0xff] }
 0x265   : > { %2432 = vmatpush2.msra.mxu1 %v7082_v2  ;;  %v2314_v2 = vld [vmem:[%s8812_s5 + $0x30] sm:$0xff] }
 0x266   : > { %2433 = vmatprep.subr.mxu1 %v7071_v58  ;;  %v2538_v58 = vld [vmem:[%s8810_s3 + $0x50] sm:$0xff] }
 0x267   : > { %2434 = vmatpush2.msra.mxu1 %v7058_v59  ;;  %v2539_v59 = vld [vmem:[%s8810_s3 + $0x58] sm:$0xff] }
 0x268   : > { %2435 = vmatprep.subr.mxu1 %v7047_v42  ;;  %v2315_v42 = vld [vmem:[%s8812_s5 + $0x38] sm:$0xff] }
 0x269   : > { %2436 = vmatpush2.msra.mxu1 %v7032_v14  ;;  %v2312_v14 = vld [vmem:[%s8812_s5 + $0x20] sm:$0xff] }
 0x26a   : > { %2437 = vmatprep.subr.mxu1 %v7021_v53  ;;  %v2543_v53 = vld [vmem:[%s8810_s3 + $0x78] sm:$0xff] }
 0x26b   : > { %2438 = vmatpush2.msra.mxu1 %v7006_v4  ;;  %v2540_v4 = vld [vmem:[%s8810_s3 + $0x60] sm:$0xff] }
 0x26c   : > { %2439 = vmatprep.subr.mxu1 %v6995_v36  ;;  %v2313_v36 = vld [vmem:[%s8812_s5 + $0x28] sm:$0xff] }
 0x26d   : > { %2440 = vmatpush2.msra.mxu1 %v6980_v35  ;;  %v2542_v35 = vld [vmem:[%s8810_s3 + $0x70] sm:$0xff] }
 0x26e   : > { %2441 = vmatprep.subr.mxu1 %v6969_v3  ;;  %v2310_v3 = vld [vmem:[%s8812_s5 + $0x10] sm:$0xff] }
 0x26f   : > { %2442 = vmatpush2.msra.mxu1 %v6957_v19  ;;  %v2541_v19 = vld [vmem:[%s8810_s3 + $0x68] sm:$0xff] }
 0x270   : > { %2444 = vmatmul.mubr.f32.vlgmr.msra.gmra.mxu1 %v2308_v51  ;;  %2592 = vmatprep.subr.mxu1 %v8984_v40  ;;  %v4896_v51 = vld [vmem:[%s8813_s6 + $0x2d8] sm:$0xff] }
 0x271   : > { %4796 = vmatprep.mubr.msk.f32.mxu1 %vm2336_vm0, %v2311_v9  ;;  %2593 = vmatpush1.msra.mxu1 %v2543_v53 }
 0x272   : > { %2594 = vmatprep.subr.mxu1 %v8984_v40 }
 0x273   : > { %2595 = vmatpush1.msra.mxu1 %v2542_v35  ;;  %v4863_v35 = vld [vmem:[%s8813_s6 + $0x1d0] sm:$0xff] }
 0x274   : > { %2450 = vmatmul.mubr.f32.gmra.mxu1 %v2310_v3  ;;  %2596 = vmatprep.subr.mxu1 %v8984_v40  ;;  %v4895_v3 = vld [vmem:[%s8813_s6 + $0x2d0] sm:$0xff] }
 0x275   : > { %4797 = vmatprep.mubr.msk.f32.mxu1 %vm2336_vm0, %v2313_v36  ;;  %2597 = vmatpush1.msra.mxu1 %v2541_v19  ;;  %v4862_v36 = vld [vmem:[%s8813_s6 + $0x1c8] sm:$0xff] }
 0x276   : > { %2598 = vmatprep.subr.mxu1 %v8984_v40  ;;  %v4894_v19 = vld [vmem:[%s8813_s6 + $0x2c8] sm:$0xff] }
 0x277   : > { %2599 = vmatpush1.msra.mxu1 %v2540_v4 }
 0x278   : > { %2456 = vmatmul.mubr.f32.gmra.mxu1 %v2312_v14  ;;  %2600 = vmatprep.subr.mxu1 %v8984_v40 }
 0x279   : > { %4798 = vmatprep.mubr.msk.f32.mxu1 %vm2336_vm0, %v2315_v42  ;;  %2601 = vmatpush1.msra.mxu1 %v2539_v59  ;;  %v4861_v42 = vld [vmem:[%s8813_s6 + $0x1c0] sm:$0xff] }
 0x27a   : > { %2602 = vmatprep.subr.mxu1 %v8984_v40  ;;  %v4893_v59 = vld [vmem:[%s8813_s6 + $0x2c0] sm:$0xff] }
 0x27b   : > { %2603 = vmatpush1.msra.mxu1 %v2538_v58  ;;  %v4860_v58 = vld [vmem:[%s8813_s6 + $0x1b8] sm:$0xff] }
 0x27c   : > { %2462 = vmatmul.mubr.f32.gmra.mxu1 %v2314_v2  ;;  %2604 = vmatprep.subr.mxu1 %v8984_v40  ;;  %v4892_v2 = vld [vmem:[%s8813_s6 + $0x2b8] sm:$0xff] }
 0x27d   : > { %4799 = vmatprep.mubr.msk.f32.mxu1 %vm2336_vm0, %v2317_v55  ;;  %2605 = vmatpush1.msra.mxu1 %v2537_v52 }
 0x27e   : > { %2606 = vmatprep.subr.mxu1 %v8984_v40 }
 0x27f   : > { %2607 = vmatpush1.msra.mxu1 %v2536_v63  ;;  %v4859_v63 = vld [vmem:[%s8813_s6 + $0x1b0] sm:$0xff] }
 0x280   : > { %2468 = vmatmul.mubr.f32.gmra.mxu1 %v2316_v20  ;;  %2608 = vmatprep.subr.mxu1 %v8984_v40  ;;  %v4891_v20 = vld [vmem:[%s8813_s6 + $0x2b0] sm:$0xff] }
 0x281   : > { %4800 = vmatprep.mubr.msk.f32.mxu1 %vm2336_vm0, %v2319_v57  ;;  %2609 = vmatpush1.msra.mxu1 %v2535_v6  ;;  %v4858_v57 = vld [vmem:[%s8813_s6 + $0x1a8] sm:$0xff] }
 0x282   : > { %2610 = vmatprep.subr.mxu1 %v8984_v40  ;;  %v4890_v6 = vld [vmem:[%s8813_s6 + $0x2a8] sm:$0xff] }
 0x283   : > { %2611 = vmatpush1.msra.mxu1 %v2534_v17 }
 0x284   : > { %2474 = vmatmul.mubr.f32.gmra.mxu1 %v2318_v37  ;;  %2612 = vmatprep.subr.mxu1 %v8984_v40 }
 0x285   : > { %4801 = vmatprep.mubr.msk.f32.mxu1 %vm2336_vm0, %v2321_v44  ;;  %2613 = vmatpush1.msra.mxu1 %v2533_v26  ;;  %v4857_v44 = vld [vmem:[%s8813_s6 + $0x1a0] sm:$0xff]  ;;  %v4856_v26 = vld [vmem:[%s8813_s6 + $0x198] sm:$0xff] }
 0x286   : > { %2614 = vmatprep.subr.mxu1 %v8984_v40 }
 0x287   : > { %2615 = vmatpush1.msra.mxu1 %v2532_v8 }
 0x288   : > { %2480 = vmatmul.mubr.f32.gmra.mxu1 %v2320_v50  ;;  %2616 = vmatprep.subr.mxu1 %v8984_v40 }
 0x289   : > { %4802 = vmatprep.mubr.msk.f32.mxu1 %vm2336_vm0, %v2323_v62  ;;  %2617 = vmatpush1.msra.mxu1 %v2531_v12  ;;  %v4855_v62 = vld [vmem:[%s8813_s6 + $0x190] sm:$0xff]  ;;  %v4854_v12 = vld [vmem:[%s8813_s6 + $0x188] sm:$0xff] }
 0x28a   : > { %2618 = vmatprep.subr.mxu1 %v8984_v40 }
 0x28b   : > { %2619 = vmatpush1.msra.mxu1 %v2530_v43 }
 0x28c   : > { %2486 = vmatmul.mubr.f32.gmra.mxu1 %v2322_v27  ;;  %2620 = vmatprep.subr.mxu1 %v8984_v40 }
 0x28d   : > { %4803 = vmatprep.mubr.msk.f32.mxu1 %vm2336_vm0, %v2325_v7  ;;  %2621 = vmatpush1.msra.mxu1 %v2529_v18  ;;  %v4853_v7 = vld [vmem:[%s8813_s6 + $0x180] sm:$0xff]  ;;  %v4852_v18 = vld [vmem:[%s8813_s6 + $0x178] sm:$0xff] }
 0x28e   : > { %2622 = vmatprep.subr.mxu1 %v8984_v40 }
 0x28f   : > { %2623 = vmatpush1.msra.mxu1 %v2528_v49 }
 0x290   : > { %2492 = vmatmul.mubr.f32.gmra.mxu1 %v2324_v32  ;;  %2646 = vmatprep.subr.mxu1 %v8984_v40 }
 0x291   : > { %4804 = vmatprep.mubr.msk.f32.mxu1 %vm2336_vm0, %v2327_v33  ;;  %2647 = vmatpush2.msra.mxu1 %v2548_v10  ;;  %v4851_v33 = vld [vmem:[%s8813_s6 + $0x170] sm:$0xff]  ;;  %v4850_v10 = vld [vmem:[%s8813_s6 + $0x168] sm:$0xff] }
 0x292   : > { %2648 = vmatprep.subr.mxu1 %v8984_v40 }
 0x293   : > { %2649 = vmatpush2.msra.mxu1 %v2547_v22 }
 0x294   : > { %2498 = vmatmul.mubr.f32.gmra.mxu1 %v2326_v11  ;;  %2650 = vmatprep.subr.mxu1 %v8984_v40 }
 0x295   : > { %4805 = vmatprep.mubr.msk.f32.mxu1 %vm2336_vm0, %v2329_v56  ;;  %2651 = vmatpush2.msra.mxu1 %v2546_v23  ;;  %v4849_v56 = vld [vmem:[%s8813_s6 + $0x160] sm:$0xff]  ;;  %v4848_v23 = vld [vmem:[%s8813_s6 + $0x158] sm:$0xff] }
 0x296   : > { %2652 = vmatprep.subr.mxu1 %v8984_v40 }
 0x297   : > { %2653 = vmatpush2.msra.mxu1 %v2545_v25  ;;  %v4844_v25 = vld [vmem:[%s8813_s6 + $0x138] sm:$0xff] }
 0x298   : > { %2504 = vmatmul.mubr.f32.gmra.mxu1 %v2328_v41  ;;  %2654 = vmatprep.subr.mxu1 %v8984_v40 }
 0x299   : > { %4806 = vmatprep.mubr.msk.f32.mxu1 %vm2336_vm0, %v2331_v47  ;;  %2655 = vmatpush2.msra.mxu1 %v2544_v54 }
 0x29a   : > { %2962 = vmatprep.subr.mxu1 %v4868_v21 }
 0x29c   : > { %2510 = vmatmul.mubr.f32.gmra.mxu1 %v2330_v28  ;;  %v4847_v28 = vld [vmem:[%s8813_s6 + $0x150] sm:$0xff] }
 0x29d   : > { %4807 = vmatprep.mubr.msk.f32.mxu1 %vm2336_vm0, %v2333_v34  ;;  %v4846_v34 = vld [vmem:[%s8813_s6 + $0x148] sm:$0xff] }
 0x2a0   : > { %2516 = vmatmul.mubr.f32.gmra.mxu1 %v2332_v15 }
 0x2a1   : > { %4808 = vmatprep.mubr.msk.f32.mxu1 %vm2336_vm0, %v2335_v1 }
 0x2a4   : > { %2522 = vmatmul.mubr.f32.gmra.mxu1 %v2334_v61  ;;  %v4845_v61 = vld [vmem:[%s8813_s6 + $0x140] sm:$0xff] }
 0x330   : > { %v2445_v48 = vpop.f32.mrf.mxu1 }
 0x332   : > { %v2447_v30 = vpop.f32.mrf.mxu1 }
 0x333   : > { %4809 = vmatprep.mubr.msk.f32.mxu1 %vm2549_vm1, %v2447_v30  ;;  %4823 = vmatprep.mubr.msk.f32.mxu0 %vm2549_vm1, %v2447_v30  ;;  %v4887_v30 = vld [vmem:[%s8813_s6 + $0x290] sm:$0xff] }
 0x334   : > { %v2451_v38 = vpop.f32.mrf.mxu1  ;;  %2657 = vmatmul.mubr.f32.vlgmr.msra.gmra.mxu1 %v2445_v48  ;;  %2813 = vmatmul.mubr.f32.vlgmr.msra.gmra.mxu0 %v2445_v48  ;;  %v4888_v48 = vld [vmem:[%s8813_s6 + $0x298] sm:$0xff] }
 0x335   : > { %2963 = vmatpush1.msra.mxu1 %v4867_v0  ;;  %3246 = vmatpush1.msra.mxu0 %v4899_v16  ;;  %v4886_v0 = vld [vmem:[%s8813_s6 + $0x288] sm:$0xff]  ;;  %v4885_v16 = vld [vmem:[%s8813_s6 + $0x280] sm:$0xff] }
 0x336   : > { %v2453_v45 = vpop.f32.mrf.mxu1  ;;  %2964 = vmatprep.subr.mxu1 %v4866_v24  ;;  %3247 = vmatprep.subr.mxu0 %v4898_v46  ;;  %v4884_v24 = vld [vmem:[%s8813_s6 + $0x278] sm:$0xff]  ;;  %v4883_v46 = vld [vmem:[%s8813_s6 + $0x270] sm:$0xff] }
 0x337   : > { %4810 = vmatprep.mubr.msk.f32.mxu1 %vm2549_vm1, %v2453_v45  ;;  %4824 = vmatprep.mubr.msk.f32.mxu0 %vm2549_vm1, %v2453_v45  ;;  %v4881_v45 = vld [vmem:[%s8813_s6 + $0x260] sm:$0xff] }
 0x338   : > { %v2457_v9 = vpop.f32.mrf.mxu1  ;;  %2662 = vmatmul.mubr.f32.gmra.mxu1 %v2451_v38  ;;  %2818 = vmatmul.mubr.f32.gmra.mxu0 %v2451_v38  ;;  %v4882_v38 = vld [vmem:[%s8813_s6 + $0x268] sm:$0xff] }
 0x339   : > { %2965 = vmatpush1.msra.mxu1 %v4865_v31  ;;  %3248 = vmatpush1.msra.mxu0 %v4897_v60  ;;  %v4880_v31 = vld [vmem:[%s8813_s6 + $0x258] sm:$0xff]  ;;  %v4843_v60 = vld [vmem:[%s8813_s6 + $0x130] sm:$0xff] }
 0x33a   : > { %v2459_v53 = vpop.f32.mrf.mxu1  ;;  %2966 = vmatprep.subr.mxu1 %v4864_v13  ;;  %3249 = vmatprep.subr.mxu0 %v4896_v51  ;;  %v4879_v13 = vld [vmem:[%s8813_s6 + $0x250] sm:$0xff]  ;;  %v4842_v51 = vld [vmem:[%s8813_s6 + $0x128] sm:$0xff] }
 0x33b   : > { %4811 = vmatprep.mubr.msk.f32.mxu1 %vm2549_vm1, %v2459_v53  ;;  %4825 = vmatprep.mubr.msk.f32.mxu0 %vm2549_vm1, %v2459_v53  ;;  %v4841_v53 = vld [vmem:[%s8813_s6 + $0x120] sm:$0xff] }
 0x33c   : > { %v2463_v4 = vpop.f32.mrf.mxu1  ;;  %2667 = vmatmul.mubr.f32.gmra.mxu1 %v2457_v9  ;;  %2823 = vmatmul.mubr.f32.gmra.mxu0 %v2457_v9  ;;  %v4878_v9 = vld [vmem:[%s8813_s6 + $0x248] sm:$0xff] }
 0x33d   : > { %2967 = vmatpush1.msra.mxu1 %v4863_v35  ;;  %3250 = vmatpush1.msra.mxu0 %v4895_v3  ;;  %v4877_v35 = vld [vmem:[%s8813_s6 + $0x240] sm:$0xff]  ;;  %v4840_v3 = vld [vmem:[%s8813_s6 + $0x118] sm:$0xff] }
 0x33e   : > { %v2465_v14 = vpop.f32.mrf.mxu1  ;;  %2968 = vmatprep.subr.mxu1 %v4862_v36  ;;  %3251 = vmatprep.subr.mxu0 %v4894_v19  ;;  %v4876_v36 = vld [vmem:[%s8813_s6 + $0x238] sm:$0xff]  ;;  %v4839_v19 = vld [vmem:[%s8813_s6 + $0x110] sm:$0xff] }
 0x33f   : > { %4812 = vmatprep.mubr.msk.f32.mxu1 %vm2549_vm1, %v2465_v14  ;;  %4826 = vmatprep.mubr.msk.f32.mxu0 %vm2549_vm1, %v2465_v14  ;;  %v4838_v14 = vld [vmem:[%s8813_s6 + $0x108] sm:$0xff] }
 0x340   : > { %v2469_v55 = vpop.f32.mrf.mxu1  ;;  %2672 = vmatmul.mubr.f32.gmra.mxu1 %v2463_v4  ;;  %2828 = vmatmul.mubr.f32.gmra.mxu0 %v2463_v4  ;;  %v4875_v4 = vld [vmem:[%s8813_s6 + $0x230] sm:$0xff] }
 0x341   : > { %2969 = vmatpush1.msra.mxu1 %v4861_v42  ;;  %3252 = vmatpush1.msra.mxu0 %v4893_v59  ;;  %v4874_v42 = vld [vmem:[%s8813_s6 + $0x228] sm:$0xff]  ;;  %v4837_v59 = vld [vmem:[%s8813_s6 + $0x100] sm:$0xff] }
 0x342   : > { %v2471_v52 = vpop.f32.mrf.mxu1  ;;  %2970 = vmatprep.subr.mxu1 %v4860_v58  ;;  %3253 = vmatprep.subr.mxu0 %v4892_v2  ;;  %v4873_v58 = vld [vmem:[%s8813_s6 + $0x220] sm:$0xff]  ;;  %v4872_v2 = vld [vmem:[%s8813_s6 + $0x218] sm:$0xff] }
 0x343   : > { %4813 = vmatprep.mubr.msk.f32.mxu1 %vm2549_vm1, %v2471_v52  ;;  %4827 = vmatprep.mubr.msk.f32.mxu0 %vm2549_vm1, %v2471_v52  ;;  %v4870_v52 = vld [vmem:[%s8813_s6 + $0x208] sm:$0xff] }
 0x344   : > { %v2475_v17 = vpop.f32.mrf.mxu1  ;;  %2677 = vmatmul.mubr.f32.gmra.mxu1 %v2469_v55  ;;  %2833 = vmatmul.mubr.f32.gmra.mxu0 %v2469_v55  ;;  %v4871_v55 = vld [vmem:[%s8813_s6 + $0x210] sm:$0xff] }
 0x345   : > { %2971 = vmatpush1.msra.mxu1 %v4859_v63  ;;  %3254 = vmatpush1.msra.mxu0 %v4891_v20  ;;  %v4869_v63 = vld [vmem:[%s8813_s6 + $0x200] sm:$0xff]  ;;  %v2928_v20 = vld [vmem:[%s8813_s6 + $0xf8] sm:$0xff] }
 0x346   : > { %v2477_v37 = vpop.f32.mrf.mxu1  ;;  %2972 = vmatprep.subr.mxu1 %v4858_v57  ;;  %3255 = vmatprep.subr.mxu0 %v4890_v6  ;;  %v4964_v57 = vld [vmem:[%s8813_s6 + $0x4f8] sm:$0xff] }
 0x347   : > { %4814 = vmatprep.mubr.msk.f32.mxu1 %vm2549_vm1, %v2477_v37  ;;  %4828 = vmatprep.mubr.msk.f32.mxu0 %vm2549_vm1, %v2477_v37 }
 0x348   : > { %v2481_v8 = vpop.f32.mrf.mxu1  ;;  %2682 = vmatmul.mubr.f32.gmra.mxu1 %v2475_v17  ;;  %2838 = vmatmul.mubr.f32.gmra.mxu0 %v2475_v17 }
 0x349   : > { %2973 = vmatpush1.msra.mxu1 %v4857_v44  ;;  %3256 = vmatpush1.msra.mxu0 %v4889_v29 }
 0x34a   : > { %v2483_v50 = vpop.f32.mrf.mxu1  ;;  %2974 = vmatprep.subr.mxu1 %v4856_v26  ;;  %3257 = vmatprep.subr.mxu0 %v4888_v48  ;;  %v2915_v48 = vld [vmem:[%s8813_s6 + $0x90] sm:$0xff] }
 0x34b   : > { %4815 = vmatprep.mubr.msk.f32.mxu1 %vm2549_vm1, %v2483_v50  ;;  %4829 = vmatprep.mubr.msk.f32.mxu0 %vm2549_vm1, %v2483_v50 }
 0x34c   : > { %v2487_v43 = vpop.f32.mrf.mxu1  ;;  %2687 = vmatmul.mubr.f32.gmra.mxu1 %v2481_v8  ;;  %2843 = vmatmul.mubr.f32.gmra.mxu0 %v2481_v8 }
 0x34d   : > { %2975 = vmatpush1.msra.mxu1 %v4855_v62  ;;  %3258 = vmatpush1.msra.mxu0 %v4887_v30  ;;  %v2927_v62 = vld [vmem:[%s8813_s6 + $0xf0] sm:$0xff] }
 0x34e   : > { %v2489_v27 = vpop.f32.mrf.mxu1  ;;  %2976 = vmatprep.subr.mxu1 %v4854_v12  ;;  %3259 = vmatprep.subr.mxu0 %v4886_v0 }
 0x34f   : > { %4816 = vmatprep.mubr.msk.f32.mxu1 %vm2549_vm1, %v2489_v27  ;;  %4830 = vmatprep.mubr.msk.f32.mxu0 %vm2549_vm1, %v2489_v27  ;;  %v2926_v27 = vld [vmem:[%s8813_s6 + $0xe8] sm:$0xff] }
 0x350   : > { %v2493_v49 = vpop.f32.mrf.mxu1  ;;  %2692 = vmatmul.mubr.f32.gmra.mxu1 %v2487_v43  ;;  %2848 = vmatmul.mubr.f32.gmra.mxu0 %v2487_v43 }
 0x351   : > { %2977 = vmatpush1.msra.mxu1 %v4853_v7  ;;  %3260 = vmatpush1.msra.mxu0 %v4885_v16  ;;  %v2925_v7 = vld [vmem:[%s8813_s6 + $0xe0] sm:$0xff]  ;;  %v2914_v16 = vld [vmem:[%s8813_s6 + $0x88] sm:$0xff] }
 0x352   : > { %v2495_v32 = vpop.f32.mrf.mxu1  ;;  %2978 = vmatprep.subr.mxu1 %v4852_v18  ;;  %3261 = vmatprep.subr.mxu0 %v4884_v24  ;;  %v2913_v24 = vld [vmem:[%s8813_s6 + $0x80] sm:$0xff] }
 0x353   : > { %4817 = vmatprep.mubr.msk.f32.mxu1 %vm2549_vm1, %v2495_v32  ;;  %4831 = vmatprep.mubr.msk.f32.mxu0 %vm2549_vm1, %v2495_v32  ;;  %v2924_v32 = vld [vmem:[%s8813_s6 + $0xd8] sm:$0xff] }
 0x354   : > { %v2499_v22 = vpop.f32.mrf.mxu1  ;;  %2697 = vmatmul.mubr.f32.gmra.mxu1 %v2493_v49  ;;  %2853 = vmatmul.mubr.f32.gmra.mxu0 %v2493_v49 }
 0x355   : > { %2979 = vmatpush1.msra.mxu1 %v4851_v33  ;;  %3262 = vmatpush1.msra.mxu0 %v4883_v46  ;;  %v4963_v46 = vld [vmem:[%s8813_s6 + $0x4f0] sm:$0xff] }
 0x356   : > { %v2501_v11 = vpop.f32.mrf.mxu1  ;;  %2980 = vmatprep.subr.mxu1 %v4850_v10  ;;  %3263 = vmatprep.subr.mxu0 %v4882_v38  ;;  %v2923_v10 = vld [vmem:[%s8813_s6 + $0xd0] sm:$0xff] }
 0x357   : > { %4818 = vmatprep.mubr.msk.f32.mxu1 %vm2549_vm1, %v2501_v11  ;;  %4832 = vmatprep.mubr.msk.f32.mxu0 %vm2549_vm1, %v2501_v11 }
 0x358   : > { %v2505_v41 = vpop.f32.mrf.mxu1  ;;  %2702 = vmatmul.mubr.f32.gmra.mxu1 %v2499_v22  ;;  %2858 = vmatmul.mubr.f32.gmra.mxu0 %v2499_v22 }
 0x359   : > { %2981 = vmatpush1.msra.mxu1 %v4849_v56  ;;  %3264 = vmatpush1.msra.mxu0 %v4881_v45  ;;  %v2922_v56 = vld [vmem:[%s8813_s6 + $0xc8] sm:$0xff] }
 0x35a   : > { %v2507_v47 = vpop.f32.mrf.mxu1  ;;  %2982 = vmatprep.subr.mxu1 %v4848_v23  ;;  %3265 = vmatprep.subr.mxu0 %v4880_v31  ;;  %v2921_v23 = vld [vmem:[%s8813_s6 + $0xc0] sm:$0xff]  ;;  %v2912_v31 = vld [vmem:[%s8813_s6 + $0x78] sm:$0xff] }
 0x35b   : > { %4819 = vmatprep.mubr.msk.f32.mxu1 %vm2549_vm1, %v2507_v47  ;;  %4833 = vmatprep.mubr.msk.f32.mxu0 %vm2549_vm1, %v2507_v47 }
 0x35c   : > { %2707 = vmatmul.mubr.f32.gmra.mxu1 %v2505_v41  ;;  %2863 = vmatmul.mubr.f32.gmra.mxu0 %v2505_v41  ;;  %v2511_v15 = vpop.f32.mrf.mxu1 }
 0x35d   : > { %2983 = vmatpush1.msra.mxu1 %v4847_v28  ;;  %3266 = vmatpush1.msra.mxu0 %v4879_v13  ;;  %v2920_v28 = vld [vmem:[%s8813_s6 + $0xb8] sm:$0xff]  ;;  %v4962_v13 = vld [vmem:[%s8813_s6 + $0x4e8] sm:$0xff] }
 0x35e   : > { %v2513_v1 = vpop.f32.mrf.mxu1  ;;  %2984 = vmatprep.subr.mxu1 %v4846_v34  ;;  %3267 = vmatprep.subr.mxu0 %v4878_v9 }
 0x35f   : > { %4820 = vmatprep.mubr.msk.f32.mxu1 %vm2549_vm1, %v2513_v1  ;;  %4834 = vmatprep.mubr.msk.f32.mxu0 %vm2549_vm1, %v2513_v1 }
 0x360   : > { %2712 = vmatmul.mubr.f32.gmra.mxu1 %v2511_v15  ;;  %2868 = vmatmul.mubr.f32.gmra.mxu0 %v2511_v15  ;;  %v2517_v39 = vpop.f32.mrf.mxu1  ;;  %v2919_v15 = vld [vmem:[%s8813_s6 + $0xb0] sm:$0xff] }
 0x361   : > { %2985 = vmatpush1.msra.mxu1 %v4845_v61  ;;  %3268 = vmatpush1.msra.mxu0 %v4877_v35  ;;  %v4961_v35 = vld [vmem:[%s8813_s6 + $0x4e0] sm:$0xff] }
 0x362   : > { %v2519_v54 = vpop.f32.mrf.mxu1  ;;  %2986 = vmatprep.subr.mxu1 %v4844_v25  ;;  %3269 = vmatprep.subr.mxu0 %v4876_v36  ;;  %v2918_v25 = vld [vmem:[%s8813_s6 + $0xa8] sm:$0xff] }
 0x363   : > { %4821 = vmatprep.mubr.msk.f32.mxu1 %vm2549_vm1, %v2519_v54  ;;  %4835 = vmatprep.mubr.msk.f32.mxu0 %vm2549_vm1, %v2519_v54 }
 0x364   : > { %v2523_v5 = vpop.f32.mrf.mxu1  ;;  %2717 = vmatmul.mubr.f32.gmra.mxu1 %v2517_v39  ;;  %2873 = vmatmul.mubr.f32.gmra.mxu0 %v2517_v39  ;;  %v2917_v39 = vld [vmem:[%s8813_s6 + $0xa0] sm:$0xff] }
 0x365   : > { %2987 = vmatpush1.msra.mxu1 %v4843_v60  ;;  %3270 = vmatpush1.msra.mxu0 %v4875_v4 }
 0x366   : > { %v2525_v21 = vpop.f32.mrf.mxu1  ;;  %2988 = vmatprep.subr.mxu1 %v4842_v51  ;;  %3271 = vmatprep.subr.mxu0 %v4874_v42 }
 0x367   : > { %4822 = vmatprep.mubr.msk.f32.mxu1 %vm2549_vm1, %v2525_v21  ;;  %4836 = vmatprep.mubr.msk.f32.mxu0 %vm2549_vm1, %v2525_v21  ;;  %v2916_v21 = vld [vmem:[%s8813_s6 + $0x98] sm:$0xff] }
 0x368   : > { %2722 = vmatmul.mubr.f32.gmra.mxu1 %v2523_v5  ;;  %2878 = vmatmul.mubr.f32.gmra.mxu0 %v2523_v5 }
 0x369   : > { %3026 = vmatprep.mubr.f32.mxu1 %v8984_v40  ;;  %3309 = vmatprep.mubr.f32.mxu0 %v8984_v40 }
 0x36a   : > { %2989 = vmatpush1.msra.mxu1 %v4841_v53  ;;  %3272 = vmatpush1.msra.mxu0 %v4873_v58  ;;  %v2911_v53 = vld [vmem:[%s8813_s6 + $0x70] sm:$0xff]  ;;  %v2909_v58 = vld [vmem:[%s8813_s6 + $0x60] sm:$0xff] }
 0x36b   : > { %2990 = vmatprep.subr.mxu1 %v4840_v3  ;;  %3273 = vmatprep.subr.mxu0 %v4872_v2  ;;  %v2910_v3 = vld [vmem:[%s8813_s6 + $0x68] sm:$0xff]  ;;  %v4959_v2 = vld [vmem:[%s8813_s6 + $0x4d0] sm:$0xff] }
 0x36c   : > { %2991 = vmatpush1.msra.mxu1 %v4839_v19  ;;  %3274 = vmatpush1.msra.mxu0 %v4871_v55  ;;  %v2908_v55 = vld [vmem:[%s8813_s6 + $0x58] sm:$0xff] }
 0x36d   : > { %2992 = vmatprep.subr.mxu1 %v4838_v14  ;;  %3275 = vmatprep.subr.mxu0 %v4870_v52  ;;  %v4960_v14 = vld [vmem:[%s8813_s6 + $0x4d8] sm:$0xff]  ;;  %v4958_v52 = vld [vmem:[%s8813_s6 + $0x4c8] sm:$0xff] }
 0x36e   : > { %2993 = vmatpush1.msra.mxu1 %v4837_v59  ;;  %3276 = vmatpush1.msra.mxu0 %v4869_v63 }
 0x36f   : > { %3087 = vmatprep.subr.mxu1 %v2928_v20  ;;  %3601 = vmatprep.subr.mxu0 %v4964_v57 }
 0x3f4   : > { %v7563_v6 = vpop.f32.mrf.mxu1  ;;  %v7565_v17 = vpop.f32.mrf.mxu0 }
 0x3f6   : > { %v2660_v37 = vpop.f32.mrf.mxu1  ;;  %v2816_v44 = vpop.f32.mrf.mxu0 }
 0x3f7   : > { %v2907_v37 = vld [vmem:[%s8813_s6 + $0x50] sm:$0xff] }
 0x3f8   : > { %v2663_v26 = vpop.f32.mrf.mxu1  ;;  %v2819_v8 = vpop.f32.mrf.mxu0 }
 0x3f9   : > { %v7567_v50 = vmax.f32 %v2663_v26, %v2819_v8  ;;  %v4957_v8 = vld [vmem:[%s8813_s6 + $0x4c0] sm:$0xff] }
 0x3fa   : > { %v2665_v12 = vpop.f32.mrf.mxu1  ;;  %v2821_v43 = vpop.f32.mrf.mxu0 }
 0x3fb   : > { %3027 = vmatmul.mubr.f32.vlgmr.msra.gmra.mxu1 %v7567_v50  ;;  %v4956_v12 = vld [vmem:[%s8813_s6 + $0x4b8] sm:$0xff] }
 0x3fc   : > { %v2668_v18 = vpop.f32.mrf.mxu1  ;;  %v2824_v49 = vpop.f32.mrf.mxu0  ;;  %3032 = vmatprep.mubr.f32.mxu1 %v8984_v40  ;;  %3088 = vmatpush1.msra.mxu1 %v2927_v62  ;;  %v2906_v62 = vld [vmem:[%s8813_s6 + $0x48] sm:$0xff] }
 0x3fd   : > { %v7583_v33 = vmax.f32 %v2668_v18, %v2824_v49  ;;  %3089 = vmatprep.subr.mxu1 %v2926_v27  ;;  %v2905_v49 = vld [vmem:[%s8813_s6 + $0x40] sm:$0xff] }
 0x3fe   : > { %v2670_v22 = vpop.f32.mrf.mxu1  ;;  %v2826_v11 = vpop.f32.mrf.mxu0  ;;  %3090 = vmatpush1.msra.mxu1 %v2925_v7  ;;  %v4955_v7 = vld [vmem:[%s8813_s6 + $0x4b0] sm:$0xff] }
 0x3ff   : > { %3033 = vmatmul.mubr.f32.gmra.mxu1 %v7583_v33  ;;  %3091 = vmatprep.subr.mxu1 %v2924_v32  ;;  %v2904_v22 = vld [vmem:[%s8813_s6 + $0x38] sm:$0xff]  ;;  %v4954_v11 = vld [vmem:[%s8813_s6 + $0x4a8] sm:$0xff] }
 0x400   : > { %v2673_v41 = vpop.f32.mrf.mxu1  ;;  %v2829_v47 = vpop.f32.mrf.mxu0  ;;  %3038 = vmatprep.mubr.f32.mxu1 %v8984_v40  ;;  %3092 = vmatpush1.msra.mxu1 %v2923_v10 }
 0x401   : > { %v7599_v34 = vmax.f32 %v2673_v41, %v2829_v47  ;;  %3093 = vmatprep.subr.mxu1 %v2922_v56  ;;  %3310 = vmatmul.mubr.f32.vlgmr.msra.gmra.mxu0 %v7583_v33  ;;  %v2903_v56 = vld [vmem:[%s8813_s6 + $0x30] sm:$0xff]  ;;  %v4953_v47 = vld [vmem:[%s8813_s6 + $0x4a0] sm:$0xff] }
 0x402   : > { %v2675_v1 = vpop.f32.mrf.mxu1  ;;  %v2831_v61 = vpop.f32.mrf.mxu0  ;;  %3094 = vmatpush1.msra.mxu1 %v2921_v23  ;;  %3315 = vmatprep.mubr.f32.mxu0 %v8984_v40 }
 0x403   : > { %3039 = vmatmul.mubr.f32.gmra.mxu1 %v7599_v34  ;;  %3095 = vmatprep.subr.mxu1 %v2920_v28 }
 0x404   : > { %v2678_v54 = vpop.f32.mrf.mxu1  ;;  %v2834_v5 = vpop.f32.mrf.mxu0  ;;  %3044 = vmatprep.mubr.f32.mxu1 %v8984_v40  ;;  %3096 = vmatpush1.msra.mxu1 %v2919_v15  ;;  %v2902_v15 = vld [vmem:[%s8813_s6 + $0x28] sm:$0xff] }
 0x405   : > { %v7617_v29 = vmax.f32 %v2678_v54, %v2834_v5  ;;  %3097 = vmatprep.subr.mxu1 %v2918_v25  ;;  %3316 = vmatmul.mubr.f32.gmra.mxu0 %v7599_v34  ;;  %v4952_v25 = vld [vmem:[%s8813_s6 + $0x498] sm:$0xff]  ;;  %v4951_v54 = vld [vmem:[%s8813_s6 + $0x490] sm:$0xff] }
 0x406   : > { %v2680_v30 = vpop.f32.mrf.mxu1  ;;  %v2836_v0 = vpop.f32.mrf.mxu0  ;;  %3098 = vmatpush1.msra.mxu1 %v2917_v39  ;;  %3321 = vmatprep.mubr.f32.mxu0 %v8984_v40  ;;  %v2901_v39 = vld [vmem:[%s8813_s6 + $0x20] sm:$0xff] }
 0x407   : > { %3045 = vmatmul.mubr.f32.gmra.mxu1 %v7617_v29  ;;  %3099 = vmatprep.subr.mxu1 %v2916_v21  ;;  %v4950_v0 = vld [vmem:[%s8813_s6 + $0x488] sm:$0xff] }
 0x408   : > { %v2683_v38 = vpop.f32.mrf.mxu1  ;;  %v2839_v45 = vpop.f32.mrf.mxu0  ;;  %3050 = vmatprep.mubr.f32.mxu1 %v8984_v40  ;;  %3100 = vmatpush1.msra.mxu1 %v2915_v48  ;;  %v2900_v48 = vld [vmem:[%s8813_s6 + $0x18] sm:$0xff] }
 0x409   : > { %v7638_v60 = vmax.f32 %v2683_v38, %v2839_v45  ;;  %3101 = vmatprep.subr.mxu1 %v2914_v16  ;;  %3322 = vmatmul.mubr.f32.gmra.mxu0 %v7617_v29  ;;  %v2899_v16 = vld [vmem:[%s8813_s6 + $0x10] sm:$0xff]  ;;  %v2898_v45 = vld [vmem:[%s8813_s6 + $0x8] sm:$0xff] }
 0x40a   : > { %v2685_v51 = vpop.f32.mrf.mxu1  ;;  %v2841_v9 = vpop.f32.mrf.mxu0  ;;  %3102 = vmatpush1.msra.mxu1 %v2913_v24  ;;  %3602 = vmatpush1.msra.mxu0 %v4963_v46  ;;  %v4949_v24 = vld [vmem:[%s8813_s6 + $0x480] sm:$0xff] }
 0x40b   : > { %3051 = vmatmul.mubr.f32.gmra.mxu1 %v7638_v60  ;;  %3103 = vmatprep.subr.mxu1 %v2912_v31  ;;  %v4948_v31 = vld [vmem:[%s8813_s6 + $0x478] sm:$0xff] }
 0x40c   : > { %v2688_v36 = vpop.f32.mrf.mxu1  ;;  %v2844_v19 = vpop.f32.mrf.mxu0  ;;  %3056 = vmatprep.mubr.f32.mxu1 %v8984_v40  ;;  %3603 = vmatprep.subr.mxu0 %v4962_v13  ;;  %v2897_v13 = vld [vmem:[%s8813_s6] sm:$0xff] }
 0x40d   : > { %v7655_v4 = vmax.f32 %v2688_v36, %v2844_v19  ;;  %3104 = vmatpush1.msra.mxu1 %v2911_v53  ;;  %3327 = vmatprep.mubr.f32.mxu0 %v8984_v40  ;;  %v4947_v53 = vld [vmem:[%s8813_s6 + $0x470] sm:$0xff]  ;;  %v2883_v19 = vmax.f32 %v7563_v6, %v7565_v17  ;;  %v4942_v17 = vld [vmem:[%s8813_s6 + $0x448] sm:$0xff] }
 0x40e   : > { %v2690_v42 = vpop.f32.mrf.mxu1  ;;  %v2846_v59 = vpop.f32.mrf.mxu0  ;;  %3604 = vmatpush1.msra.mxu0 %v4961_v35  ;;  %3105 = vmatprep.subr.mxu1 %v2910_v3  ;;  %v4946_v35 = vld [vmem:[%s8813_s6 + $0x468] sm:$0xff]  ;;  %v4943_v6 = vld [vmem:[%s8813_s6 + $0x450] sm:$0xff] }
 0x40f   : > { %3057 = vmatmul.mubr.f32.gmra.mxu1 %v7655_v4  ;;  %3328 = vmatmul.mubr.f32.gmra.mxu0 %v7638_v60  ;;  %v4944_v42 = vld [vmem:[%s8813_s6 + $0x458] sm:$0xff] }
 0x410   : > { %v2693_v63 = vpop.f32.mrf.mxu1  ;;  %v2849_v20 = vpop.f32.mrf.mxu0  ;;  %3062 = vmatprep.mubr.f32.mxu1 %v8984_v40  ;;  %3605 = vmatprep.subr.mxu0 %v4960_v14  ;;  %v4945_v14 = vld [vmem:[%s8813_s6 + $0x460] sm:$0xff] }
 0x411   : > { %v7676_v57 = vmax.f32 %v2693_v63, %v2849_v20  ;;  %3106 = vmatpush1.msra.mxu1 %v2909_v58  ;;  %3606 = vmatpush1.msra.mxu0 %v4959_v2  ;;  %v4940_v63 = vld [vmem:[%s8813_s6 + $0x438] sm:$0xff] }
 0x412   : > { %v2695_v44 = vpop.f32.mrf.mxu1  ;;  %v2851_v26 = vpop.f32.mrf.mxu0  ;;  %3107 = vmatprep.subr.mxu1 %v2908_v55  ;;  %3607 = vmatprep.subr.mxu0 %v4958_v52  ;;  %v4941_v52 = vld [vmem:[%s8813_s6 + $0x440] sm:$0xff] }
 0x413   : > { %3063 = vmatmul.mubr.f32.gmra.mxu1 %v7676_v57  ;;  %3333 = vmatprep.mubr.f32.mxu0 %v8984_v40  ;;  %v4939_v44 = vld [vmem:[%s8813_s6 + $0x430] sm:$0xff]  ;;  %v4932_v26 = vld [vmem:[%s8813_s6 + $0x3f8] sm:$0xff] }
 0x414   : > { %v2698_v43 = vpop.f32.mrf.mxu1  ;;  %v2854_v27 = vpop.f32.mrf.mxu0  ;;  %3068 = vmatprep.mubr.f32.mxu1 %v8984_v40  ;;  %3108 = vmatpush1.msra.mxu1 %v2907_v37 }
 0x415   : > { %v7696_v18 = vmax.f32 %v2698_v43, %v2854_v27  ;;  %3608 = vmatpush1.msra.mxu0 %v4957_v8  ;;  %3109 = vmatprep.subr.mxu1 %v2906_v62  ;;  %v4931_v43 = vld [vmem:[%s8813_s6 + $0x3f0] sm:$0xff]  ;;  %v4937_v27 = vld [vmem:[%s8813_s6 + $0x420] sm:$0xff] }
 0x416   : > { %v2700_v32 = vpop.f32.mrf.mxu1  ;;  %v2856_v10 = vpop.f32.mrf.mxu0  ;;  %3334 = vmatmul.mubr.f32.gmra.mxu0 %v7655_v4  ;;  %3609 = vmatprep.subr.mxu0 %v4956_v12 }
 0x417   : > { %3069 = vmatmul.mubr.f32.gmra.mxu1 %v7696_v18  ;;  %3610 = vmatpush1.msra.mxu0 %v4955_v7  ;;  %v4930_v7 = vld [vmem:[%s8813_s6 + $0x3e8] sm:$0xff]  ;;  %v4929_v32 = vld [vmem:[%s8813_s6 + $0x3e0] sm:$0xff]  ;;  %v4928_v10 = vld [vmem:[%s8813_s6 + $0x3d8] sm:$0xff] }
 0x418   : > { %v2703_v23 = vpop.f32.mrf.mxu1  ;;  %v2859_v41 = vpop.f32.mrf.mxu0  ;;  %3074 = vmatprep.mubr.f32.mxu1 %v8984_v40  ;;  %3110 = vmatpush1.msra.mxu1 %v2905_v49  ;;  %v4936_v49 = vld [vmem:[%s8813_s6 + $0x418] sm:$0xff] }
 0x419   : > { %v7716_v28 = vmax.f32 %v2703_v23, %v2859_v41  ;;  %3111 = vmatprep.subr.mxu1 %v2904_v22  ;;  %3611 = vmatprep.subr.mxu0 %v4954_v11  ;;  %v4934_v22 = vld [vmem:[%s8813_s6 + $0x408] sm:$0xff]  ;;  %v4927_v11 = vld [vmem:[%s8813_s6 + $0x3d0] sm:$0xff]  ;;  %v4925_v41 = vld [vmem:[%s8813_s6 + $0x3c0] sm:$0xff] }
 0x41a   : > { %v2705_v1 = vpop.f32.mrf.mxu1  ;;  %v2861_v61 = vpop.f32.mrf.mxu0  ;;  %3112 = vmatpush1.msra.mxu1 %v2903_v56  ;;  %3339 = vmatprep.mubr.f32.mxu0 %v8984_v40  ;;  %v4933_v56 = vld [vmem:[%s8813_s6 + $0x400] sm:$0xff]  ;;  %v4926_v23 = vld [vmem:[%s8813_s6 + $0x3c8] sm:$0xff] }
 0x41b   : > { %3075 = vmatmul.mubr.f32.gmra.mxu1 %v7716_v28  ;;  %3612 = vmatpush1.msra.mxu0 %v4953_v47  ;;  %v4924_v47 = vld [vmem:[%s8813_s6 + $0x3b8] sm:$0xff]  ;;  %v4922_v1 = vld [vmem:[%s8813_s6 + $0x3a8] sm:$0xff]  ;;  %v4921_v61 = vld [vmem:[%s8813_s6 + $0x3a0] sm:$0xff] }
 0x41c   : > { %v2708_v5 = vpop.f32.mrf.mxu1  ;;  %v2864_v21 = vpop.f32.mrf.mxu0  ;;  %3113 = vmatprep.subr.mxu1 %v2902_v15  ;;  %3340 = vmatmul.mubr.f32.gmra.mxu0 %v7676_v57  ;;  %v4923_v15 = vld [vmem:[%s8813_s6 + $0x3b0] sm:$0xff] }
 0x41d   : > { %v7736_v30 = vmax.f32 %v2708_v5, %v2864_v21  ;;  %3613 = vmatprep.subr.mxu0 %v4952_v25  ;;  %3080 = vmatprep.mubr.f32.mxu1 %v8984_v40  ;;  %v4920_v25 = vld [vmem:[%s8813_s6 + $0x398] sm:$0xff]  ;;  %v4917_v5 = vld [vmem:[%s8813_s6 + $0x380] sm:$0xff] }
 0x41e   : > { %3114 = vmatpush1.msra.mxu1 %v2901_v39  ;;  %3614 = vmatpush1.msra.mxu0 %v4951_v54  ;;  %v2710_v46 = vpop.f32.mrf.mxu1  ;;  %v2866_v38 = vpop.f32.mrf.mxu0  ;;  %v4919_v39 = vld [vmem:[%s8813_s6 + $0x390] sm:$0xff]  ;;  %v4918_v54 = vld [vmem:[%s8813_s6 + $0x388] sm:$0xff]  ;;  %v4916_v21 = vld [vmem:[%s8813_s6 + $0x378] sm:$0xff] }
 0x41f   : > { %3081 = vmatmul.mubr.f32.gmra.mxu1 %v7736_v30  ;;  %3115 = vmatprep.subr.mxu1 %v2900_v48  ;;  %v4915_v48 = vld [vmem:[%s8813_s6 + $0x370] sm:$0xff]  ;;  %v4910_v38 = vld [vmem:[%s8813_s6 + $0x348] sm:$0xff] }
 0x420   : > { %3615 = vmatprep.subr.mxu0 %v4950_v0  ;;  %3116 = vmatpush1.msra.mxu1 %v2899_v16  ;;  %v2713_v51 = vpop.f32.mrf.mxu1  ;;  %v2869_v9 = vpop.f32.mrf.mxu0  ;;  %v4914_v0 = vld [vmem:[%s8813_s6 + $0x368] sm:$0xff]  ;;  %v4913_v16 = vld [vmem:[%s8813_s6 + $0x360] sm:$0xff]  ;;  %v4911_v46 = vld [vmem:[%s8813_s6 + $0x350] sm:$0xff] }
 0x421   : > { %3345 = vmatprep.mubr.f32.mxu0 %v8984_v40  ;;  %3616 = vmatpush1.msra.mxu0 %v4949_v24  ;;  %v7810_v12 = vmax.f32 %v2713_v51, %v2869_v9  ;;  %v4912_v24 = vld [vmem:[%s8813_s6 + $0x358] sm:$0xff]  ;;  %v4906_v51 = vld [vmem:[%s8813_s6 + $0x328] sm:$0xff]  ;;  %v4905_v9 = vld [vmem:[%s8813_s6 + $0x320] sm:$0xff] }
 0x422   : > { %3117 = vmatprep.subr.mxu1 %v2898_v45  ;;  %3346 = vmatmul.mubr.f32.gmra.mxu0 %v7696_v18  ;;  %v2715_v3 = vpop.f32.mrf.mxu1  ;;  %v2871_v36 = vpop.f32.mrf.mxu0  ;;  %v4909_v45 = vld [vmem:[%s8813_s6 + $0x340] sm:$0xff] }
 0x423   : > { %3617 = vmatprep.subr.mxu0 %v4948_v31  ;;  %3118 = vmatpush1.msra.mxu1 %v2897_v13  ;;  %v4908_v31 = vld [vmem:[%s8813_s6 + $0x338] sm:$0xff]  ;;  %v4907_v13 = vld [vmem:[%s8813_s6 + $0x330] sm:$0xff]  ;;  %v4902_v3 = vld [vmem:[%s8813_s6 + $0x308] sm:$0xff] }
 0x424   : > { %3151 = vmatprep.mubr.f32.mxu1 %v8984_v40  ;;  %3618 = vmatpush1.msra.mxu0 %v4947_v53  ;;  %v7775_v59 = vpop.f32.mrf.mxu1  ;;  %v7777_v58 = vpop.f32.mrf.mxu0  ;;  %v4904_v53 = vld [vmem:[%s8813_s6 + $0x318] sm:$0xff]  ;;  %v4901_v36 = vld [vmem:[%s8813_s6 + $0x300] sm:$0xff] }
 0x425   : > { %3152 = vmatmul.mubr.f32.vlgmr.msra.gmra.mxu1 %v2883_v19  ;;  %3619 = vmatprep.subr.mxu0 %v4946_v35  ;;  %v4903_v35 = vld [vmem:[%s8813_s6 + $0x310] sm:$0xff]  ;;  %v2895_v19 = vmax.f32 %v7775_v59, %v7777_v58  ;;  %v3981_v59 = vld [vmem:[%s8816_s9 + $0x58] sm:$0xff] }
 0x426   : > { %3351 = vmatprep.mubr.f32.mxu0 %v8984_v40  ;;  %3620 = vmatpush1.msra.mxu0 %v4945_v14  ;;  %v2720_v2 = vpop.f32.mrf.mxu1  ;;  %v2876_v55 = vpop.f32.mrf.mxu0  ;;  %v3982_v14 = vld [vmem:[%s8816_s9 + $0x60] sm:$0xff]  ;;  %v3826_v58 = vld [vmem:[%s8815_s8 + $0x50] sm:$0xff] }
 0x427   : > { %3352 = vmatmul.mubr.f32.gmra.mxu0 %v7716_v28  ;;  %3621 = vmatprep.subr.mxu0 %v4944_v42  ;;  %v3827_v42 = vld [vmem:[%s8815_s8 + $0x58] sm:$0xff]  ;;  %v3979_v2 = vld [vmem:[%s8816_s9 + $0x48] sm:$0xff]  ;;  %v3824_v55 = vld [vmem:[%s8815_s8 + $0x40] sm:$0xff] }
 0x428   : > { %3157 = vmatprep.mubr.f32.mxu1 %v8984_v40  ;;  %3622 = vmatpush1.msra.mxu0 %v4943_v6  ;;  %v7794_v20 = vpop.f32.mrf.mxu1  ;;  %v7796_v37 = vpop.f32.mrf.mxu0  ;;  %v3980_v6 = vld [vmem:[%s8816_s9 + $0x50] sm:$0xff] }
 0x429   : > { %3158 = vmatmul.mubr.f32.gmra.mxu1 %v7567_v50  ;;  %3623 = vmatprep.subr.mxu0 %v4942_v17  ;;  %v4938_v50 = vld [vmem:[%s8813_s6 + $0x428] sm:$0xff] }
 0x42a   : > { %3357 = vmatprep.mubr.f32.mxu0 %v8984_v40  ;;  %3624 = vmatpush1.msra.mxu0 %v4941_v52  ;;  %v2725_v8 = vpop.f32.mrf.mxu1  ;;  %v2881_v62 = vpop.f32.mrf.mxu0  ;;  %v3825_v17 = vld [vmem:[%s8815_s8 + $0x48] sm:$0xff]  ;;  %v3978_v52 = vld [vmem:[%s8816_s9 + $0x40] sm:$0xff] }
 0x42b   : > { %3358 = vmatmul.mubr.f32.gmra.mxu0 %v7736_v30  ;;  %3625 = vmatprep.subr.mxu0 %v4940_v63  ;;  %v3823_v63 = vld [vmem:[%s8815_s8 + $0x38] sm:$0xff]  ;;  %v3975_v8 = vld [vmem:[%s8816_s9 + $0x28] sm:$0xff]  ;;  %v3820_v62 = vld [vmem:[%s8815_s8 + $0x20] sm:$0xff] }
 0x42c   : > { %3163 = vmatprep.mubr.f32.mxu1 %v8984_v40  ;;  %3626 = vmatpush1.msra.mxu0 %v4939_v44  ;;  %v3976_v44 = vld [vmem:[%s8816_s9 + $0x30] sm:$0xff] }
 0x42d   : > { %3164 = vmatmul.mubr.f32.gmra.mxu1 %v7583_v33  ;;  %3423 = vmatprep.subr.mxu1 %v4932_v26  ;;  %v4935_v33 = vld [vmem:[%s8813_s6 + $0x410] sm:$0xff]  ;;  %v3821_v26 = vld [vmem:[%s8815_s8 + $0x28] sm:$0xff] }
 0x42e   : > { %3627 = vmatprep.subr.mxu0 %v4938_v50  ;;  %3363 = vmatprep.mubr.f32.mxu0 %v8984_v40  ;;  %v3974_v50 = vld [vmem:[%s8816_s9 + $0x20] sm:$0xff] }
 0x42f   : > { %3424 = vmatpush1.msra.mxu1 %v4931_v43  ;;  %3628 = vmatpush1.msra.mxu0 %v4937_v27  ;;  %v3973_v43 = vld [vmem:[%s8816_s9 + $0x18] sm:$0xff]  ;;  %v3818_v27 = vld [vmem:[%s8815_s8 + $0x10] sm:$0xff] }
 0x430   : > { %3364 = vmatmul.mubr.f32.gmra.mxu0 %v7810_v12  ;;  %3425 = vmatprep.subr.mxu1 %v4930_v7  ;;  %v3972_v7 = vld [vmem:[%s8816_s9 + $0x10] sm:$0xff] }
 0x431   : > { %3629 = vmatprep.subr.mxu0 %v4936_v49  ;;  %3169 = vmatprep.mubr.f32.mxu1 %v8984_v40  ;;  %v3817_v49 = vld [vmem:[%s8815_s8 + $0x8] sm:$0xff] }
 0x432   : > { %3426 = vmatpush1.msra.mxu1 %v4929_v32  ;;  %3630 = vmatpush1.msra.mxu0 %v4935_v33  ;;  %v3971_v32 = vld [vmem:[%s8816_s9 + $0x8] sm:$0xff]  ;;  %v3816_v33 = vld [vmem:[%s8815_s8] sm:$0xff] }
 0x433   : > { %3170 = vmatmul.mubr.f32.gmra.mxu1 %v7599_v34  ;;  %3427 = vmatprep.subr.mxu1 %v4928_v10  ;;  %v3970_v10 = vld [vmem:[%s8816_s9] sm:$0xff] }
 0x434   : > { %3631 = vmatprep.subr.mxu0 %v4934_v22  ;;  %3428 = vmatpush1.msra.mxu1 %v4927_v11  ;;  %v3835_v22 = vld [vmem:[%s8815_s8 + $0x98] sm:$0xff] }
 0x435   : > { %3632 = vmatpush1.msra.mxu0 %v4933_v56  ;;  %3665 = vmatprep.mubr.f32.mxu0 %v8984_v40  ;;  %v3989_v11 = vld [vmem:[%s8816_s9 + $0x98] sm:$0xff]  ;;  %v3834_v56 = vld [vmem:[%s8815_s8 + $0x90] sm:$0xff] }
 0x436   : > { %3429 = vmatprep.subr.mxu1 %v4926_v23  ;;  %3666 = vmatmul.mubr.f32.vlgmr.msra.gmra.mxu0 %v7617_v29  ;;  %v3988_v23 = vld [vmem:[%s8816_s9 + $0x90] sm:$0xff] }
 0x437   : > { %3175 = vmatprep.mubr.f32.mxu1 %v8984_v40  ;;  %3430 = vmatpush1.msra.mxu1 %v4925_v41  ;;  %v3833_v41 = vld [vmem:[%s8815_s8 + $0x88] sm:$0xff] }
 0x438   : > { %3176 = vmatmul.mubr.f32.gmra.mxu1 %v7617_v29  ;;  %3431 = vmatprep.subr.mxu1 %v4924_v47  ;;  %v3987_v47 = vld [vmem:[%s8816_s9 + $0x88] sm:$0xff] }
 0x439   : > { %3432 = vmatpush1.msra.mxu1 %v4923_v15  ;;  %3671 = vmatprep.mubr.f32.mxu0 %v8984_v40  ;;  %v3832_v15 = vld [vmem:[%s8815_s8 + $0x80] sm:$0xff] }
 0x43a   : > { %3433 = vmatprep.subr.mxu1 %v4922_v1  ;;  %3672 = vmatmul.mubr.f32.gmra.mxu0 %v7638_v60  ;;  %v3986_v1 = vld [vmem:[%s8816_s9 + $0x80] sm:$0xff] }
 0x43b   : > { %3181 = vmatprep.mubr.f32.mxu1 %v8984_v40  ;;  %3434 = vmatpush1.msra.mxu1 %v4921_v61 }
 0x43c   : > { %3182 = vmatmul.mubr.f32.gmra.mxu1 %v7638_v60  ;;  %3435 = vmatprep.subr.mxu1 %v4920_v25 }
 0x43d   : > { %3436 = vmatpush1.msra.mxu1 %v4919_v39  ;;  %3677 = vmatprep.mubr.f32.mxu0 %v8984_v40 }
 0x43e   : > { %3437 = vmatprep.subr.mxu1 %v4918_v54  ;;  %3678 = vmatmul.mubr.f32.gmra.mxu0 %v7655_v4 }
 0x43f   : > { %3187 = vmatprep.mubr.f32.mxu1 %v8984_v40  ;;  %3438 = vmatpush1.msra.mxu1 %v4917_v5 }
 0x440   : > { %3188 = vmatmul.mubr.f32.gmra.mxu1 %v7655_v4  ;;  %3439 = vmatprep.subr.mxu1 %v4916_v21 }
 0x441   : > { %3440 = vmatpush1.msra.mxu1 %v4915_v48  ;;  %3683 = vmatprep.mubr.f32.mxu0 %v8984_v40 }
 0x442   : > { %3441 = vmatprep.subr.mxu1 %v4914_v0  ;;  %3684 = vmatmul.mubr.f32.gmra.mxu0 %v7676_v57  ;;  %v4132_v0 = vld [vmem:[%s8817_s10 + $0xf8] sm:$0xff] }
 0x443   : > { %3193 = vmatprep.mubr.f32.mxu1 %v8984_v40  ;;  %3442 = vmatpush1.msra.mxu1 %v4913_v16 }
 0x444   : > { %3194 = vmatmul.mubr.f32.gmra.mxu1 %v7676_v57  ;;  %3443 = vmatprep.subr.mxu1 %v4912_v24 }
 0x445   : > { %3444 = vmatpush1.msra.mxu1 %v4911_v46  ;;  %3689 = vmatprep.mubr.f32.mxu0 %v8984_v40 }
 0x446   : > { %3445 = vmatprep.subr.mxu1 %v4910_v38  ;;  %3690 = vmatmul.mubr.f32.gmra.mxu0 %v7696_v18 }
 0x447   : > { %3199 = vmatprep.mubr.f32.mxu1 %v8984_v40  ;;  %3446 = vmatpush1.msra.mxu1 %v4909_v45 }
 0x448   : > { %3200 = vmatmul.mubr.f32.gmra.mxu1 %v7696_v18  ;;  %3447 = vmatprep.subr.mxu1 %v4908_v31 }
 0x449   : > { %3448 = vmatpush1.msra.mxu1 %v4907_v13  ;;  %3695 = vmatprep.mubr.f32.mxu0 %v8984_v40  ;;  %v4164_v13 = vld [vmem:[%s8817_s10 + $0x1f8] sm:$0xff] }
 0x44a   : > { %3449 = vmatprep.subr.mxu1 %v4906_v51  ;;  %3696 = vmatmul.mubr.f32.gmra.mxu0 %v7716_v28 }
 0x44b   : > { %3205 = vmatprep.mubr.f32.mxu1 %v8984_v40  ;;  %3450 = vmatpush1.msra.mxu1 %v4905_v9 }
 0x44c   : > { %3206 = vmatmul.mubr.f32.gmra.mxu1 %v7716_v28  ;;  %3451 = vmatprep.subr.mxu1 %v4904_v53 }
 0x44d   : > { %3452 = vmatpush1.msra.mxu1 %v4903_v35  ;;  %3701 = vmatprep.mubr.f32.mxu0 %v8984_v40 }
 0x44e   : > { %3453 = vmatprep.subr.mxu1 %v4902_v3  ;;  %3702 = vmatmul.mubr.f32.gmra.mxu0 %v7736_v30 }
 0x44f   : > { %3454 = vmatpush1.msra.mxu1 %v4901_v36  ;;  %3487 = vmatprep.mubr.f32.mxu1 %v8984_v40 }
 0x450   : > { %3488 = vmatmul.mubr.f32.vlgmr.msra.gmra.mxu1 %v7599_v34  ;;  %3707 = vmatprep.mubr.f32.mxu0 %v8984_v40  ;;  %v2896_v34 = vmax.f32 %v7794_v20, %v7796_v37  ;;  %v3977_v20 = vld [vmem:[%s8816_s9 + $0x38] sm:$0xff]  ;;  %v3822_v37 = vld [vmem:[%s8815_s8 + $0x30] sm:$0xff] }
 0x451   : > { %3493 = vmatprep.mubr.f32.mxu1 %v8984_v40  ;;  %3864 = vmatprep.subr.mxu1 %v8984_v40 }
 0x452   : > { %3708 = vmatmul.mubr.f32.gmra.mxu0 %v7810_v12  ;;  %3990 = vmatprep.subr.mxu0 %v8984_v40 }
 0x453   : > { %3713 = vmatprep.mubr.f32.mxu0 %v8984_v40 }
 0x454   : > { %3494 = vmatmul.mubr.f32.gmra.mxu1 %v7617_v29  ;;  %v3831_v29 = vld [vmem:[%s8815_s8 + $0x78] sm:$0xff] }
 0x455   : > { %3499 = vmatprep.mubr.f32.mxu1 %v8984_v40  ;;  %3865 = vmatpush1.msra.mxu1 %v3831_v29 }
 0x456   : > { %3714 = vmatmul.mubr.f32.gmra.mxu0 %v2895_v19  ;;  %3866 = vmatprep.subr.mxu1 %v8984_v40 }
 0x457   : > { %3719 = vmatprep.mubr.f32.mxu0 %v8984_v40 }
 0x458   : > { %3500 = vmatmul.mubr.f32.gmra.mxu1 %v7638_v60  ;;  %v3985_v60 = vld [vmem:[%s8816_s9 + $0x78] sm:$0xff] }
 0x459   : > { %3505 = vmatprep.mubr.f32.mxu1 %v8984_v40  ;;  %3991 = vmatpush1.msra.mxu0 %v3985_v60 }
 0x45a   : > { %3720 = vmatmul.mubr.f32.gmra.mxu0 %v2896_v34  ;;  %3992 = vmatprep.subr.mxu0 %v8984_v40 }
 0x45c   : > { %3506 = vmatmul.mubr.f32.gmra.mxu1 %v7655_v4  ;;  %v3830_v4 = vld [vmem:[%s8815_s8 + $0x70] sm:$0xff] }
 0x45d   : > { %3511 = vmatprep.mubr.f32.mxu1 %v8984_v40  ;;  %3867 = vmatpush1.msra.mxu1 %v3830_v4 }
 0x45e   : > { %3868 = vmatprep.subr.mxu1 %v8984_v40 }
 0x460   : > { %3512 = vmatmul.mubr.f32.gmra.mxu1 %v7676_v57  ;;  %v3984_v57 = vld [vmem:[%s8816_s9 + $0x70] sm:$0xff] }
 0x461   : > { %3517 = vmatprep.mubr.f32.mxu1 %v8984_v40  ;;  %3993 = vmatpush1.msra.mxu0 %v3984_v57 }
 0x462   : > { %3994 = vmatprep.subr.mxu0 %v8984_v40 }
 0x464   : > { %3518 = vmatmul.mubr.f32.gmra.mxu1 %v7696_v18  ;;  %v3829_v18 = vld [vmem:[%s8815_s8 + $0x68] sm:$0xff] }
 0x465   : > { %3523 = vmatprep.mubr.f32.mxu1 %v8984_v40  ;;  %3869 = vmatpush1.msra.mxu1 %v3829_v18 }
 0x466   : > { %3870 = vmatprep.subr.mxu1 %v8984_v40 }
 0x468   : > { %3524 = vmatmul.mubr.f32.gmra.mxu1 %v7716_v28  ;;  %v3983_v28 = vld [vmem:[%s8816_s9 + $0x68] sm:$0xff] }
 0x469   : > { %3529 = vmatprep.mubr.f32.mxu1 %v8984_v40  ;;  %3995 = vmatpush1.msra.mxu0 %v3983_v28 }
 0x46a   : > { %3996 = vmatprep.subr.mxu0 %v8984_v40 }
 0x46b   : > { %3997 = vmatpush1.msra.mxu0 %v3982_v14 }
 0x46c   : > { %3530 = vmatmul.mubr.f32.gmra.mxu1 %v7736_v30  ;;  %v3828_v30 = vld [vmem:[%s8815_s8 + $0x60] sm:$0xff]  ;;  %3998 = vmatprep.subr.mxu0 %v8984_v40 }
 0x46d   : > { %3535 = vmatprep.mubr.f32.mxu1 %v8984_v40  ;;  %3871 = vmatpush1.msra.mxu1 %v3828_v30 }
 0x46e   : > { %3872 = vmatprep.subr.mxu1 %v8984_v40  ;;  %3999 = vmatpush1.msra.mxu0 %v3981_v59 }
 0x46f   : > { %3873 = vmatpush1.msra.mxu1 %v3827_v42  ;;  %4000 = vmatprep.subr.mxu0 %v8984_v40 }
 0x470   : > { %3536 = vmatmul.mubr.f32.gmra.mxu1 %v7810_v12  ;;  %3874 = vmatprep.subr.mxu1 %v8984_v40  ;;  %v3819_v12 = vld [vmem:[%s8815_s8 + $0x18] sm:$0xff] }
 0x471   : > { %3541 = vmatprep.mubr.f32.mxu1 %v8984_v40  ;;  %3875 = vmatpush1.msra.mxu1 %v3826_v58 }
 0x472   : > { %4001 = vmatpush1.msra.mxu0 %v3980_v6  ;;  %3876 = vmatprep.subr.mxu1 %v8984_v40 }
 0x473   : > { %4002 = vmatprep.subr.mxu0 %v8984_v40  ;;  %3877 = vmatpush1.msra.mxu1 %v3825_v17 }
 0x474   : > { %3542 = vmatmul.mubr.f32.gmra.mxu1 %v2895_v19  ;;  %4003 = vmatpush1.msra.mxu0 %v3979_v2 }
 0x475   : > { %3878 = vmatprep.subr.mxu1 %v8984_v40  ;;  %4004 = vmatprep.subr.mxu0 %v8984_v40 }
 0x476   : > { %3879 = vmatpush1.msra.mxu1 %v3824_v55  ;;  %4005 = vmatpush1.msra.mxu0 %v3978_v52 }
 0x477   : > { %3880 = vmatprep.subr.mxu1 %v8984_v40  ;;  %4006 = vmatprep.subr.mxu0 %v8984_v40 }
 0x478   : > { %3881 = vmatpush1.msra.mxu1 %v3823_v63  ;;  %4007 = vmatpush1.msra.mxu0 %v3977_v20 }
 0x479   : > { %3882 = vmatprep.subr.mxu1 %v8984_v40  ;;  %4008 = vmatprep.subr.mxu0 %v8984_v40 }
 0x47a   : > { %3883 = vmatpush1.msra.mxu1 %v3822_v37  ;;  %4009 = vmatpush1.msra.mxu0 %v3976_v44 }
 0x47b   : > { %3884 = vmatprep.subr.mxu1 %v8984_v40  ;;  %4010 = vmatprep.subr.mxu0 %v8984_v40 }
 0x47c   : > { %3885 = vmatpush1.msra.mxu1 %v3821_v26  ;;  %4011 = vmatpush1.msra.mxu0 %v3975_v8 }
 0x47d   : > { %3886 = vmatprep.subr.mxu1 %v8984_v40  ;;  %4012 = vmatprep.subr.mxu0 %v8984_v40 }
 0x47e   : > { %3887 = vmatpush1.msra.mxu1 %v3820_v62  ;;  %4013 = vmatpush1.msra.mxu0 %v3974_v50 }
 0x47f   : > { %3888 = vmatprep.subr.mxu1 %v8984_v40  ;;  %4014 = vmatprep.subr.mxu0 %v8984_v40 }
 0x480   : > { %3889 = vmatpush1.msra.mxu1 %v3819_v12  ;;  %4015 = vmatpush1.msra.mxu0 %v3973_v43 }
 0x481   : > { %3890 = vmatprep.subr.mxu1 %v8984_v40  ;;  %4016 = vmatprep.subr.mxu0 %v8984_v40 }
 0x482   : > { %3891 = vmatpush1.msra.mxu1 %v3818_v27  ;;  %4017 = vmatpush1.msra.mxu0 %v3972_v7 }
 0x483   : > { %3892 = vmatprep.subr.mxu1 %v8984_v40  ;;  %4018 = vmatprep.subr.mxu0 %v8984_v40 }
 0x484   : > { %3893 = vmatpush1.msra.mxu1 %v3817_v49  ;;  %4019 = vmatpush1.msra.mxu0 %v3971_v32 }
 0x485   : > { %3894 = vmatprep.subr.mxu1 %v8984_v40  ;;  %4020 = vmatprep.subr.mxu0 %v8984_v40 }
 0x486   : > { %3895 = vmatpush1.msra.mxu1 %v3816_v33  ;;  %4021 = vmatpush1.msra.mxu0 %v3970_v10 }
 0x487   : > { %3920 = vmatprep.subr.mxu1 %v8984_v40  ;;  %4046 = vmatprep.subr.mxu0 %v8984_v40 }
 0x488   : > { %3921 = vmatpush2.msra.mxu1 %v3835_v22  ;;  %4047 = vmatpush2.msra.mxu0 %v3989_v11 }
 0x489   : > { %3922 = vmatprep.subr.mxu1 %v8984_v40  ;;  %4048 = vmatprep.subr.mxu0 %v8984_v40 }
 0x48a   : > { %3923 = vmatpush2.msra.mxu1 %v3834_v56  ;;  %4049 = vmatpush2.msra.mxu0 %v3988_v23 }
 0x48b   : > { %3924 = vmatprep.subr.mxu1 %v8984_v40  ;;  %4050 = vmatprep.subr.mxu0 %v8984_v40 }
 0x48c   : > { %3925 = vmatpush2.msra.mxu1 %v3833_v41  ;;  %4051 = vmatpush2.msra.mxu0 %v3987_v47 }
 0x48d   : > { %3926 = vmatprep.subr.mxu1 %v8984_v40  ;;  %4052 = vmatprep.subr.mxu0 %v8984_v40 }
 0x48e   : > { %3927 = vmatpush2.msra.mxu1 %v3832_v15  ;;  %4053 = vmatpush2.msra.mxu0 %v3986_v1 }
 0x48f   : > { %4991 = vmatprep.subr.mxu1 %v4132_v0  ;;  %5026 = vmatprep.subr.mxu0 %v4164_v13 }
 0x4bb   : > { %v8139_v61 = vpop.f32.mrf.mxu1 }
 0x4bd   : > { %v8141_v25 = vpop.f32.mrf.mxu1 }
 0x4bf   : > { %v8143_v39 = vpop.f32.mrf.mxu1 }
 0x4c1   : > { %v8145_v54 = vpop.f32.mrf.mxu1  ;;  %v8147_v5 = vpop.f32.mrf.mxu0 }
 0x4c3   : > { %v8149_v21 = vpop.f32.mrf.mxu1  ;;  %v8151_v48 = vpop.f32.mrf.mxu0 }
 0x4c5   : > { %v8156_v16 = vpop.f32.mrf.mxu1  ;;  %v8158_v24 = vpop.f32.mrf.mxu0 }
 0x4c7   : > { %v8160_v46 = vpop.f32.mrf.mxu1  ;;  %v8162_v38 = vpop.f32.mrf.mxu0 }
 0x4c9   : > { %v8164_v45 = vpop.f32.mrf.mxu1  ;;  %v8166_v31 = vpop.f32.mrf.mxu0 }
 0x4cb   : > { %v8171_v51 = vpop.f32.mrf.mxu1  ;;  %v8173_v9 = vpop.f32.mrf.mxu0 }
 0x4cd   : > { %v8175_v53 = vpop.f32.mrf.mxu1 }
 0x4cf   : > { %v8177_v35 = vpop.f32.mrf.mxu1  ;;  %v8179_v3 = vpop.f32.mrf.mxu0 }
 0x4d1   : > { %v8181_v36 = vpop.f32.mrf.mxu1  ;;  %v8183_v19 = vpop.f32.mrf.mxu0 }
 0x4d3   : > { %v8185_v34 = vpop.f32.mrf.mxu1 }
 0x4d5   : > { %v8187_v29 = vpop.f32.mrf.mxu1 }
 0x4d6   : > { %v8189_v60 = vpop.f32.mrf.mxu0 }
 0x4d7   : > { %v8191_v4 = vpop.f32.mrf.mxu1 }
 0x4d8   : > { %v8193_v57 = vpop.f32.mrf.mxu0 }
 0x4d9   : > { %v8195_v18 = vpop.f32.mrf.mxu1 }
 0x4da   : > { %9025 = vst [vmem:[#allocation53_spill] sm:$0xff] %v8195_v18 }
 0x4db   : > { %v8197_v28 = vpop.f32.mrf.mxu1 }
 0x4dc   : > { %9026 = vst [vmem:[#allocation11_spill] sm:$0xff] %v8197_v28  ;;  %v8199_v30 = vpop.f32.mrf.mxu0 }
 0x4dd   : > { %v8201_v14 = vpop.f32.mrf.mxu1 }
 0x4de   : > { %9027 = vst [vmem:[#allocation12_spill] sm:$0xff] %v8201_v14  ;;  %v8203_v42 = vpop.f32.mrf.mxu0 }
 0x4df   : > { %v8205_v59 = vpop.f32.mrf.mxu1 }
 0x4e0   : > { %9028 = vst [vmem:[#allocation54_spill] sm:$0xff] %v8205_v59 }
 0x4e1   : > { %v8207_v58 = vpop.f32.mrf.mxu1 }
 0x4e2   : > { %9029 = vst [vmem:[#allocation13_spill] sm:$0xff] %v8207_v58  ;;  %v8209_v6 = vpop.f32.mrf.mxu0 }
 0x4e3   : > { %9030 = vst [vmem:[#allocation14_spill] sm:$0xff] %v8209_v6 }
 0x4e4   : > { %v8211_v17 = vpop.f32.mrf.mxu0 }
 0x4e5   : > { %9031 = vst [vmem:[#allocation55_spill] sm:$0xff] %v8211_v17  ;;  %v3153_v2 = vpop.f32.mrf.mxu1  ;;  %v9043_v17 = vld [vmem:[#allocation91_spill] sm:$0xff] }
 0x4e6   : > { %v9045_v18 = vsub.s32 1, %v9043_v17 }
 0x4e7   : > { %v3155_v55 = vpop.f32.mrf.mxu1  ;;  %v8213_v52 = vpop.f32.mrf.mxu0 }
 0x4e8   : > { %9032 = vst [vmem:[#allocation15_spill] sm:$0xff] %v8213_v52  ;;  %v3156_v59 = vadd.f32 %v3155_v55, %v8141_v25  ;;  %v9044_v25 = vsub.s32 0, %v9043_v17 }
 0x4e9   : > { %v3159_v63 = vpop.f32.mrf.mxu1  ;;  %v8215_v20 = vpop.f32.mrf.mxu0 }
 0x4ea   : > { %9033 = vst [vmem:[#allocation16_spill] sm:$0xff] %v8215_v20  ;;  %v3160_v14 = vadd.f32 %v3159_v63, %v8143_v39 }
 0x4eb   : > { %v3161_v37 = vpop.f32.mrf.mxu1  ;;  %v8217_v44 = vpop.f32.mrf.mxu0 }
 0x4ec   : > { %9034 = vst [vmem:[#allocation57_spill] sm:$0xff] %v8217_v44 }
 0x4ed   : > { %v3165_v26 = vpop.f32.mrf.mxu1  ;;  %v8219_v8 = vpop.f32.mrf.mxu0 }
 0x4ee   : > { %9035 = vst [vmem:[#allocation17_spill] sm:$0xff] %v8219_v8  ;;  %v3154_v8 = vadd.f32 %v3153_v2, %v8139_v61  ;;  %v3162_v61 = vadd.f32 %v3161_v37, %v8145_v54  ;;  %v3166_v39 = vadd.f32 %v3165_v26, %v8149_v21 }
 0x4ef   : > { %v3167_v62 = vpop.f32.mrf.mxu1 }
 0x4f0   : > { %v8221_v50 = vpop.f32.mrf.mxu0  ;;  %v3370_v52 = vadd.f32 %v8147_v5, %v3154_v8  ;;  %v3372_v8 = vadd.f32 %v8158_v24, %v3160_v14  ;;  %v3373_v37 = vadd.f32 %v8162_v38, %v3162_v61  ;;  %v3374_v24 = vadd.f32 %v8166_v31, %v3166_v39 }
 0x4f1   : > { %9036 = vst [vmem:[#allocation18_spill] sm:$0xff] %v8221_v50 }
 0x4f2   : > { %v8223_v12 = vpop.f32.mrf.mxu0 }
 0x4f3   : > { %9037 = vst [vmem:[#allocation56_spill] sm:$0xff] %v8223_v12  ;;  %v3171_v43 = vpop.f32.mrf.mxu1 }
 0x4f4   : > { %v3172_v14 = vadd.f32 %v3171_v43, %v8160_v46 }
 0x4f5   : > { %v3173_v27 = vpop.f32.mrf.mxu1 }
 0x4f6   : > { %v3667_v7 = vpop.f32.mrf.mxu0  ;;  %v3174_v17 = vadd.f32 %v3173_v27, %v8164_v45  ;;  %v3376_v39 = vadd.f32 %v8179_v3, %v3172_v14 }
 0x4f8   : > { %v3177_v49 = vpop.f32.mrf.mxu1  ;;  %v3669_v32 = vpop.f32.mrf.mxu0 }
 0x4fa   : > { %v3179_v33 = vpop.f32.mrf.mxu1  ;;  %v3673_v10 = vpop.f32.mrf.mxu0 }
 0x4fb   : > { %v3180_v27 = vadd.f32 %v3179_v33, %v8175_v53 }
 0x4fc   : > { %v8225_v22 = vpop.f32.mrf.mxu1  ;;  %v3675_v11 = vpop.f32.mrf.mxu0 }
 0x4fe   : > { %v8227_v56 = vpop.f32.mrf.mxu1  ;;  %v3679_v23 = vpop.f32.mrf.mxu0 }
 0x500   : > { %v8229_v41 = vpop.f32.mrf.mxu1  ;;  %v8231_v47 = vpop.f32.mrf.mxu0 }
 0x502   : > { %v8233_v15 = vpop.f32.mrf.mxu1  ;;  %v8235_v1 = vpop.f32.mrf.mxu0 }
 0x504   : > { %v8237_v0 = vpop.f32.mrf.mxu1  ;;  %v8241_v40 = vpop.f32.mrf.mxu0 }
 0x506   : > { %v8239_v13 = vpop.f32.mrf.mxu1  ;;  %v8248_v58 = vpop.f32.mrf.mxu0 }
 0x507   : > { %9038 = vst [vmem:[#allocation59_spill] sm:$0xff] %v8239_v13 }
 0x508   : > { %v8243_v12 = vpop.f32.mrf.mxu1  ;;  %v8260_v28 = vpop.f32.mrf.mxu0 }
 0x509   : > { %9039 = vst [vmem:[#allocation19_spill] sm:$0xff] %v8243_v12  ;;  %v3746_v12 = vld [vmem:[%s8814_s7] sm:$0x3] }
 0x50a   : > { %v8245_v50 = vpop.f32.mrf.mxu1  ;;  %v8266_v55 = vrot.slane %v3746_v12, %v9044_v25  ;;  %v8270_v13 = vpop.f32.mrf.mxu0  ;;  %v8274_v6 = vrot.slane %v3746_v12, %v9045_v18 }
 0x50b   : > { %9040 = vst [vmem:[#allocation20_spill] sm:$0xff] %v8245_v50 }
 0x50c   : > { %v8250_v44 = vpop.f32.mrf.mxu1  ;;  %v8282_v18 = vpop.f32.mrf.mxu0 }
 0x50d   : > { %9041 = vst [vmem:[#allocation58_spill] sm:$0xff] %v8250_v44  ;;  %v3371_v44 = vadd.f32 %v8151_v48, %v3156_v59  ;;  %v3168_v48 = vadd.f32 %v3167_v62, %v8156_v16 }
 0x50e   : > { %v8253_v20 = vpop.f32.mrf.mxu1 }
 0x50f   : > { %9042 = vst [vmem:[#allocation61_spill] sm:$0xff] %v8253_v20 }
 0x510   : > { %v3489_v50 = vpop.f32.mrf.mxu1 }
 0x511   : > { %v3548_v2 = vadd.f32 %v3489_v50, %v3370_v52 }
 0x512   : > { %v3491_v20 = vpop.f32.mrf.mxu1 }
 0x513   : > { %v3726_v5 = vadd.f32 %v3667_v7, %v3548_v2  ;;  %v3549_v63 = vadd.f32 %v3491_v20, %v3371_v44  ;;  %v3375_v7 = vadd.f32 %v8173_v9, %v3168_v48  ;;  %v8290_v2 = vpop.f32.mrf.mxu0 }
 0x514   : > { %v3495_v54 = vpop.f32.mrf.mxu1 }
 0x515   : > { %v3727_v59 = vadd.f32 %v3669_v32, %v3549_v63  ;;  %v3550_v52 = vadd.f32 %v3495_v54, %v3372_v8  ;;  %v3758_v50 = vadd.f32 %v8266_v55, %v3726_v5  ;;  %v3178_v32 = vadd.f32 %v3177_v49, %v8171_v51 }
 0x516   : > { %v3497_v21 = vpop.f32.mrf.mxu1  ;;  %v3377_v5 = vadd.f32 %v8183_v19, %v3174_v17  ;;  %v3186_v19 = vadd.f32 %v8227_v56, %v8181_v36  ;;  %v4131_v36 = vld [vmem:[%s8817_s10 + $0xf0] sm:$0xff]  ;;  %v3190_v56 = vadd.f32 %v8229_v41, %v8185_v34 }
 0x517   : > { %v3728_v26 = vadd.f32 %v3673_v10, %v3550_v52  ;;  %v3551_v20 = vadd.f32 %v3497_v21, %v3373_v37  ;;  %v3759_v44 = vadd.f32 %v8274_v6, %v3727_v59  ;;  %v3778_v10 = vmax.f32 %v3758_v50, 0.0  ;;  %v8302_v52 = vpop.f32.mrf.mxu0 }
 0x518   : > { %v3501_v16 = vpop.f32.mrf.mxu1  ;;  %v3378_v53 = vadd.f32 %v8189_v60, %v3178_v32  ;;  %v4116_v60 = vld [vmem:[%s8817_s10 + $0x78] sm:$0xff]  ;;  %v3381_v34 = vadd.f32 %v8203_v42, %v3186_v19  ;;  %v4130_v42 = vld [vmem:[%s8817_s10 + $0xe8] sm:$0xff]  ;;  %v4147_v32 = vld [vmem:[%s8817_s10 + $0x170] sm:$0xff] }
 0x519   : > { %v3760_v62 = vadd.f32 %v8266_v55, %v3728_v26  ;;  %v3729_v12 = vadd.f32 %v3675_v11, %v3551_v20  ;;  %v3552_v38 = vadd.f32 %v3501_v16, %v3374_v24  ;;  %v3779_v25 = vmax.f32 %v3759_v44, 0.0  ;;  %v8327_v41 = vpop.f32.mrf.mxu0 }
 0x51a   : > { %v3503_v61 = vpop.f32.mrf.mxu1  ;;  %v3192_v16 = vadd.f32 %v8233_v15, %v8187_v29 }
 0x51b   : > { %v3780_v31 = vmax.f32 %v3760_v62, 0.0  ;;  %v3761_v46 = vadd.f32 %v8274_v6, %v3729_v12  ;;  %v3730_v43 = vadd.f32 %v3679_v23, %v3552_v38  ;;  %v3553_v45 = vadd.f32 %v3503_v61, %v3375_v7 }
 0x51c   : > { %v3507_v11 = vpop.f32.mrf.mxu1  ;;  %v3184_v23 = vadd.f32 %v8225_v22, %v8177_v35  ;;  %v3379_v35 = vadd.f32 %v8193_v57, %v3180_v27  ;;  %v4148_v57 = vld [vmem:[%s8817_s10 + $0x178] sm:$0xff] }
 0x51d   : > { %v3798_v9 = vmax.f32 %v3778_v10, %v3780_v31  ;;  %v3781_v63 = vmax.f32 %v3761_v46, 0.0  ;;  %v3762_v51 = vadd.f32 %v8266_v55, %v3730_v43  ;;  %v3731_v49 = vadd.f32 %v8231_v47, %v3553_v45 }
 0x51e   : > { %v3554_v8 = vadd.f32 %v3507_v11, %v3376_v39  ;;  %v3509_v54 = vpop.f32.mrf.mxu1  ;;  %v3196_v10 = vadd.f32 %v8237_v0, %v8191_v4  ;;  %v9047_v39 = vld [vmem:[#allocation53_spill] sm:$0xff]  ;;  %v9048_v11 = vld [vmem:[#allocation59_spill] sm:$0xff] }
 0x51f   : > { %v3799_v33 = vmax.f32 %v3779_v25, %v3781_v63  ;;  %v3782_v48 = vmax.f32 %v3762_v51, 0.0  ;;  %v3763_v3 = vadd.f32 %v8274_v6, %v3731_v49  ;;  %v3555_v59 = vadd.f32 %v3509_v54, %v3377_v5  ;;  %v9049_v4 = vld [vmem:[#allocation55_spill] sm:$0xff]  ;;  %v3711_v51 = vpop.f32.mrf.mxu0  ;;  %v4114_v49 = vld [vmem:[%s8817_s10 + $0x68] sm:$0xff] }
 0x520   : > { %v3732_v47 = vadd.f32 %v8235_v1, %v3554_v8  ;;  %v3513_v37 = vpop.f32.mrf.mxu1  ;;  %v3198_v5 = vadd.f32 %v9048_v11, %v9047_v39  ;;  %v3383_v0 = vadd.f32 %v9049_v4, %v3192_v16  ;;  %v9056_v16 = vld [vmem:[#allocation54_spill] sm:$0xff] }
 0x521   : > { %v3800_v22 = vmax.f32 %v3780_v31, %v3782_v48  ;;  %v3783_v50 = vmax.f32 %v3763_v3, 0.0  ;;  %v3733_v21 = vadd.f32 %v8241_v40, %v3555_v59  ;;  %v3556_v26 = vadd.f32 %v3513_v37, %v3378_v53  ;;  %4965 = vmatprep.mubr.msk.f32.mxu1 %vm3836_vm2, %v3799_v33  ;;  %4974 = vmatprep.mubr.msk.f32.mxu0 %vm3836_vm2, %v3799_v33  ;;  %v4129_v53 = vld [vmem:[%s8817_s10 + $0xe0] sm:$0xff]  ;;  %v9050_v33 = vld [vmem:[#allocation11_spill] sm:$0xff] }
 0x522   : > { %v3764_v1 = vadd.f32 %v8266_v55, %v3732_v47  ;;  %v3515_v20 = vpop.f32.mrf.mxu1  ;;  %3929 = vmatmul.mubr.f32.vlgmr.msra.gmra.mxu1 %v3798_v9  ;;  %4055 = vmatmul.mubr.f32.vlgmr.msra.gmra.mxu0 %v3798_v9  ;;  %v3380_v40 = vadd.f32 %v8199_v30, %v3184_v23  ;;  %v4115_v30 = vld [vmem:[%s8817_s10 + $0x70] sm:$0xff] }
 0x523   : > { %v3801_v24 = vmax.f32 %v3781_v63, %v3783_v50  ;;  %v3765_v14 = vadd.f32 %v8274_v6, %v3733_v21  ;;  %v3734_v17 = vadd.f32 %v8248_v58, %v3556_v26  ;;  %v3557_v44 = vadd.f32 %v3515_v20, %v3379_v35  ;;  %4992 = vmatpush3.msra.mxu1 %v4116_v60  ;;  %v4163_v58 = vld [vmem:[%s8817_s10 + $0x1f0] sm:$0xff]  ;;  %v3715_v35 = vpop.f32.mrf.mxu0  ;;  %v9053_v26 = vld [vmem:[#allocation12_spill] sm:$0xff] }
 0x524   : > { %v3784_v62 = vmax.f32 %v3764_v1, 0.0  ;;  %v3519_v12 = vpop.f32.mrf.mxu1  ;;  %4993 = vmatprep.subr.mxu1 %v4131_v36  ;;  %5027 = vmatpush3.msra.mxu0 %v4148_v57  ;;  %v9052_v47 = vld [vmem:[#allocation15_spill] sm:$0xff]  ;;  %v9054_v36 = vld [vmem:[#allocation20_spill] sm:$0xff] }
 0x525   : > { %v3785_v38 = vmax.f32 %v3765_v14, 0.0  ;;  %v3766_v7 = vadd.f32 %v8266_v55, %v3734_v17  ;;  %v3735_v29 = vadd.f32 %v8260_v28, %v3557_v44  ;;  %v3558_v15 = vadd.f32 %v3519_v12, %v3380_v40  ;;  %4966 = vmatprep.mubr.msk.f32.mxu1 %vm3836_vm2, %v3801_v24  ;;  %4975 = vmatprep.mubr.msk.f32.mxu0 %vm3836_vm2, %v3801_v24  ;;  %v9046_v28 = vld [vmem:[#allocation14_spill] sm:$0xff]  ;;  %v9055_v20 = vld [vmem:[#allocation16_spill] sm:$0xff]  ;;  %v4113_v40 = vld [vmem:[%s8817_s10 + $0x60] sm:$0xff] }
 0x526   : > { %v3802_v61 = vmax.f32 %v3782_v48, %v3784_v62  ;;  %v3521_v31 = vpop.f32.mrf.mxu1  ;;  %3934 = vmatmul.mubr.f32.gmra.mxu1 %v3800_v22  ;;  %4060 = vmatmul.mubr.f32.gmra.mxu0 %v3800_v22  ;;  %v3382_v46 = vadd.f32 %v9046_v28, %v3190_v56  ;;  %v9051_v48 = vld [vmem:[#allocation19_spill] sm:$0xff]  ;;  %v3384_v37 = vadd.f32 %v9052_v47, %v3196_v10  ;;  %v4128_v44 = vld [vmem:[%s8817_s10 + $0xd8] sm:$0xff]  ;;  %v9059_v10 = vld [vmem:[#allocation13_spill] sm:$0xff] }
 0x527   : > { %v3803_v43 = vmax.f32 %v3783_v50, %v3785_v38  ;;  %v3786_v45 = vmax.f32 %v3766_v7, 0.0  ;;  %v3767_v27 = vadd.f32 %v8274_v6, %v3735_v29  ;;  %v3736_v25 = vadd.f32 %v8270_v13, %v3558_v15  ;;  %4994 = vmatpush3.msra.mxu1 %v4115_v30  ;;  %5028 = vmatprep.subr.mxu0 %v4163_v58  ;;  %v9058_v58 = vld [vmem:[#allocation57_spill] sm:$0xff]  ;;  %v3717_v7 = vpop.f32.mrf.mxu0 }
 0x528   : > { %v3559_v9 = vadd.f32 %v3521_v31, %v3381_v34  ;;  %v3525_v63 = vpop.f32.mrf.mxu1  ;;  %4995 = vmatprep.subr.mxu1 %v4130_v42  ;;  %5029 = vmatpush3.msra.mxu0 %v4147_v32  ;;  %v3202_v3 = vadd.f32 %v9051_v48, %v9050_v33  ;;  %v3204_v57 = vadd.f32 %v9054_v36, %v9053_v26  ;;  %v9063_v33 = vld [vmem:[#allocation56_spill] sm:$0xff] }
 0x529   : > { %v3804_v23 = vmax.f32 %v3784_v62, %v3786_v45  ;;  %v3787_v8 = vmax.f32 %v3767_v27, 0.0  ;;  %v3768_v13 = vadd.f32 %v8266_v55, %v3736_v25  ;;  %v3560_v54 = vadd.f32 %v3525_v63, %v3382_v46  ;;  %4967 = vmatprep.mubr.msk.f32.mxu1 %vm3836_vm2, %v3803_v43  ;;  %4976 = vmatprep.mubr.msk.f32.mxu0 %vm3836_vm2, %v3803_v43  ;;  %v9057_v62 = vld [vmem:[#allocation58_spill] sm:$0xff]  ;;  %v9061_v43 = vld [vmem:[#allocation17_spill] sm:$0xff] }
 0x52a   : > { %v3737_v59 = vadd.f32 %v8282_v18, %v3559_v9  ;;  %v3527_v19 = vpop.f32.mrf.mxu1  ;;  %3938 = vmatmul.mubr.f32.gmra.mxu1 %v3802_v61  ;;  %4064 = vmatmul.mubr.f32.gmra.mxu0 %v3802_v61  ;;  %v3385_v18 = vadd.f32 %v9055_v20, %v3198_v5  ;;  %v3208_v12 = vadd.f32 %v9057_v62, %v9056_v16  ;;  %v9060_v61 = vld [vmem:[#allocation61_spill] sm:$0xff]  ;;  %v9062_v63 = vld [vmem:[#allocation18_spill] sm:$0xff]  ;;  %v4124_v62 = vld [vmem:[%s8817_s10 + $0xb8] sm:$0xff] }
 0x52b   : > { %v3805_v60 = vmax.f32 %v3785_v38, %v3787_v8  ;;  %v3788_v22 = vmax.f32 %v3768_v13, 0.0  ;;  %v3738_v50 = vadd.f32 %v8290_v2, %v3560_v54  ;;  %v3561_v21 = vadd.f32 %v3527_v19, %v3383_v0  ;;  %4996 = vmatpush3.msra.mxu1 %v4114_v49  ;;  %v3721_v0 = vpop.f32.mrf.mxu0  ;;  %v4111_v54 = vld [vmem:[%s8817_s10 + $0x50] sm:$0xff] }
 0x52c   : > { %v3769_v56 = vadd.f32 %v8274_v6, %v3737_v59  ;;  %v3531_v1 = vpop.f32.mrf.mxu1  ;;  %4997 = vmatprep.subr.mxu1 %v4129_v53  ;;  %v3386_v38 = vadd.f32 %v9058_v58, %v3202_v3  ;;  %v3210_v31 = vadd.f32 %v9060_v61, %v9059_v10  ;;  %v3388_v4 = vadd.f32 %v9062_v63, %v3208_v12  ;;  %v4122_v58 = vld [vmem:[%s8817_s10 + $0xa8] sm:$0xff]  ;;  %v4145_v10 = vld [vmem:[%s8817_s10 + $0x160] sm:$0xff]  ;;  %v4104_v61 = vld [vmem:[%s8817_s10 + $0x18] sm:$0xff] }
 0x52d   : > { %v3806_v24 = vmax.f32 %v3786_v45, %v3788_v22  ;;  %v3770_v14 = vadd.f32 %v8266_v55, %v3738_v50  ;;  %v3739_v2 = vadd.f32 %v8302_v52, %v3561_v21  ;;  %v3562_v17 = vadd.f32 %v3531_v1, %v3384_v37  ;;  %4968 = vmatprep.mubr.msk.f32.mxu1 %vm3836_vm2, %v3805_v60  ;;  %v4112_v52 = vld [vmem:[%s8817_s10 + $0x58] sm:$0xff]  ;;  %v4126_v37 = vld [vmem:[%s8817_s10 + $0xc8] sm:$0xff]  ;;  %v4157_v63 = vld [vmem:[%s8817_s10 + $0x1c0] sm:$0xff] }
 0x52e   : > { %v3789_v34 = vmax.f32 %v3769_v56, 0.0  ;;  %4977 = vmatprep.mubr.msk.f32.mxu0 %vm3836_vm2, %v3805_v60  ;;  %v3533_v30 = vpop.f32.mrf.mxu1  ;;  %3943 = vmatmul.mubr.f32.gmra.mxu1 %v3804_v23  ;;  %v3387_v45 = vadd.f32 %v9061_v43, %v3204_v57  ;;  %v3389_v48 = vadd.f32 %v9063_v33, %v3210_v31  ;;  %v4110_v50 = vld [vmem:[%s8817_s10 + $0x48] sm:$0xff]  ;;  %v4160_v31 = vld [vmem:[%s8817_s10 + $0x1d8] sm:$0xff]  ;;  %v4103_v43 = vld [vmem:[%s8817_s10 + $0x10] sm:$0xff] }
 0x52f   : > { %v3790_v29 = vmax.f32 %v3770_v14, 0.0  ;;  %v3771_v15 = vadd.f32 %v8274_v6, %v3739_v2  ;;  %v3563_v42 = vadd.f32 %v3533_v30, %v3385_v18  ;;  %v3740_v32 = vadd.f32 %v8327_v41, %v3562_v17  ;;  %4069 = vmatmul.mubr.f32.gmra.mxu0 %v3804_v23  ;;  %4998 = vmatpush3.msra.mxu1 %v4113_v40  ;;  %v4127_v41 = vld [vmem:[%s8817_s10 + $0xd0] sm:$0xff]  ;;  %v4137_v33 = vld [vmem:[%s8817_s10 + $0x120] sm:$0xff] }
 0x530   : > { %v3807_v28 = vmax.f32 %v3787_v8, %v3789_v34  ;;  %v3537_v46 = vpop.f32.mrf.mxu1  ;;  %4999 = vmatprep.subr.mxu1 %v4128_v44  ;;  %v4107_v30 = vld [vmem:[%s8817_s10 + $0x30] sm:$0xff] }
 0x531   : > { %v3808_v27 = vmax.f32 %v3788_v22, %v3790_v29  ;;  %v3791_v25 = vmax.f32 %v3771_v15, 0.0  ;;  %v3772_v39 = vadd.f32 %v8266_v55, %v3740_v32  ;;  %v3564_v11 = vadd.f32 %v3537_v46, %v3386_v38  ;;  %5000 = vmatpush3.msra.mxu1 %v4112_v52  ;;  %v3723_v22 = vpop.f32.mrf.mxu0  ;;  %v4106_v38 = vld [vmem:[%s8817_s10 + $0x28] sm:$0xff]  ;;  %v4121_v52 = vld [vmem:[%s8817_s10 + $0xa0] sm:$0xff]  ;;  %v4120_v32 = vld [vmem:[%s8817_s10 + $0x98] sm:$0xff] }
 0x532   : > { %v3741_v5 = vadd.f32 %v3711_v51, %v3563_v42  ;;  %4969 = vmatprep.mubr.msk.f32.mxu1 %vm3836_vm2, %v3807_v28  ;;  %4978 = vmatprep.mubr.msk.f32.mxu0 %vm3836_vm2, %v3807_v28  ;;  %v3539_v9 = vpop.f32.mrf.mxu1  ;;  %v4105_v15 = vld [vmem:[%s8817_s10 + $0x20] sm:$0xff]  ;;  %v4119_v28 = vld [vmem:[%s8817_s10 + $0x90] sm:$0xff]  ;;  %v4144_v46 = vld [vmem:[%s8817_s10 + $0x158] sm:$0xff] }
 0x533   : > { %v3809_v49 = vmax.f32 %v3789_v34, %v3791_v25  ;;  %v3792_v23 = vmax.f32 %v3772_v39, 0.0  ;;  %v3565_v8 = vadd.f32 %v3539_v9, %v3387_v45  ;;  %v3742_v13 = vadd.f32 %v3715_v35, %v3564_v11  ;;  %3947 = vmatmul.mubr.f32.gmra.mxu1 %v3806_v24  ;;  %4073 = vmatmul.mubr.f32.gmra.mxu0 %v3806_v24  ;;  %v4125_v24 = vld [vmem:[%s8817_s10 + $0xc0] sm:$0xff]  ;;  %v4123_v34 = vld [vmem:[%s8817_s10 + $0xb0] sm:$0xff]  ;;  %v4102_v39 = vld [vmem:[%s8817_s10 + $0x8] sm:$0xff] }
 0x534   : > { %v3773_v51 = vadd.f32 %v8274_v6, %v3741_v5  ;;  %v3543_v53 = vpop.f32.mrf.mxu1  ;;  %5001 = vmatprep.subr.mxu1 %v4127_v41  ;;  %v4161_v42 = vld [vmem:[%s8817_s10 + $0x1e0] sm:$0xff]  ;;  %v4159_v45 = vld [vmem:[%s8817_s10 + $0x1d0] sm:$0xff]  ;;  %v4158_v11 = vld [vmem:[%s8817_s10 + $0x1c8] sm:$0xff] }
 0x535   : > { %v3810_v3 = vmax.f32 %v3790_v29, %v3792_v23  ;;  %v3774_v59 = vadd.f32 %v8266_v55, %v3742_v13  ;;  %v3566_v19 = vadd.f32 %v3543_v53, %v3388_v4  ;;  %v3743_v47 = vadd.f32 %v3717_v7, %v3565_v8  ;;  %4970 = vmatprep.mubr.msk.f32.mxu1 %vm3836_vm2, %v3809_v49  ;;  %v4162_v7 = vld [vmem:[%s8817_s10 + $0x1e8] sm:$0xff]  ;;  %v4117_v41 = vld [vmem:[%s8817_s10 + $0x80] sm:$0xff]  ;;  %v4155_v8 = vld [vmem:[%s8817_s10 + $0x1b0] sm:$0xff] }
 0x536   : > { %v3793_v35 = vmax.f32 %v3773_v51, 0.0  ;;  %4979 = vmatprep.mubr.msk.f32.mxu0 %vm3836_vm2, %v3809_v49  ;;  %v3545_v60 = vpop.f32.mrf.mxu1  ;;  %5002 = vmatpush3.msra.mxu1 %v4111_v54  ;;  %v4146_v29 = vld [vmem:[%s8817_s10 + $0x168] sm:$0xff]  ;;  %v4101_v9 = vld [vmem:[%s8817_s10] sm:$0xff]  ;;  %v4156_v49 = vld [vmem:[%s8817_s10 + $0x1b8] sm:$0xff] }
 0x537   : > { %v3794_v21 = vmax.f32 %v3774_v59, 0.0  ;;  %v3775_v26 = vadd.f32 %v8274_v6, %v3743_v47  ;;  %v3567_v36 = vadd.f32 %v3545_v60, %v3389_v48  ;;  %v3744_v57 = vadd.f32 %v3721_v0, %v3566_v19  ;;  %3952 = vmatmul.mubr.f32.gmra.mxu1 %v3808_v27  ;;  %4078 = vmatmul.mubr.f32.gmra.mxu0 %v3808_v27  ;;  %v4118_v27 = vld [vmem:[%s8817_s10 + $0x88] sm:$0xff]  ;;  %v4141_v4 = vld [vmem:[%s8817_s10 + $0x140] sm:$0xff]  ;;  %v4139_v13 = vld [vmem:[%s8817_s10 + $0x130] sm:$0xff] }
 0x538   : > { %v3811_v56 = vmax.f32 %v3791_v25, %v3793_v35  ;;  %5003 = vmatprep.subr.mxu1 %v4126_v37  ;;  %5030 = vmatprep.subr.mxu0 %v4162_v7  ;;  %v4143_v25 = vld [vmem:[%s8817_s10 + $0x150] sm:$0xff]  ;;  %v4142_v5 = vld [vmem:[%s8817_s10 + $0x148] sm:$0xff]  ;;  %v9064_v0 = vmov 0.0   ;;  %v4153_v53 = vld [vmem:[%s8817_s10 + $0x1a0] sm:$0xff] }
 0x539   : > { %v3812_v1 = vmax.f32 %v3792_v23, %v3794_v21  ;;  %v3795_v20 = vmax.f32 %v3775_v26, 0.0  ;;  %v3776_v18 = vadd.f32 %v8266_v55, %v3744_v57  ;;  %v3745_v40 = vadd.f32 %v3723_v22, %v3567_v36  ;;  %5004 = vmatpush3.msra.mxu1 %v4110_v50  ;;  %v4109_v55 = vld [vmem:[%s8817_s10 + $0x40] sm:$0xff]  ;;  %5031 = vmatpush3.msra.mxu0 %v4146_v29  ;;  %v4140_v23 = vld [vmem:[%s8817_s10 + $0x138] sm:$0xff]  ;;  %v4154_v54 = vld [vmem:[%s8817_s10 + $0x1a8] sm:$0xff] }
 0x53a   : > { %4971 = vmatprep.mubr.msk.f32.mxu1 %vm3836_vm2, %v3811_v56  ;;  %4980 = vmatprep.mubr.msk.f32.mxu0 %vm3836_vm2, %v3811_v56  ;;  %v4138_v51 = vld [vmem:[%s8817_s10 + $0x128] sm:$0xff]  ;;  %v4152_v48 = vld [vmem:[%s8817_s10 + $0x198] sm:$0xff]  ;;  %v4151_v59 = vld [vmem:[%s8817_s10 + $0x190] sm:$0xff] }
 0x53b   : > { %v3813_v14 = vmax.f32 %v3793_v35, %v3795_v20  ;;  %v3796_v2 = vmax.f32 %v3776_v18, 0.0  ;;  %v3777_v17 = vadd.f32 %v8274_v6, %v3745_v40  ;;  %3956 = vmatmul.mubr.f32.gmra.mxu1 %v3810_v3  ;;  %4082 = vmatmul.mubr.f32.gmra.mxu0 %v3810_v3  ;;  %v4108_v6 = vld [vmem:[%s8817_s10 + $0x38] sm:$0xff]  ;;  %v4135_v19 = vld [vmem:[%s8817_s10 + $0x110] sm:$0xff]  ;;  %v4150_v47 = vld [vmem:[%s8817_s10 + $0x188] sm:$0xff] }
 0x53c   : > { %5005 = vmatprep.subr.mxu1 %v4125_v24  ;;  %5032 = vmatprep.subr.mxu0 %v4161_v42  ;;  %v4136_v3 = vld [vmem:[%s8817_s10 + $0x118] sm:$0xff]  ;;  %v4134_v37 = vld [vmem:[%s8817_s10 + $0x108] sm:$0xff]  ;;  %v4149_v35 = vld [vmem:[%s8817_s10 + $0x180] sm:$0xff] }
 0x53d   : > { %v3814_v44 = vmax.f32 %v3794_v21, %v3796_v2  ;;  %v3797_v16 = vmax.f32 %v3777_v17, 0.0  ;;  %4972 = vmatprep.mubr.msk.f32.mxu1 %vm3836_vm2, %v3813_v14  ;;  %4981 = vmatprep.mubr.msk.f32.mxu0 %vm3836_vm2, %v3813_v14  ;;  %v4133_v60 = vld [vmem:[%s8817_s10 + $0x100] sm:$0xff]  ;;  %v4180_v17 = vld [vmem:[%s8817_s10 + $0x278] sm:$0xff]  ;;  %v4175_v29 = vld [vmem:[%s8817_s10 + $0x250] sm:$0xff] }
 0x53e   : > { %5006 = vmatpush3.msra.mxu1 %v4109_v55  ;;  %5033 = vmatpush3.msra.mxu0 %v4145_v10 }
 0x53f   : > { %v3815_v12 = vmax.f32 %v3795_v20, %v3797_v16  ;;  %3961 = vmatmul.mubr.f32.gmra.mxu1 %v3812_v1  ;;  %4087 = vmatmul.mubr.f32.gmra.mxu0 %v3812_v1 }
 0x540   : > { %5007 = vmatprep.subr.mxu1 %v4124_v62  ;;  %5034 = vmatprep.subr.mxu0 %v4160_v31  ;;  %v4173_v31 = vld [vmem:[%s8817_s10 + $0x240] sm:$0xff] }
 0x541   : > { %4973 = vmatprep.mubr.msk.f32.mxu1 %vm3836_vm2, %v3815_v12  ;;  %4982 = vmatprep.mubr.msk.f32.mxu0 %vm3836_vm2, %v3815_v12  ;;  %v4178_v12 = vld [vmem:[%s8817_s10 + $0x268] sm:$0xff] }
 0x542   : > { %5008 = vmatpush3.msra.mxu1 %v4108_v6  ;;  %5035 = vmatpush3.msra.mxu0 %v4144_v46 }
 0x543   : > { %3965 = vmatmul.mubr.f32.gmra.mxu1 %v3814_v44  ;;  %4091 = vmatmul.mubr.f32.gmra.mxu0 %v3814_v44  ;;  %v4179_v44 = vld [vmem:[%s8817_s10 + $0x270] sm:$0xff] }
 0x544   : > { %5009 = vmatprep.subr.mxu1 %v4123_v34  ;;  %5036 = vmatprep.subr.mxu0 %v4159_v45  ;;  %v4177_v34 = vld [vmem:[%s8817_s10 + $0x260] sm:$0xff]  ;;  %v4172_v45 = vld [vmem:[%s8817_s10 + $0x238] sm:$0xff] }
 0x545   : > { %5010 = vmatpush3.msra.mxu1 %v4107_v30  ;;  %5037 = vmatpush3.msra.mxu0 %v4143_v25 }
 0x546   : > { %5011 = vmatprep.subr.mxu1 %v4122_v58  ;;  %5038 = vmatprep.subr.mxu0 %v4158_v11  ;;  %v4171_v11 = vld [vmem:[%s8817_s10 + $0x230] sm:$0xff] }
 0x547   : > { %5012 = vmatpush3.msra.mxu1 %v4106_v38  ;;  %5039 = vmatpush3.msra.mxu0 %v4142_v5  ;;  %v4176_v38 = vld [vmem:[%s8817_s10 + $0x258] sm:$0xff] }
 0x548   : > { %5013 = vmatprep.subr.mxu1 %v4121_v52  ;;  %5040 = vmatprep.subr.mxu0 %v4157_v63 }
 0x549   : > { %5014 = vmatpush3.msra.mxu1 %v4105_v15  ;;  %5041 = vmatpush3.msra.mxu0 %v4141_v4 }
 0x54a   : > { %5015 = vmatprep.subr.mxu1 %v4120_v32  ;;  %5042 = vmatprep.subr.mxu0 %v4156_v49  ;;  %v4174_v32 = vld [vmem:[%s8817_s10 + $0x248] sm:$0xff]  ;;  %v4169_v49 = vld [vmem:[%s8817_s10 + $0x220] sm:$0xff] }
 0x54b   : > { %5016 = vmatpush3.msra.mxu1 %v4104_v61  ;;  %5043 = vmatpush3.msra.mxu0 %v4140_v23 }
 0x54c   : > { %5017 = vmatprep.subr.mxu1 %v4119_v28  ;;  %5044 = vmatprep.subr.mxu0 %v4155_v8 }
 0x54d   : > { %5018 = vmatpush3.msra.mxu1 %v4103_v43  ;;  %5045 = vmatpush3.msra.mxu0 %v4139_v13  ;;  %v4168_v13 = vld [vmem:[%s8817_s10 + $0x218] sm:$0xff] }
 0x54e   : > { %5019 = vmatprep.subr.mxu1 %v4118_v27  ;;  %5046 = vmatprep.subr.mxu0 %v4154_v54 }
 0x54f   : > { %5020 = vmatpush3.msra.mxu1 %v4102_v39  ;;  %5047 = vmatpush3.msra.mxu0 %v4138_v51 }
 0x550   : > { %5021 = vmatprep.subr.mxu1 %v4117_v41  ;;  %5048 = vmatprep.subr.mxu0 %v4153_v53  ;;  %v4167_v53 = vld [vmem:[%s8817_s10 + $0x210] sm:$0xff] }
 0x551   : > { %5022 = vmatpush3.msra.mxu1 %v4101_v9  ;;  %5049 = vmatpush3.msra.mxu0 %v4137_v33  ;;  %v4170_v9 = vld [vmem:[%s8817_s10 + $0x228] sm:$0xff] }
 0x552   : > { %5112 = vmatprep.subr.mxu1 %v9064_v0  ;;  %5050 = vmatprep.subr.mxu0 %v4152_v48  ;;  %v4166_v33 = vld [vmem:[%s8817_s10 + $0x208] sm:$0xff]  ;;  %v4165_v48 = vld [vmem:[%s8817_s10 + $0x200] sm:$0xff] }
 0x553   : > { %5051 = vmatpush3.msra.mxu0 %v4136_v3 }
 0x554   : > { %5052 = vmatprep.subr.mxu0 %v4151_v59  ;;  %v4414_v59 = vld [vmem:[%s8819_s12 + $0x78] sm:$0xff] }
 0x555   : > { %5053 = vmatpush3.msra.mxu0 %v4135_v19  ;;  %v4413_v19 = vld [vmem:[%s8819_s12 + $0x70] sm:$0xff] }
 0x556   : > { %5054 = vmatprep.subr.mxu0 %v4150_v47  ;;  %v4412_v47 = vld [vmem:[%s8819_s12 + $0x68] sm:$0xff] }
 0x557   : > { %5055 = vmatpush3.msra.mxu0 %v4134_v37  ;;  %v4411_v37 = vld [vmem:[%s8819_s12 + $0x60] sm:$0xff] }
 0x558   : > { %5056 = vmatprep.subr.mxu0 %v4149_v35  ;;  %v4410_v35 = vld [vmem:[%s8819_s12 + $0x58] sm:$0xff] }
 0x559   : > { %5057 = vmatpush3.msra.mxu0 %v4133_v60  ;;  %v4409_v60 = vld [vmem:[%s8819_s12 + $0x50] sm:$0xff] }
 0x55a   : > { %5147 = vmatprep.subr.mxu0 %v9064_v0 }
 0x5e2   : > { %v3930_v22 = vpop.f32.mrf.mxu1  ;;  %v4056_v50 = vpop.f32.mrf.mxu0 }
 0x5e3   : > { %v4096_v24 = vmax.f32 %v3930_v22, %v4056_v50  ;;  %v4408_v22 = vld [vmem:[%s8819_s12 + $0x48] sm:$0xff]  ;;  %v4407_v50 = vld [vmem:[%s8819_s12 + $0x40] sm:$0xff] }
 0x5e4   : > { %v3932_v21 = vpop.f32.mrf.mxu1  ;;  %v4058_v26 = vpop.f32.mrf.mxu0 }
 0x5e5   : > { %v4406_v21 = vld [vmem:[%s8819_s12 + $0x38] sm:$0xff]  ;;  %v4405_v26 = vld [vmem:[%s8819_s12 + $0x30] sm:$0xff] }
 0x5e6   : > { %v3935_v36 = vpop.f32.mrf.mxu1  ;;  %v4061_v57 = vpop.f32.mrf.mxu0 }
 0x5e7   : > { %v4404_v36 = vld [vmem:[%s8819_s12 + $0x28] sm:$0xff]  ;;  %v4403_v57 = vld [vmem:[%s8819_s12 + $0x20] sm:$0xff] }
 0x5e8   : > { %v3936_v56 = vpop.f32.mrf.mxu1  ;;  %v4062_v1 = vpop.f32.mrf.mxu0 }
 0x5e9   : > { %v4402_v56 = vld [vmem:[%s8819_s12 + $0x18] sm:$0xff]  ;;  %v4401_v1 = vld [vmem:[%s8819_s12 + $0x10] sm:$0xff] }
 0x5ea   : > { %v3939_v20 = vpop.f32.mrf.mxu1  ;;  %v4065_v18 = vpop.f32.mrf.mxu0 }
 0x5eb   : > { %v4097_v40 = vmax.f32 %v3939_v20, %v4065_v18  ;;  %v4400_v20 = vld [vmem:[%s8819_s12 + $0x8] sm:$0xff]  ;;  %v4399_v18 = vld [vmem:[%s8819_s12] sm:$0xff] }
 0x5ec   : > { %v3941_v14 = vpop.f32.mrf.mxu1  ;;  %v4067_v2 = vpop.f32.mrf.mxu0 }
 0x5ed   : > { %4252 = vmatprep.mubr.f32.mxu1 %v4097_v40  ;;  %v4508_v40 = vld [vmem:[%s8821_s14 + $0x78] sm:$0xff]  ;;  %v4506_v14 = vld [vmem:[%s8821_s14 + $0x68] sm:$0xff]  ;;  %v4505_v2 = vld [vmem:[%s8821_s14 + $0x60] sm:$0xff] }
 0x5ee   : > { %v3944_v55 = vpop.f32.mrf.mxu1  ;;  %4253 = vmatmul.mubr.f32.vlgmr.msra.gmra.mxu1 %v4096_v24  ;;  %v4507_v24 = vld [vmem:[%s8821_s14 + $0x70] sm:$0xff] }
 0x5ef   : > { %v4070_v16 = vpop.f32.mrf.mxu0  ;;  %5113 = vmatpush3.msra.mxu1 %v4180_v17  ;;  %5144 = vmatprep.mubr.msk.f32.mxu1 %vm5321_vm3, %v9064_v0  ;;  %v4504_v17 = vld [vmem:[%s8821_s14 + $0x58] sm:$0xff]  ;;  %v4503_v55 = vld [vmem:[%s8821_s14 + $0x50] sm:$0xff] }
 0x5f0   : > { %5114 = vmatprep.subr.mxu1 %v9064_v0  ;;  %v3945_v62 = vpop.f32.mrf.mxu1  ;;  %v4501_v16 = vld [vmem:[%s8821_s14 + $0x40] sm:$0xff] }
 0x5f1   : > { %v4071_v6 = vpop.f32.mrf.mxu0  ;;  %5115 = vmatpush3.msra.mxu1 %v4179_v44  ;;  %v4502_v44 = vld [vmem:[%s8821_s14 + $0x48] sm:$0xff]  ;;  %v4500_v62 = vld [vmem:[%s8821_s14 + $0x38] sm:$0xff] }
 0x5f2   : > { %5116 = vmatprep.subr.mxu1 %v9064_v0  ;;  %v4498_v6 = vld [vmem:[%s8821_s14 + $0x28] sm:$0xff] }
 0x5f3   : > { %v3948_v30 = vpop.f32.mrf.mxu1  ;;  %v4074_v58 = vpop.f32.mrf.mxu0  ;;  %5117 = vmatpush3.msra.mxu1 %v4178_v12  ;;  %v4499_v12 = vld [vmem:[%s8821_s14 + $0x30] sm:$0xff] }
 0x5f4   : > { %5118 = vmatprep.subr.mxu1 %v9064_v0  ;;  %v4098_v27 = vmax.f32 %v3948_v30, %v4074_v58  ;;  %v4496_v30 = vld [vmem:[%s8821_s14 + $0x18] sm:$0xff] }
 0x5f5   : > { %v3950_v7 = vpop.f32.mrf.mxu1  ;;  %v4076_v52 = vpop.f32.mrf.mxu0  ;;  %5119 = vmatpush3.msra.mxu1 %v4177_v34  ;;  %v4497_v34 = vld [vmem:[%s8821_s14 + $0x20] sm:$0xff] }
 0x5f6   : > { %5120 = vmatprep.subr.mxu1 %v9064_v0 }
 0x5f7   : > { %v3953_v15 = vpop.f32.mrf.mxu1  ;;  %v4079_v42 = vpop.f32.mrf.mxu0  ;;  %5121 = vmatpush3.msra.mxu1 %v4176_v38 }
 0x5f8   : > { %5122 = vmatprep.subr.mxu1 %v9064_v0  ;;  %v4983_v15 = vld [vmem:[%s8818_s11] ss:$0 sm:$0xff] }
 0x5f9   : > { %v3954_v10 = vpop.f32.mrf.mxu1  ;;  %v4080_v61 = vpop.f32.mrf.mxu0  ;;  %5123 = vmatpush3.msra.mxu1 %v4175_v29 }
 0x5fa   : > { %5124 = vmatprep.subr.mxu1 %v9064_v0 }
 0x5fb   : > { %v3957_v28 = vpop.f32.mrf.mxu1  ;;  %v4083_v46 = vpop.f32.mrf.mxu0  ;;  %5125 = vmatpush3.msra.mxu1 %v4174_v32 }
 0x5fc   : > { %v4099_v43 = vmax.f32 %v3957_v28, %v4083_v46  ;;  %5126 = vmatprep.subr.mxu1 %v9064_v0 }
 0x5fd   : > { %v3959_v25 = vpop.f32.mrf.mxu1  ;;  %v4085_v39 = vpop.f32.mrf.mxu0  ;;  %5127 = vmatpush3.msra.mxu1 %v4173_v31 }
 0x5fe   : > { %4322 = vmatprep.mubr.f32.mxu0 %v4099_v43  ;;  %5128 = vmatprep.subr.mxu1 %v9064_v0  ;;  %v4495_v43 = vld [vmem:[%s8821_s14 + $0x10] sm:$0xff]  ;;  %v4984_v25 = vld [vmem:[%s8820_s13] ss:$0 sm:$0xff] }
 0x5ff   : > { %v3962_v41 = vpop.f32.mrf.mxu1  ;;  %v4088_v5 = vpop.f32.mrf.mxu0  ;;  %4323 = vmatmul.mubr.f32.vlgmr.msra.gmra.mxu0 %v4098_v27  ;;  %5129 = vmatpush3.msra.mxu1 %v4172_v45  ;;  %v4494_v45 = vld [vmem:[%s8821_s14 + $0x8] sm:$0xff]  ;;  %v4493_v27 = vld [vmem:[%s8821_s14] sm:$0xff] }
 0x600   : > { %5130 = vmatprep.subr.mxu1 %v9064_v0  ;;  %5179 = vmatprep.mubr.msk.f32.mxu0 %vm5321_vm3, %v9064_v0 }
 0x601   : > { %v3963_v63 = vpop.f32.mrf.mxu1  ;;  %v4089_v4 = vpop.f32.mrf.mxu0  ;;  %5131 = vmatpush3.msra.mxu1 %v4171_v11  ;;  %5148 = vmatpush3.msra.mxu0 %v4414_v59 }
 0x602   : > { %5132 = vmatprep.subr.mxu1 %v9064_v0  ;;  %5149 = vmatprep.subr.mxu0 %v9064_v0 }
 0x603   : > { %v3966_v23 = vpop.f32.mrf.mxu1  ;;  %v4092_v8 = vpop.f32.mrf.mxu0  ;;  %5133 = vmatpush3.msra.mxu1 %v4170_v9  ;;  %5150 = vmatpush3.msra.mxu0 %v4413_v19  ;;  %v4985_v9 = vld [vmem:[%s8822_s15] ss:$0 sm:$0xff] }
 0x604   : > { %5134 = vmatprep.subr.mxu1 %v9064_v0  ;;  %v4100_v3 = vmax.f32 %v3966_v23, %v4092_v8  ;;  %5151 = vmatprep.subr.mxu0 %v9064_v0 }
 0x605   : > { %v3968_v54 = vpop.f32.mrf.mxu1  ;;  %v4094_v51 = vpop.f32.mrf.mxu0  ;;  %5135 = vmatpush3.msra.mxu1 %v4169_v49  ;;  %5152 = vmatpush3.msra.mxu0 %v4412_v47 }
 0x606   : > { %5136 = vmatprep.subr.mxu1 %v9064_v0  ;;  %5153 = vmatprep.subr.mxu0 %v9064_v0 }
 0x607   : > { %5137 = vmatpush3.msra.mxu1 %v4168_v13  ;;  %5154 = vmatpush3.msra.mxu0 %v4411_v37 }
 0x608   : > { %5138 = vmatprep.subr.mxu1 %v9064_v0  ;;  %5155 = vmatprep.subr.mxu0 %v9064_v0 }
 0x609   : > { %5139 = vmatpush3.msra.mxu1 %v4167_v53  ;;  %5156 = vmatpush3.msra.mxu0 %v4410_v35 }
 0x60a   : > { %5140 = vmatprep.subr.mxu1 %v9064_v0  ;;  %5157 = vmatprep.subr.mxu0 %v9064_v0 }
 0x60b   : > { %5141 = vmatpush3.msra.mxu1 %v4166_v33  ;;  %5158 = vmatpush3.msra.mxu0 %v4409_v60 }
 0x60c   : > { %5142 = vmatprep.subr.mxu1 %v9064_v0  ;;  %5159 = vmatprep.subr.mxu0 %v9064_v0 }
 0x60d   : > { %5143 = vmatpush3.msra.mxu1 %v4165_v48  ;;  %5160 = vmatpush3.msra.mxu0 %v4408_v22 }
 0x60e   : > { %5145 = vmatmul.mubr.f32.vlgmr.msra.gmra.mxu1 %v4100_v3  ;;  %5182 = vmatprep.subr.mxu1 %v9064_v0 }
 0x60f   : > { %5214 = vmatprep.mubr.msk.f32.mxu1 %vm5321_vm3, %v9064_v0  ;;  %5161 = vmatprep.subr.mxu0 %v9064_v0 }
 0x610   : > { %5162 = vmatpush3.msra.mxu0 %v4407_v50  ;;  %5183 = vmatpush3.msra.mxu1 %v4508_v40 }
 0x611   : > { %5163 = vmatprep.subr.mxu0 %v9064_v0  ;;  %5184 = vmatprep.subr.mxu1 %v9064_v0 }
 0x612   : > { %5164 = vmatpush3.msra.mxu0 %v4406_v21  ;;  %5185 = vmatpush3.msra.mxu1 %v4507_v24 }
 0x613   : > { %5165 = vmatprep.subr.mxu0 %v9064_v0  ;;  %5186 = vmatprep.subr.mxu1 %v9064_v0 }
 0x614   : > { %5166 = vmatpush3.msra.mxu0 %v4405_v26  ;;  %5187 = vmatpush3.msra.mxu1 %v4506_v14 }
 0x615   : > { %5167 = vmatprep.subr.mxu0 %v9064_v0  ;;  %5188 = vmatprep.subr.mxu1 %v9064_v0 }
 0x616   : > { %5168 = vmatpush3.msra.mxu0 %v4404_v36  ;;  %5189 = vmatpush3.msra.mxu1 %v4505_v2 }
 0x617   : > { %5169 = vmatprep.subr.mxu0 %v9064_v0  ;;  %5190 = vmatprep.subr.mxu1 %v9064_v0 }
 0x618   : > { %5170 = vmatpush3.msra.mxu0 %v4403_v57  ;;  %5191 = vmatpush3.msra.mxu1 %v4504_v17 }
 0x619   : > { %5171 = vmatprep.subr.mxu0 %v9064_v0  ;;  %5192 = vmatprep.subr.mxu1 %v9064_v0 }
 0x61a   : > { %5172 = vmatpush3.msra.mxu0 %v4402_v56  ;;  %5193 = vmatpush3.msra.mxu1 %v4503_v55 }
 0x61b   : > { %5173 = vmatprep.subr.mxu0 %v9064_v0  ;;  %5194 = vmatprep.subr.mxu1 %v9064_v0 }
 0x61c   : > { %5174 = vmatpush3.msra.mxu0 %v4401_v1  ;;  %5195 = vmatpush3.msra.mxu1 %v4502_v44 }
 0x61d   : > { %5175 = vmatprep.subr.mxu0 %v9064_v0  ;;  %5196 = vmatprep.subr.mxu1 %v9064_v0 }
 0x61e   : > { %5176 = vmatpush3.msra.mxu0 %v4400_v20  ;;  %5197 = vmatpush3.msra.mxu1 %v4501_v16 }
 0x61f   : > { %5177 = vmatprep.subr.mxu0 %v9064_v0  ;;  %5198 = vmatprep.subr.mxu1 %v9064_v0 }
 0x620   : > { %5178 = vmatpush3.msra.mxu0 %v4399_v18  ;;  %5199 = vmatpush3.msra.mxu1 %v4500_v62 }
 0x621   : > { %5200 = vmatprep.subr.mxu1 %v9064_v0 }
 0x622   : > { %5201 = vmatpush3.msra.mxu1 %v4499_v12 }
 0x623   : > { %5202 = vmatprep.subr.mxu1 %v9064_v0 }
 0x624   : > { %5203 = vmatpush3.msra.mxu1 %v4498_v6 }
 0x625   : > { %5204 = vmatprep.subr.mxu1 %v9064_v0 }
 0x626   : > { %5205 = vmatpush3.msra.mxu1 %v4497_v34 }
 0x627   : > { %5206 = vmatprep.subr.mxu1 %v9064_v0 }
 0x628   : > { %5207 = vmatpush3.msra.mxu1 %v4496_v30 }
 0x629   : > { %5208 = vmatprep.subr.mxu1 %v9064_v0 }
 0x62a   : > { %5209 = vmatpush3.msra.mxu1 %v4495_v43 }
 0x62b   : > { %5210 = vmatprep.subr.mxu1 %v9064_v0 }
 0x62c   : > { %5211 = vmatpush3.msra.mxu1 %v4494_v45 }
 0x62d   : > { %5212 = vmatprep.subr.mxu1 %v9064_v0 }
 0x62e   : > { %5213 = vmatpush3.msra.mxu1 %v4493_v27 }
 0x6ae   : > { %v5023_v58 = vpop.f32.mrf.mxu1 }
 0x6b0   : > { %v5024_v7 = vpop.f32.mrf.mxu1 }
 0x6b1   : > { %v5025_v29 = vadd.f32 %v5024_v7, %v5023_v58 }
 0x6b3   : > { %v4255_v32 = vadd.f32 %v5025_v29, %v4983_v15 }
 0x6bf   : > { %v5058_v38 = vpop.f32.mrf.mxu0 }
 0x6c1   : > { %v5059_v52 = vpop.f32.mrf.mxu0 }
 0x6c2   : > { %v5060_v42 = vadd.f32 %v5059_v52, %v5058_v38 }
 0x6c4   : > { %v4325_v10 = vadd.f32 %v5060_v42, %v4255_v32 }
 0x6ce   : > { %v4394_v61 = vpop.f32.mrf.mxu1 }
 0x6cf   : > { %v4395_v31 = vadd.f32 %v4394_v61, %v4325_v10 }
 0x6d0   : > { %v5146_v28 = vpop.f32.mrf.mxu1 }
 0x6d1   : > { %v4398_v46 = vmax.f32 %v4395_v31, 0.0 }
 0x6d3   : > { %5180 = vmatmul.mubr.f32.vlgmr.msra.gmra.mxu0 %v4398_v46 }
 0x793   : > { %v4488_v39 = vpop.f32.mrf.mxu0 }
 0x794   : > { %v4489_v11 = vadd.f32 %v4984_v25, %v4488_v39 }
 0x795   : > { %v5181_v41 = vpop.f32.mrf.mxu0 }
 0x796   : > { %v4492_v5 = vmax.f32 %v4489_v11, 0.0 }
 0x798   : > { %5215 = vmatmul.mubr.f32.vlgmr.msra.gmra.mxu1 %v4492_v5 }
 0x858   : > { %v4582_v0 = vpop.f32.mrf.mxu1 }
 0x859   : > { %v4583_v63 = vadd.f32 %v4985_v9, %v4582_v0 }
 0x85a   : > { %v5216_v4 = vpop.f32.mrf.mxu1 }
 0x85b   : > { %4586 = vst [vmem:[%s514_s17] sm:$0xff] %v4583_v63 }
 0x85c   : > { %5271 = shalt.err (!%p5268_p3)
}
 0x85d   : > { %s5272_s30 = scalar_lea.hbm %s8772_s23, 128  ;;  %s5276_s17 = scalar_lea.hbm %s9066_s26, 256 }
 0x85e   : > { %p5273_p4 = scmp.ne.s32.totalorder %s8772_s23, %s5272_s30  ;;  %p5277_p9 = scmp.lt.s32.totalorder %s8772_s23, %s9066_s26 }
 0x85f   : > { %p5278_p10 = scmp.lt.s32.totalorder %s5276_s17, %s5272_s30 }
 0x860   : > { %p5274_p7 = pnand %p5273_p4, %p5446_p5 }
 0x861   : > { %p5279_p11 = por %p5278_p10, %p5277_p9 }
 0x862   : > { %p5275_p8 = pneg %p5274_p7 }
 0x864   : > { %p5280_p12 = pnand %p5279_p11, %p5275_p8 }
 0x866   : > { %5283 = shalt.err (!%p5280_p12)
}
 0x867   : > { %5217 = dma.vmem_to_hbm [thread:$0]  (%p5446_p5), %s4602_s18, 128, %s8772_s23, %s4588_s20  }
 0x868 PF: > { %s9067_s1 = sld [smem:[#allocation7_spill]] }
 0x869   : > { %s9068_s24 = sld [smem:[#allocation5_spill]] }
 0x86e   : > { %p5223_p13 = scmp.ge.s32.totalorder %s9067_s1, 2 }
 0x86f   : > { %s4613_s25 = sand.u32 1, %s9068_s24  }
 0x870   : > { %p5220_p0 = pnand %p5223_p13, %p5450_p6  ;;  %s4614_s21 = scalar_lea.sflag [#allocation3], %s4613_s25 }
 0x872   : > { %p5221_p1 = pneg %p5220_p0 }
 0x874   : > { %5301 = dma.done.wait (%p5221_p1), %s4614_s21, 128  }
 0x875   : > { %5303 = vsyncadd (%p5221_p1), %s4614_s21, 4294967168  ;;  %s9070_s24 = sld [smem:[#allocation8_spill]]  ;;  %s9073_s21 = smov %s5310_s22 }
 0x876   : > { %s9071_s30 = sld [smem:[#allocation6_spill]] }
 0x877   : > { %s9072_s23 = sld [smem:[#allocation9_spill]] }
 0x87b   : > { %p26_p2 = scmp.ge.s32.totalorder %s9070_s24, 4  }
 0x87c   : > { %s9074_s22 = smov %s9071_s30 }
 0x87d   :  { %28 = sbr.rel (!%p26_p2) target bundleno = 7 (0x7), region = 127 }
 0x882   :  { %4619 = vsyncpa [#allocation3], 1 }
 0x883   :  { %4621 = vsyncpa [#allocation3 + $0x1], 1 }

</bundles_post_ra>
